<compile_context>
chip_gen: v5e
topology: v5e:2x2
jax: 0.10.0
libtpu: 0.0.40
codegen_flags: <defaults>
</compile_context>

<pallas_src>
import jax
import jax.numpy as jnp
from jax.experimental import pallas as pl
from jax.experimental.pallas import tpu as pltpu

N_LAYERS = 2                   # CRP(N=2)
MATMUL_DTYPE = jnp.bfloat16    # MXU operand dtype (accumulation stays f32)
PADL = 8                       # left halo width of pool_pad (sublane aligned)


def _crp_kernel(x_ref, w_ref, o_ref, pool_pad):
    # x_ref/o_ref : (1, H, W, C) f32
    # w_ref       : (N_LAYERS, 3, 3*C, C) bf16, rows ordered (kw, ci)
    # pool_pad    : VMEM (H+4, PADL+W+2, C) f32 -- (-inf)-halo pool staging;
    #               interior starts at column PADL (sublane aligned).
    _, H, W, C = x_ref.shape
    WP = PADL + W + 2
    NEG = jnp.float32(-jnp.inf)

    # ---- halo init (strips only; the interior is overwritten every layer).
    # Re-done each grid step: cheap, and safe under megacore batch splitting.
    pool_pad[:, 0:PADL, :] = jnp.full((H + 4, PADL, C), NEG, jnp.float32)
    pool_pad[:, PADL + W:WP, :] = jnp.full((H + 4, 2, C), NEG, jnp.float32)
    pool_pad[0:2, :, :] = jnp.full((2, WP, C), NEG, jnp.float32)
    pool_pad[H + 2:H + 4, :, :] = jnp.full((2, WP, C), NEG, jnp.float32)

    # ---- hoisted constants (don't rebuild broadcasts inside the layer loop)
    zcol = jnp.zeros((H, 1, C), jnp.float32)
    zrow = jnp.zeros((1, W, 3 * C), MATMUL_DTYPE)

    # ---- ret = relu(x); residual accumulated directly in the output block.
    relu = jnp.maximum(x_ref[0], 0.0)                       # (H, W, C) f32
    o_ref[0] = relu
    pool_pad[2:2 + H, PADL:PADL + W, :] = relu              # aligned store

    for layer in range(N_LAYERS):                           # static unroll
        # ---- MaxPool2d(kernel=5, stride=1, padding=2), separable H then W --
        hpool = pool_pad[0:H, :, :]                         # (H, WP, C)
        for dh in range(1, 5):                              # H shifts: free
            hpool = jnp.maximum(hpool, pool_pad[dh:dh + H, :, :])
        pooled = hpool[:, PADL - 2:PADL - 2 + W, :]
        for dw in range(1, 5):                              # 4 sublane shifts
            pooled = jnp.maximum(
                pooled, hpool[:, PADL - 2 + dw:PADL - 2 + dw + W, :])

        # ---- Conv2d(C, C, 3, stride=1, padding=1, bias=False) ----
        # Build the kw-fused operand ONCE per layer: cat[h, w, kw*C + ci] =
        # pooled_zero_padded[h, w + kw - 1, ci]; cast to bf16 once.
        left = jnp.concatenate([zcol, pooled[:, :W - 1, :]], axis=1)
        right = jnp.concatenate([pooled[:, 1:, :], zcol], axis=1)
        cat = jnp.concatenate([left, pooled, right],
                              axis=-1).astype(MATMUL_DTYPE)  # (H, W, 3C)

        # Per-kh patches are leading-axis (row) shifts of `cat` -- no sublane
        # work here.  Accumulate the three matmuls in values (no scratch RMW).
        acc = None
        for kh in range(3):
            if kh == 0:
                patch = jnp.concatenate([zrow, cat[:H - 1]], axis=0)
            elif kh == 1:
                patch = cat
            else:
                patch = jnp.concatenate([cat[1:], zrow], axis=0)
            contrib = jnp.dot(patch.reshape(H * W, 3 * C), w_ref[layer, kh],
                              preferred_element_type=jnp.float32)
            acc = contrib if acc is None else acc + contrib
        cur = acc.reshape(H, W, C)                           # f32 layer output

        o_ref[0] = o_ref[0] + cur                            # residual add
        if layer + 1 < N_LAYERS:                             # stage next input
            pool_pad[2:2 + H, PADL:PADL + W, :] = cur


def _pack_weights(weights_oihw, dtype):
    """OIHW (Cout, Cin, 3, 3) -> (N_LAYERS, 3, 3*Cin, Cout), fused along kw.

    w_packed[l, kh, kw * Cin + ci, co] == w_l[co, ci, kh, kw], matching the
    in-kernel lane order of the kw-fused operand.
    """
    packed = []
    for w in weights_oihw:
        c_out, c_in = w.shape[0], w.shape[1]
        hwio = jnp.transpose(w, (2, 3, 1, 0))            # (kh, kw, ci, co)
        packed.append(hwio.reshape(3, 3 * c_in, c_out))
    return jnp.stack(packed, axis=0).astype(dtype)


def crp_pallas(x_nchw, w1_oihw, w2_oihw):
    """CRP forward. x: (B, C, H, W) f32; w1/w2: (C, C, 3, 3) f32 (OIHW)."""
    B, C, H, W = x_nchw.shape
    x = jnp.transpose(x_nchw, (0, 2, 3, 1))              # NCHW -> NHWC
    w_packed = _pack_weights((w1_oihw, w2_oihw), MATMUL_DTYPE)

    out_nhwc = pl.pallas_call(
        _crp_kernel,
        out_shape=jax.ShapeDtypeStruct((B, H, W, C), x.dtype),
        grid_spec=pltpu.PrefetchScalarGridSpec(
            num_scalar_prefetch=0,
            grid=(B,),
            in_specs=[
                pl.BlockSpec((1, H, W, C), lambda b: (b, 0, 0, 0)),
                pl.BlockSpec((N_LAYERS, 3, 3 * C, C), lambda b: (0, 0, 0, 0)),
            ],
            out_specs=pl.BlockSpec((1, H, W, C), lambda b: (b, 0, 0, 0)),
            scratch_shapes=[
                pltpu.VMEM((H + 4, PADL + W + 2, C), jnp.float32),  # pool halo
            ],
        ),
        compiler_params=pltpu.CompilerParams(
            dimension_semantics=("parallel",),
            vmem_limit_bytes=32 * 1024 * 1024),
    )(x, w_packed)
    return jnp.transpose(out_nhwc, (0, 3, 1, 2))         # NHWC -> NCHW


def crp_reference(x_nchw, w1_oihw, w2_oihw):
    """Pure-JAX reference (NCHW, torch semantics), quantizing the conv
    operands to bf16 exactly where the kernel does, so a tight tolerance
    meaningfully validates the indexing."""
    ret = jnp.maximum(x_nchw, 0.0)
    cur = ret
    for w in (w1_oihw, w2_oihw):
        pooled = jax.lax.reduce_window(
            cur, -jnp.inf, jax.lax.max,
            window_dimensions=(1, 1, 5, 5), window_strides=(1, 1, 1, 1),
            padding=((0, 0), (0, 0), (2, 2), (2, 2)))
        pooled_q = pooled.astype(jnp.bfloat16).astype(jnp.float32)
        w_q = w.astype(jnp.bfloat16).astype(jnp.float32)
        cur = jax.lax.conv_general_dilated(
            pooled_q, w_q, window_strides=(1, 1), padding=((1, 1), (1, 1)),
            dimension_numbers=("NCHW", "OIHW", "NCHW"))
        ret = ret + cur
    return ret


if __name__ == "__main__":
    B, C, H, W = 2, 4, 16, 16
    key = jax.random.PRNGKey(0)
    kx, k1, k2 = jax.random.split(key, 3)
    x = jax.random.normal(kx, (B, C, H, W), dtype=jnp.float32)
    # PyTorch OIHW conv weights: (Cout, Cin, 3, 3), bias=False.
    w1 = 0.1 * jax.random.normal(k1, (C, C, 3, 3), dtype=jnp.float32)
    w2 = 0.1 * jax.random.normal(k2, (C, C, 3, 3), dtype=jnp.float32)

    out = crp_pallas(x, w1, w2)
    out = jax.block_until_ready(out)

    ref = crp_reference(x, w1, w2)
    assert out.shape == ref.shape == (B, C, H, W)
    # Reference quantizes the conv operands to bf16 like the kernel; the
    # remaining slack covers f32 accumulation-order differences (MXU vs XLA
    # conv) propagating through the layer-1 bf16 requantization.
    assert jnp.allclose(out, ref, rtol=2e-3, atol=2e-3), (
        "mismatch vs reference, max abs err = %e"
        % float(jnp.max(jnp.abs(out - ref))))

    print("KERNEL_OK")
</pallas_src>

<mosaic_0001>
module attributes {stable_mosaic.version = 11 : i64} {
  func.func @_crp_kernel(%arg0: i32, %arg1: memref<1x16x16x4xf32, #tpu.memory_space<vmem>>, %arg2: memref<2x3x12x4xbf16, #tpu.memory_space<vmem>>, %arg3: memref<1x16x16x4xf32, #tpu.memory_space<vmem>>, %arg4: memref<20x26x4xf32, #tpu.memory_space<vmem>>) attributes {dimension_semantics = [#tpu.dimension_semantics<parallel>], iteration_bounds = array<i64: 2>, scalar_prefetch = 0 : i64, scratch_operands = 1 : i64, tpu.core_type = #tpu.core_type<tc>, window_params = [{transform_indices = @transform_0, window_bounds = array<i64: 1, 16, 16, 4>}, {pipeline_mode = #tpu.pipeline_mode<synchronous>, transform_indices = @transform_1, window_bounds = array<i64: 2, 3, 12, 4>}, {transform_indices = @transform_2, window_bounds = array<i64: 1, 16, 16, 4>}]} {
    %cst = arith.constant 0xFF800000 : f32
    %0 = vector.broadcast %cst : f32 to vector<20x8x4xf32>
    %c0 = arith.constant 0 : index
    %c0_0 = arith.constant 0 : index
    %c0_1 = arith.constant 0 : index
    %1 = vector.load %arg4[%c0, %c0_0, %c0_1] : memref<20x26x4xf32, #tpu.memory_space<vmem>>, vector<20x8x4xf32>
    tpu.vector_store %arg4[%c0, %c0_0, %c0_1], %0 {strides = array<i32>} : memref<20x26x4xf32, #tpu.memory_space<vmem>>, vector<20x8x4xf32>,
    %cst_2 = arith.constant 0xFF800000 : f32
    %2 = vector.broadcast %cst_2 : f32 to vector<20x2x4xf32>
    %c0_3 = arith.constant 0 : index
    %c24 = arith.constant 24 : index
    %c0_4 = arith.constant 0 : index
    %3 = vector.load %arg4[%c0_3, %c24, %c0_4] : memref<20x26x4xf32, #tpu.memory_space<vmem>>, vector<20x2x4xf32>
    tpu.vector_store %arg4[%c0_3, %c24, %c0_4], %2 {strides = array<i32>} : memref<20x26x4xf32, #tpu.memory_space<vmem>>, vector<20x2x4xf32>,
    %cst_5 = arith.constant 0xFF800000 : f32
    %4 = vector.broadcast %cst_5 : f32 to vector<2x26x4xf32>
    %c0_6 = arith.constant 0 : index
    %c0_7 = arith.constant 0 : index
    %c0_8 = arith.constant 0 : index
    %5 = vector.load %arg4[%c0_6, %c0_7, %c0_8] : memref<20x26x4xf32, #tpu.memory_space<vmem>>, vector<2x26x4xf32>
    tpu.vector_store %arg4[%c0_6, %c0_7, %c0_8], %4 {strides = array<i32>} : memref<20x26x4xf32, #tpu.memory_space<vmem>>, vector<2x26x4xf32>,
    %cst_9 = arith.constant 0xFF800000 : f32
    %6 = vector.broadcast %cst_9 : f32 to vector<2x26x4xf32>
    %c18 = arith.constant 18 : index
    %c0_10 = arith.constant 0 : index
    %c0_11 = arith.constant 0 : index
    %7 = vector.load %arg4[%c18, %c0_10, %c0_11] : memref<20x26x4xf32, #tpu.memory_space<vmem>>, vector<2x26x4xf32>
    tpu.vector_store %arg4[%c18, %c0_10, %c0_11], %6 {strides = array<i32>} : memref<20x26x4xf32, #tpu.memory_space<vmem>>, vector<2x26x4xf32>,
    %cst_12 = arith.constant 0.000000e+00 : f32
    %8 = vector.broadcast %cst_12 : f32 to vector<16x1x4xf32>
    %cst_13 = arith.constant 0.000000e+00 : bf16
    %9 = vector.broadcast %cst_13 : bf16 to vector<1x16x12xbf16>
    %c0_14 = arith.constant 0 : index
    %c0_15 = arith.constant 0 : index
    %c0_16 = arith.constant 0 : index
    %c0_17 = arith.constant 0 : index
    %10 = vector.load %arg1[%c0_14, %c0_15, %c0_16, %c0_17] : memref<1x16x16x4xf32, #tpu.memory_space<vmem>>, vector<1x16x16x4xf32>
    %11 = vector.shape_cast %10 : vector<1x16x16x4xf32> to vector<16x16x4xf32>
    %cst_18 = arith.constant 0.000000e+00 : f32
    %12 = vector.broadcast %cst_18 : f32 to vector<16x16x4xf32>
    %13 = arith.maximumf %11, %12 : vector<16x16x4xf32>
    %c0_19 = arith.constant 0 : index
    %c0_20 = arith.constant 0 : index
    %c0_21 = arith.constant 0 : index
    %c0_22 = arith.constant 0 : index
    %14 = vector.load %arg3[%c0_19, %c0_20, %c0_21, %c0_22] : memref<1x16x16x4xf32, #tpu.memory_space<vmem>>, vector<1x16x16x4xf32>
    %15 = vector.shape_cast %14 : vector<1x16x16x4xf32> to vector<16x16x4xf32>
    %16 = vector.shape_cast %13 : vector<16x16x4xf32> to vector<1x16x16x4xf32>
    tpu.vector_store %arg3[%c0_19, %c0_20, %c0_21, %c0_22], %16 {strides = array<i32>} : memref<1x16x16x4xf32, #tpu.memory_space<vmem>>, vector<1x16x16x4xf32>,
    %c2 = arith.constant 2 : index
    %c8 = arith.constant 8 : index
    %c0_23 = arith.constant 0 : index
    %17 = vector.load %arg4[%c2, %c8, %c0_23] : memref<20x26x4xf32, #tpu.memory_space<vmem>>, vector<16x16x4xf32>
    tpu.vector_store %arg4[%c2, %c8, %c0_23], %13 {strides = array<i32>} : memref<20x26x4xf32, #tpu.memory_space<vmem>>, vector<16x16x4xf32>,
    %c0_24 = arith.constant 0 : index
    %c0_25 = arith.constant 0 : index
    %c0_26 = arith.constant 0 : index
    %18 = vector.load %arg4[%c0_24, %c0_25, %c0_26] : memref<20x26x4xf32, #tpu.memory_space<vmem>>, vector<16x26x4xf32>
    %c1 = arith.constant 1 : index
    %c0_27 = arith.constant 0 : index
    %c0_28 = arith.constant 0 : index
    %19 = vector.load %arg4[%c1, %c0_27, %c0_28] : memref<20x26x4xf32, #tpu.memory_space<vmem>>, vector<16x26x4xf32>
    %20 = arith.maximumf %18, %19 : vector<16x26x4xf32>
    %c2_29 = arith.constant 2 : index
    %c0_30 = arith.constant 0 : index
    %c0_31 = arith.constant 0 : index
    %21 = vector.load %arg4[%c2_29, %c0_30, %c0_31] : memref<20x26x4xf32, #tpu.memory_space<vmem>>, vector<16x26x4xf32>
    %22 = arith.maximumf %20, %21 : vector<16x26x4xf32>
    %c3 = arith.constant 3 : index
    %c0_32 = arith.constant 0 : index
    %c0_33 = arith.constant 0 : index
    %23 = vector.load %arg4[%c3, %c0_32, %c0_33] : memref<20x26x4xf32, #tpu.memory_space<vmem>>, vector<16x26x4xf32>
    %24 = arith.maximumf %22, %23 : vector<16x26x4xf32>
    %c4 = arith.constant 4 : index
    %c0_34 = arith.constant 0 : index
    %c0_35 = arith.constant 0 : index
    %25 = vector.load %arg4[%c4, %c0_34, %c0_35] : memref<20x26x4xf32, #tpu.memory_space<vmem>>, vector<16x26x4xf32>
    %26 = arith.maximumf %24, %25 : vector<16x26x4xf32>
    %27 = vector.extract_strided_slice %26 {offsets = [0, 6, 0], sizes = [16, 16, 4], strides = [1, 1, 1]} : vector<16x26x4xf32> to vector<16x16x4xf32>
    %28 = vector.extract_strided_slice %26 {offsets = [0, 7, 0], sizes = [16, 16, 4], strides = [1, 1, 1]} : vector<16x26x4xf32> to vector<16x16x4xf32>
    %29 = arith.maximumf %27, %28 : vector<16x16x4xf32>
    %30 = vector.extract_strided_slice %26 {offsets = [0, 8, 0], sizes = [16, 16, 4], strides = [1, 1, 1]} : vector<16x26x4xf32> to vector<16x16x4xf32>
    %31 = arith.maximumf %29, %30 : vector<16x16x4xf32>
    %32 = vector.extract_strided_slice %26 {offsets = [0, 9, 0], sizes = [16, 16, 4], strides = [1, 1, 1]} : vector<16x26x4xf32> to vector<16x16x4xf32>
    %33 = arith.maximumf %31, %32 : vector<16x16x4xf32>
    %34 = vector.extract_strided_slice %26 {offsets = [0, 10, 0], sizes = [16, 16, 4], strides = [1, 1, 1]} : vector<16x26x4xf32> to vector<16x16x4xf32>
    %35 = arith.maximumf %33, %34 : vector<16x16x4xf32>
    %36 = vector.extract_strided_slice %35 {offsets = [0, 0, 0], sizes = [16, 15, 4], strides = [1, 1, 1]} : vector<16x16x4xf32> to vector<16x15x4xf32>
    %37 = tpu.concatenate %8, %36 in 1 : vector<16x1x4xf32>, vector<16x15x4xf32> -> vector<16x16x4xf32>
    %38 = vector.extract_strided_slice %35 {offsets = [0, 1, 0], sizes = [16, 15, 4], strides = [1, 1, 1]} : vector<16x16x4xf32> to vector<16x15x4xf32>
    %39 = tpu.concatenate %38, %8 in 1 : vector<16x15x4xf32>, vector<16x1x4xf32> -> vector<16x16x4xf32>
    %40 = tpu.concatenate %37, %35, %39 in 2 : vector<16x16x4xf32>, vector<16x16x4xf32>, vector<16x16x4xf32> -> vector<16x16x12xf32>
    %41 = arith.truncf %40 : vector<16x16x12xf32> to vector<16x16x12xbf16>
    %42 = vector.extract_strided_slice %41 {offsets = [0, 0, 0], sizes = [15, 16, 12], strides = [1, 1, 1]} : vector<16x16x12xbf16> to vector<15x16x12xbf16>
    %43 = tpu.concatenate %9, %42 in 0 : vector<1x16x12xbf16>, vector<15x16x12xbf16> -> vector<16x16x12xbf16>
    %44 = vector.shape_cast %43 : vector<16x16x12xbf16> to vector<256x12xbf16>
    %c0_36 = arith.constant 0 : index
    %c0_37 = arith.constant 0 : index
    %c0_38 = arith.constant 0 : index
    %c0_39 = arith.constant 0 : index
    %45 = vector.load %arg2[%c0_36, %c0_37, %c0_38, %c0_39] : memref<2x3x12x4xbf16, #tpu.memory_space<vmem>>, vector<1x1x12x4xbf16>
    %46 = vector.shape_cast %45 : vector<1x1x12x4xbf16> to vector<12x4xbf16>
    %cst_40 = arith.constant dense<0.000000e+00> : vector<256x4xf32>
    %47 = tpu.matmul %44, %46, %cst_40 {dimension_numbers = #tpu.dot_dimension_numbers<[1], [0], [0], [1], [0, 0, 1, 1], [], []>} : vector<256x12xbf16>, vector<12x4xbf16>, vector<256x4xf32> -> vector<256x4xf32>
    %48 = vector.shape_cast %41 : vector<16x16x12xbf16> to vector<256x12xbf16>
    %c0_41 = arith.constant 0 : index
    %c1_42 = arith.constant 1 : index
    %c0_43 = arith.constant 0 : index
    %c0_44 = arith.constant 0 : index
    %49 = vector.load %arg2[%c0_41, %c1_42, %c0_43, %c0_44] : memref<2x3x12x4xbf16, #tpu.memory_space<vmem>>, vector<1x1x12x4xbf16>
    %50 = vector.shape_cast %49 : vector<1x1x12x4xbf16> to vector<12x4xbf16>
    %cst_45 = arith.constant dense<0.000000e+00> : vector<256x4xf32>
    %51 = tpu.matmul %48, %50, %cst_45 {dimension_numbers = #tpu.dot_dimension_numbers<[1], [0], [0], [1], [0, 0, 1, 1], [], []>} : vector<256x12xbf16>, vector<12x4xbf16>, vector<256x4xf32> -> vector<256x4xf32>
    %52 = arith.addf %47, %51 : vector<256x4xf32>
    %53 = vector.extract_strided_slice %41 {offsets = [1, 0, 0], sizes = [15, 16, 12], strides = [1, 1, 1]} : vector<16x16x12xbf16> to vector<15x16x12xbf16>
    %54 = tpu.concatenate %53, %9 in 0 : vector<15x16x12xbf16>, vector<1x16x12xbf16> -> vector<16x16x12xbf16>
    %55 = vector.shape_cast %54 : vector<16x16x12xbf16> to vector<256x12xbf16>
    %c0_46 = arith.constant 0 : index
    %c2_47 = arith.constant 2 : index
    %c0_48 = arith.constant 0 : index
    %c0_49 = arith.constant 0 : index
    %56 = vector.load %arg2[%c0_46, %c2_47, %c0_48, %c0_49] : memref<2x3x12x4xbf16, #tpu.memory_space<vmem>>, vector<1x1x12x4xbf16>
    %57 = vector.shape_cast %56 : vector<1x1x12x4xbf16> to vector<12x4xbf16>
    %cst_50 = arith.constant dense<0.000000e+00> : vector<256x4xf32>
    %58 = tpu.matmul %55, %57, %cst_50 {dimension_numbers = #tpu.dot_dimension_numbers<[1], [0], [0], [1], [0, 0, 1, 1], [], []>} : vector<256x12xbf16>, vector<12x4xbf16>, vector<256x4xf32> -> vector<256x4xf32>
    %59 = arith.addf %52, %58 : vector<256x4xf32>
    %60 = vector.shape_cast %59 : vector<256x4xf32> to vector<16x16x4xf32>
    %c0_51 = arith.constant 0 : index
    %c0_52 = arith.constant 0 : index
    %c0_53 = arith.constant 0 : index
    %c0_54 = arith.constant 0 : index
    %61 = vector.load %arg3[%c0_51, %c0_52, %c0_53, %c0_54] : memref<1x16x16x4xf32, #tpu.memory_space<vmem>>, vector<1x16x16x4xf32>
    %62 = vector.shape_cast %61 : vector<1x16x16x4xf32> to vector<16x16x4xf32>
    %63 = arith.addf %62, %60 : vector<16x16x4xf32>
    %c0_55 = arith.constant 0 : index
    %c0_56 = arith.constant 0 : index
    %c0_57 = arith.constant 0 : index
    %c0_58 = arith.constant 0 : index
    %64 = vector.load %arg3[%c0_55, %c0_56, %c0_57, %c0_58] : memref<1x16x16x4xf32, #tpu.memory_space<vmem>>, vector<1x16x16x4xf32>
    %65 = vector.shape_cast %64 : vector<1x16x16x4xf32> to vector<16x16x4xf32>
    %66 = vector.shape_cast %63 : vector<16x16x4xf32> to vector<1x16x16x4xf32>
    tpu.vector_store %arg3[%c0_55, %c0_56, %c0_57, %c0_58], %66 {strides = array<i32>} : memref<1x16x16x4xf32, #tpu.memory_space<vmem>>, vector<1x16x16x4xf32>,
    %c2_59 = arith.constant 2 : index
    %c8_60 = arith.constant 8 : index
    %c0_61 = arith.constant 0 : index
    %67 = vector.load %arg4[%c2_59, %c8_60, %c0_61] : memref<20x26x4xf32, #tpu.memory_space<vmem>>, vector<16x16x4xf32>
    tpu.vector_store %arg4[%c2_59, %c8_60, %c0_61], %60 {strides = array<i32>} : memref<20x26x4xf32, #tpu.memory_space<vmem>>, vector<16x16x4xf32>,
    %c0_62 = arith.constant 0 : index
    %c0_63 = arith.constant 0 : index
    %c0_64 = arith.constant 0 : index
    %68 = vector.load %arg4[%c0_62, %c0_63, %c0_64] : memref<20x26x4xf32, #tpu.memory_space<vmem>>, vector<16x26x4xf32>
    %c1_65 = arith.constant 1 : index
    %c0_66 = arith.constant 0 : index
    %c0_67 = arith.constant 0 : index
    %69 = vector.load %arg4[%c1_65, %c0_66, %c0_67] : memref<20x26x4xf32, #tpu.memory_space<vmem>>, vector<16x26x4xf32>
    %70 = arith.maximumf %68, %69 : vector<16x26x4xf32>
    %c2_68 = arith.constant 2 : index
    %c0_69 = arith.constant 0 : index
    %c0_70 = arith.constant 0 : index
    %71 = vector.load %arg4[%c2_68, %c0_69, %c0_70] : memref<20x26x4xf32, #tpu.memory_space<vmem>>, vector<16x26x4xf32>
    %72 = arith.maximumf %70, %71 : vector<16x26x4xf32>
    %c3_71 = arith.constant 3 : index
    %c0_72 = arith.constant 0 : index
    %c0_73 = arith.constant 0 : index
    %73 = vector.load %arg4[%c3_71, %c0_72, %c0_73] : memref<20x26x4xf32, #tpu.memory_space<vmem>>, vector<16x26x4xf32>
    %74 = arith.maximumf %72, %73 : vector<16x26x4xf32>
    %c4_74 = arith.constant 4 : index
    %c0_75 = arith.constant 0 : index
    %c0_76 = arith.constant 0 : index
    %75 = vector.load %arg4[%c4_74, %c0_75, %c0_76] : memref<20x26x4xf32, #tpu.memory_space<vmem>>, vector<16x26x4xf32>
    %76 = arith.maximumf %74, %75 : vector<16x26x4xf32>
    %77 = vector.extract_strided_slice %76 {offsets = [0, 6, 0], sizes = [16, 16, 4], strides = [1, 1, 1]} : vector<16x26x4xf32> to vector<16x16x4xf32>
    %78 = vector.extract_strided_slice %76 {offsets = [0, 7, 0], sizes = [16, 16, 4], strides = [1, 1, 1]} : vector<16x26x4xf32> to vector<16x16x4xf32>
    %79 = arith.maximumf %77, %78 : vector<16x16x4xf32>
    %80 = vector.extract_strided_slice %76 {offsets = [0, 8, 0], sizes = [16, 16, 4], strides = [1, 1, 1]} : vector<16x26x4xf32> to vector<16x16x4xf32>
    %81 = arith.maximumf %79, %80 : vector<16x16x4xf32>
    %82 = vector.extract_strided_slice %76 {offsets = [0, 9, 0], sizes = [16, 16, 4], strides = [1, 1, 1]} : vector<16x26x4xf32> to vector<16x16x4xf32>
    %83 = arith.maximumf %81, %82 : vector<16x16x4xf32>
    %84 = vector.extract_strided_slice %76 {offsets = [0, 10, 0], sizes = [16, 16, 4], strides = [1, 1, 1]} : vector<16x26x4xf32> to vector<16x16x4xf32>
    %85 = arith.maximumf %83, %84 : vector<16x16x4xf32>
    %86 = vector.extract_strided_slice %85 {offsets = [0, 0, 0], sizes = [16, 15, 4], strides = [1, 1, 1]} : vector<16x16x4xf32> to vector<16x15x4xf32>
    %87 = tpu.concatenate %8, %86 in 1 : vector<16x1x4xf32>, vector<16x15x4xf32> -> vector<16x16x4xf32>
    %88 = vector.extract_strided_slice %85 {offsets = [0, 1, 0], sizes = [16, 15, 4], strides = [1, 1, 1]} : vector<16x16x4xf32> to vector<16x15x4xf32>
    %89 = tpu.concatenate %88, %8 in 1 : vector<16x15x4xf32>, vector<16x1x4xf32> -> vector<16x16x4xf32>
    %90 = tpu.concatenate %87, %85, %89 in 2 : vector<16x16x4xf32>, vector<16x16x4xf32>, vector<16x16x4xf32> -> vector<16x16x12xf32>
    %91 = arith.truncf %90 : vector<16x16x12xf32> to vector<16x16x12xbf16>
    %92 = vector.extract_strided_slice %91 {offsets = [0, 0, 0], sizes = [15, 16, 12], strides = [1, 1, 1]} : vector<16x16x12xbf16> to vector<15x16x12xbf16>
    %93 = tpu.concatenate %9, %92 in 0 : vector<1x16x12xbf16>, vector<15x16x12xbf16> -> vector<16x16x12xbf16>
    %94 = vector.shape_cast %93 : vector<16x16x12xbf16> to vector<256x12xbf16>
    %c1_77 = arith.constant 1 : index
    %c0_78 = arith.constant 0 : index
    %c0_79 = arith.constant 0 : index
    %c0_80 = arith.constant 0 : index
    %95 = vector.load %arg2[%c1_77, %c0_78, %c0_79, %c0_80] : memref<2x3x12x4xbf16, #tpu.memory_space<vmem>>, vector<1x1x12x4xbf16>
    %96 = vector.shape_cast %95 : vector<1x1x12x4xbf16> to vector<12x4xbf16>
    %cst_81 = arith.constant dense<0.000000e+00> : vector<256x4xf32>
    %97 = tpu.matmul %94, %96, %cst_81 {dimension_numbers = #tpu.dot_dimension_numbers<[1], [0], [0], [1], [0, 0, 1, 1], [], []>} : vector<256x12xbf16>, vector<12x4xbf16>, vector<256x4xf32> -> vector<256x4xf32>
    %98 = vector.shape_cast %91 : vector<16x16x12xbf16> to vector<256x12xbf16>
    %c1_82 = arith.constant 1 : index
    %c1_83 = arith.constant 1 : index
    %c0_84 = arith.constant 0 : index
    %c0_85 = arith.constant 0 : index
    %99 = vector.load %arg2[%c1_82, %c1_83, %c0_84, %c0_85] : memref<2x3x12x4xbf16, #tpu.memory_space<vmem>>, vector<1x1x12x4xbf16>
    %100 = vector.shape_cast %99 : vector<1x1x12x4xbf16> to vector<12x4xbf16>
    %cst_86 = arith.constant dense<0.000000e+00> : vector<256x4xf32>
    %101 = tpu.matmul %98, %100, %cst_86 {dimension_numbers = #tpu.dot_dimension_numbers<[1], [0], [0], [1], [0, 0, 1, 1], [], []>} : vector<256x12xbf16>, vector<12x4xbf16>, vector<256x4xf32> -> vector<256x4xf32>
    %102 = arith.addf %97, %101 : vector<256x4xf32>
    %103 = vector.extract_strided_slice %91 {offsets = [1, 0, 0], sizes = [15, 16, 12], strides = [1, 1, 1]} : vector<16x16x12xbf16> to vector<15x16x12xbf16>
    %104 = tpu.concatenate %103, %9 in 0 : vector<15x16x12xbf16>, vector<1x16x12xbf16> -> vector<16x16x12xbf16>
    %105 = vector.shape_cast %104 : vector<16x16x12xbf16> to vector<256x12xbf16>
    %c1_87 = arith.constant 1 : index
    %c2_88 = arith.constant 2 : index
    %c0_89 = arith.constant 0 : index
    %c0_90 = arith.constant 0 : index
    %106 = vector.load %arg2[%c1_87, %c2_88, %c0_89, %c0_90] : memref<2x3x12x4xbf16, #tpu.memory_space<vmem>>, vector<1x1x12x4xbf16>
    %107 = vector.shape_cast %106 : vector<1x1x12x4xbf16> to vector<12x4xbf16>
    %cst_91 = arith.constant dense<0.000000e+00> : vector<256x4xf32>
    %108 = tpu.matmul %105, %107, %cst_91 {dimension_numbers = #tpu.dot_dimension_numbers<[1], [0], [0], [1], [0, 0, 1, 1], [], []>} : vector<256x12xbf16>, vector<12x4xbf16>, vector<256x4xf32> -> vector<256x4xf32>
    %109 = arith.addf %102, %108 : vector<256x4xf32>
    %110 = vector.shape_cast %109 : vector<256x4xf32> to vector<16x16x4xf32>
    %c0_92 = arith.constant 0 : index
    %c0_93 = arith.constant 0 : index
    %c0_94 = arith.constant 0 : index
    %c0_95 = arith.constant 0 : index
    %111 = vector.load %arg3[%c0_92, %c0_93, %c0_94, %c0_95] : memref<1x16x16x4xf32, #tpu.memory_space<vmem>>, vector<1x16x16x4xf32>
    %112 = vector.shape_cast %111 : vector<1x16x16x4xf32> to vector<16x16x4xf32>
    %113 = arith.addf %112, %110 : vector<16x16x4xf32>
    %c0_96 = arith.constant 0 : index
    %c0_97 = arith.constant 0 : index
    %c0_98 = arith.constant 0 : index
    %c0_99 = arith.constant 0 : index
    %114 = vector.load %arg3[%c0_96, %c0_97, %c0_98, %c0_99] : memref<1x16x16x4xf32, #tpu.memory_space<vmem>>, vector<1x16x16x4xf32>
    %115 = vector.shape_cast %114 : vector<1x16x16x4xf32> to vector<16x16x4xf32>
    %116 = vector.shape_cast %113 : vector<16x16x4xf32> to vector<1x16x16x4xf32>
    tpu.vector_store %arg3[%c0_96, %c0_97, %c0_98, %c0_99], %116 {strides = array<i32>} : memref<1x16x16x4xf32, #tpu.memory_space<vmem>>, vector<1x16x16x4xf32>,
    return
  }
  func.func @transform_0(%arg0: i32) -> (i32, i32, i32, i32) {
    %c0_i32 = arith.constant 0 : i32
    %c0_i32_0 = arith.constant 0 : i32
    %c0_i32_1 = arith.constant 0 : i32
    %c0_i32_2 = arith.constant 0 : i32
    return %arg0, %c0_i32, %c0_i32_0, %c0_i32_1 : i32, i32, i32, i32
  }
  func.func @transform_1(%arg0: i32) -> (i32, i32, i32, i32) {
    %c0_i32 = arith.constant 0 : i32
    %c0_i32_0 = arith.constant 0 : i32
    %c0_i32_1 = arith.constant 0 : i32
    %c0_i32_2 = arith.constant 0 : i32
    %c0_i32_3 = arith.constant 0 : i32
    return %c0_i32, %c0_i32_0, %c0_i32_1, %c0_i32_2 : i32, i32, i32, i32
  }
  func.func @transform_2(%arg0: i32) -> (i32, i32, i32, i32) {
    %c0_i32 = arith.constant 0 : i32
    %c0_i32_0 = arith.constant 0 : i32
    %c0_i32_1 = arith.constant 0 : i32
    %c0_i32_2 = arith.constant 0 : i32
    return %arg0, %c0_i32, %c0_i32_0, %c0_i32_1 : i32, i32, i32, i32
  }
}

</mosaic_0001>

<bundles_post_ra>
// kernel: tpu_custom_call.1
= control target key start
LH: loop header
LB: loop body
LE: loop exit
PB: predicated region body
PF: predicated region fallthrough
CT: control target
= control target key end

     0   :  { %s6034_s9 = smov 0   ;;  %s9397_s0 = inlined_call_operand.vmem [shape: f32[2,16,16,4], index: 0, kind: input, shape index: {}]   ;;  %s9398_s1 = inlined_call_operand.vmem [shape: bf16[2,3,12,4], index: 1, kind: input, shape index: {}]   ;;  %s9399_s2 = inlined_call_operand.vmem [shape: f32[2,16,16,4], index: 2, kind: output, shape index: {}]  }
   0x1 LB: > { %s5520_s10 = sadd.s32 4294967295, %s6013_s9   ;;  %p5524_p0 = scmp.ge.s32.totalorder %s6013_s9, 1  ;;  %s6013_s9 = sphi %s6034_s9, %s12_s9  }
   0x2   : > { %p112_p1 = scmp.lt.s32.totalorder %s6013_s9, 3 }
   0x4   : > { %p113_p2 = pnand %p5524_p0, %p112_p1 }
   0x6   : > { %116 = sbr.rel (%p113_p2) target bundleno = 1218 (0x4c2), region = 28 }
   0xb   : > { %p134_p3 = scmp.lt.s32.totalorder %s5520_s10, 1  ;;  %vm145_vm0 = vcmask 31744   ;;  %v6015_v0 = vmov -inf   ;;  %vm166_vm1 = vcmask 25600   ;;  %vm960_vm2 = vcmask 1046528   ;;  %s6016_s15 = smov 4  }
   0xc   : > { %154 = vst.msk [vmem:[#allocation2 + $0x100] sm:$0xff] %vm145_vm0, %v6015_v0  ;;  %vm1137_vm3 = vcmask 1045504   ;;  %vm1298_vm4 = vcmask 1044480   ;;  %vm1475_vm5 = vcmask 1043456   ;;  %vm1942_vm6 = vcmask 1041408   ;;  %s6017_s19 = smov 8  }
   0xd   : > { %s9532_s10 = smov (!%p134_p3, %s5520_s10), 1  ;;  %155 = vst.msk [vmem:[#allocation2 + $0x120] sm:$0xff] %vm145_vm0, %v6015_v0  ;;  %vm1813_vm7 = vcmask 1040384   ;;  %vm1700_vm8 = vcmask 1042432   ;;  %vm2263_vm9 = vcmask 64512   ;;  %vm2418_vm10 = vcmask 97280  }
   0xe   : > { %156 = vst.msk [vmem:[#allocation2 + $0x140] sm:$0xff] %vm145_vm0, %v6015_v0  ;;  %s5659_s11 = sshll.u32 %s9532_s10, 8 }
   0xf   : > { %157 = vst.msk [vmem:[#allocation2 + $0x160] sm:$0xff] %vm145_vm0, %v6015_v0  ;;  %s6058_s14 = scalar_lea.vmem %s9397_s0, %s5659_s11  ;;  %s6278_s18 = scalar_lea.vmem %s9399_s2, %s5659_s11 }
  0x10   : > { %158 = vst.msk [vmem:[#allocation2 + $0x180] sm:$0xff] %vm145_vm0, %v6015_v0  ;;  %v6065_v1 = vld [vmem:[%s6058_s14 + $0x60] sm:$0xff]  ;;  %v6068_v2 = vld [vmem:[%s6058_s14 + $0x68] sm:$0xff]  ;;  %v6071_v3 = vld [vmem:[%s6058_s14 + $0x70] sm:$0xff] }
  0x11   : > { %175 = vst.msk [vmem:[#allocation2 + $0x118] sm:$0x3] %vm166_vm1, %v6015_v0  ;;  %v6076_v4 = vld [vmem:[%s6058_s14 + $0x78] sm:$0xff]  ;;  %v248_v5 = vmax.f32 %v6065_v1, 0.0  ;;  %v6082_v6 = vld [vmem:[%s6058_s14 + $0x80] sm:$0xff]  ;;  %v249_v7 = vmax.f32 %v6068_v2, 0.0 }
  0x12   : > { %176 = vst.msk [vmem:[#allocation2 + $0x138] sm:$0x3] %vm166_vm1, %v6015_v0  ;;  %v6088_v8 = vld [vmem:[%s6058_s14 + $0x88] sm:$0xff]  ;;  %v250_v9 = vmax.f32 %v6071_v3, 0.0  ;;  %v6094_v10 = vld [vmem:[%s6058_s14 + $0x90] sm:$0xff]  ;;  %v251_v11 = vmax.f32 %v6076_v4, 0.0 }
  0x13   : > { %177 = vst.msk [vmem:[#allocation2 + $0x158] sm:$0x3] %vm166_vm1, %v6015_v0  ;;  %v6098_v12 = vld [vmem:[%s6058_s14 + $0x98] sm:$0xff]  ;;  %v252_v13 = vmax.f32 %v6082_v6, 0.0  ;;  %v365_v14 = vld [vmem:[#allocation2 + $0x100] sm:$0xff]  ;;  %v253_v17 = vmax.f32 %v6088_v8, 0.0 }
  0x14   : > { %178 = vst.msk [vmem:[#allocation2 + $0x178] sm:$0x3] %vm166_vm1, %v6015_v0  ;;  %v6104_v15 = vld [vmem:[#allocation2 + $0x120] sm:$0xff]  ;;  %v6117_v20 = vld [vmem:[%s6058_s14 + $0xa8] sm:$0xff]  ;;  %v254_v21 = vmax.f32 %v6094_v10, 0.0  ;;  %v255_v23 = vmax.f32 %v6098_v12, 0.0 }
  0x15   : > { %179 = vst.msk [vmem:[#allocation2 + $0x198] sm:$0x3] %vm166_vm1, %v6015_v0  ;;  %v6107_v16 = vld [vmem:[%s6058_s14 + $0xa0] sm:$0xff]  ;;  %v494_v18 = vmax.f32 %v365_v14, %v6104_v15  ;;  %v257_v29 = vmax.f32 %v6117_v20, 0.0  ;;  %v6302_v1 = vld [vmem:[%s6058_s14 + $0xb0] sm:$0xff] }
  0x16   : > { %313 = vst.msk [vmem:[#allocation2 + $0x108] sm:$0xff] %vm145_vm0, %v248_v5  ;;  %v6114_v19 = vld [vmem:[#allocation2 + $0x140] sm:$0xff]  ;;  %v256_v25 = vmax.f32 %v6107_v16, 0.0 }
  0x17   : > { %314 = vst.msk [vmem:[#allocation2 + $0x110] sm:$0xff] %vm145_vm0, %v249_v7  ;;  %v622_v28 = vmax.f32 %v494_v18, %v6114_v19  ;;  %v6136_v30 = vld [vmem:[#allocation2 + $0x160] sm:$0xff] }
  0x18   : > { %315 = vst.msk [vmem:[#allocation2 + $0x128] sm:$0xff] %vm145_vm0, %v250_v9  ;;  %v368_v22 = vld [vmem:[#allocation2 + $0x118] sm:$0x3]  ;;  %v6153_v37 = vld [vmem:[#allocation2 + $0x180] sm:$0xff] }
  0x19   : > { %316 = vst.msk [vmem:[#allocation2 + $0x130] sm:$0xff] %vm145_vm0, %v251_v11  ;;  %v433_v24 = vld [vmem:[#allocation2 + $0x138] sm:$0x3]  ;;  %v751_v35 = vmax.f32 %v622_v28, %v6136_v30 }
  0x1a   : > { %317 = vst.msk [vmem:[#allocation2 + $0x148] sm:$0xff] %vm145_vm0, %v252_v13  ;;  %v497_v26 = vmax.f32 %v368_v22, %v433_v24  ;;  %v561_v27 = vld [vmem:[#allocation2 + $0x158] sm:$0x3] }
  0x1b   : > { %318 = vst.msk [vmem:[#allocation2 + $0x150] sm:$0xff] %vm145_vm0, %v253_v17  ;;  %v690_v33 = vld [vmem:[#allocation2 + $0x178] sm:$0x3]  ;;  %v880_v46 = vmax.f32 %v751_v35, %v6153_v37 }
  0x1c   : > { %319 = vst.msk [vmem:[#allocation2 + $0x168] sm:$0xff] %vm145_vm0, %v254_v21  ;;  %v625_v31 = vmax.f32 %v497_v26, %v561_v27  ;;  %v819_v43 = vld [vmem:[#allocation2 + $0x198] sm:$0x3] }
  0x1d   : > { %320 = vst.msk [vmem:[#allocation2 + $0x170] sm:$0xff] %vm145_vm0, %v255_v23  ;;  %v366_v32 = vld [vmem:[#allocation2 + $0x108] sm:$0xff]  ;;  %v1001_v56 = vrot.slane %v880_v46, 1 }
  0x1e   : > { %321 = vst.msk [vmem:[#allocation2 + $0x188] sm:$0xff] %vm145_vm0, %v256_v25  ;;  %v367_v34 = vld [vmem:[#allocation2 + $0x110] sm:$0xff]  ;;  %v754_v40 = vmax.f32 %v625_v31, %v690_v33 }
  0x1f   : > { %322 = vst.msk [vmem:[#allocation2 + $0x190] sm:$0xff] %vm145_vm0, %v257_v29  ;;  %v6151_v36 = vld [vmem:[#allocation2 + $0x128] sm:$0xff] }
  0x20   : > { %v6155_v38 = vld [vmem:[#allocation2 + $0x130] sm:$0xff]  ;;  %v495_v39 = vmax.f32 %v366_v32, %v6151_v36  ;;  %146 = vst.msk [vmem:[#allocation2] sm:$0xff] %vm145_vm0, %v6015_v0  ;;  %v883_v51 = vmax.f32 %v754_v40, %v819_v43 }
  0x21   : > { %v496_v41 = vmax.f32 %v367_v34, %v6155_v38  ;;  %v6161_v42 = vld [vmem:[#allocation2 + $0x148] sm:$0xff]  ;;  %147 = vst.msk [vmem:[#allocation2 + $0x20] sm:$0xff] %vm145_vm0, %v6015_v0 }
  0x22   : > { %v6165_v44 = vld [vmem:[#allocation2 + $0x150] sm:$0xff]  ;;  %v623_v45 = vmax.f32 %v495_v39, %v6161_v42  ;;  %148 = vst.msk [vmem:[#allocation2 + $0x40] sm:$0xff] %vm145_vm0, %v6015_v0  ;;  %v1342_v60 = vrot.slane %v883_v51, 3  ;;  %v1519_v26 = vrot.slane %v883_v51, 4  ;;  %v499_v3 = vmax.f32 %v6151_v36, %v6161_v42 }
  0x23   : > { %v624_v47 = vmax.f32 %v496_v41, %v6165_v44  ;;  %v6172_v48 = vld [vmem:[#allocation2 + $0x168] sm:$0xff]  ;;  %149 = vst.msk [vmem:[#allocation2 + $0x60] sm:$0xff] %vm145_vm0, %v6015_v0  ;;  %v500_v4 = vmax.f32 %v6155_v38, %v6165_v44  ;;  %v258_v38 = vmax.f32 %v6302_v1, 0.0 }
  0x24   : > { %v6176_v49 = vld [vmem:[#allocation2 + $0x170] sm:$0xff]  ;;  %v752_v50 = vmax.f32 %v623_v45, %v6172_v48  ;;  %150 = vst.msk [vmem:[#allocation2 + $0x80] sm:$0xff] %vm145_vm0, %v6015_v0 }
  0x25   : > { %v753_v52 = vmax.f32 %v624_v47, %v6176_v49  ;;  %v6182_v53 = vld [vmem:[#allocation2 + $0x188] sm:$0xff]  ;;  %151 = vst.msk [vmem:[#allocation2 + $0xa0] sm:$0xff] %vm145_vm0, %v6015_v0 }
  0x26   : > { %v6186_v54 = vld [vmem:[#allocation2 + $0x190] sm:$0xff]  ;;  %v881_v55 = vmax.f32 %v752_v50, %v6182_v53  ;;  %152 = vst.msk [vmem:[#allocation2 + $0xc0] sm:$0xff] %vm145_vm0, %v6015_v0 }
  0x27   : > { %v882_v57 = vmax.f32 %v753_v52, %v6186_v54  ;;  %153 = vst.msk [vmem:[#allocation2 + $0xe0] sm:$0xff] %vm145_vm0, %v6015_v0 }
  0x28   : > { %v1002_v58 = vrot.slane %v881_v55, 1  ;;  %v1162_v59 = vrot.slane %v881_v55, 2  ;;  %159 = vst.msk [vmem:[#allocation2 + $0x1a0] sm:$0xff] %vm145_vm0, %v6015_v0  ;;  %v1339_v63 = vrot.slane %v881_v55, 3  ;;  %v1516_v22 = vrot.slane %v881_v55, 4 }
  0x29   : > { %v1004_v61 = vrot.slane %v882_v57, 1  ;;  %v1163_v62 = vrot.slane %v882_v57, 2  ;;  %v1340_v14 = vrot.slane %v882_v57, 3  ;;  %160 = vst.msk [vmem:[#allocation2 + $0x1c0] sm:$0xff] %vm145_vm0, %v6015_v0  ;;  %v1517_v24 = vrot.slane %v882_v57, 4 }
  0x2a   : > { %v1003_v18 = vsel %vm960_vm2, %v1001_v56, %v1002_v58  ;;  %161 = vst.msk [vmem:[#allocation2 + $0x1e0] sm:$0xff] %vm145_vm0, %v6015_v0 }
  0x2b   : > { %v1005_v27 = vsel %vm960_vm2, %v1002_v58, %v1004_v61  ;;  %v1113_v28 = vmax.f32 %v880_v46, %v1003_v18  ;;  %v1115_v31 = vmax.f32 %v882_v57, %v1004_v61  ;;  %v1164_v32 = vsel %vm1137_vm3, %v1162_v59, %v1163_v62  ;;  %162 = vst.msk [vmem:[#allocation2 + $0x200] sm:$0xff] %vm145_vm0, %v6015_v0 }
  0x2c   : > { %v1114_v33 = vmax.f32 %v881_v55, %v1005_v27  ;;  %v1343_v34 = vsel %vm1298_vm4, %v1340_v14, %v1342_v60  ;;  %163 = vst.msk [vmem:[#allocation2 + $0x220] sm:$0xff] %vm145_vm0, %v6015_v0  ;;  %v1341_v40 = vsel %vm1298_vm4, %v1339_v63, %v1340_v14  ;;  %v1520_v43 = vsel %vm1475_vm5, %v1517_v24, %v1519_v26 }
  0x2d   : > { %v1258_v35 = vmax.f32 %v1113_v28, %v1162_v59  ;;  %v1260_v39 = vmax.f32 %v1115_v31, %v1163_v62  ;;  %164 = vst.msk [vmem:[#allocation2 + $0x240] sm:$0xff] %vm145_vm0, %v6015_v0  ;;  %v1518_v47 = vsel %vm1475_vm5, %v1516_v22, %v1517_v24  ;;  %v372_v62 = vld [vmem:[#allocation2 + $0x138] sm:$0x3]  ;;  %v498_v14 = vmax.f32 %v6104_v15, %v6114_v19 }
  0x2e   : > { %v1259_v41 = vmax.f32 %v1114_v33, %v1164_v32  ;;  %165 = vst.msk [vmem:[#allocation2 + $0x260] sm:$0xff] %vm145_vm0, %v6015_v0  ;;  %v565_v19 = vld [vmem:[#allocation2 + $0x178] sm:$0x3]  ;;  %v506_v26 = vmax.f32 %v6136_v30, %v6153_v37 }
  0x2f   : > { %v1451_v45 = vmax.f32 %v1258_v35, %v1339_v63  ;;  %v1453_v46 = vmax.f32 %v1260_v39, %v1343_v34  ;;  %167 = vst.msk [vmem:[#allocation2 + $0x18] sm:$0x3] %vm166_vm1, %v6015_v0  ;;  %v437_v63 = vld [vmem:[#allocation2 + $0x158] sm:$0x3]  ;;  %v626_v18 = vmax.f32 %v498_v14, %v6136_v30  ;;  %v6320_v30 = vld [vmem:[#allocation2 + $0x1a0] sm:$0xff]  ;;  %v627_v39 = vmax.f32 %v499_v3, %v6172_v48 }
  0x30   : > { %v1452_v50 = vmax.f32 %v1259_v41, %v1341_v40  ;;  %168 = vst.msk [vmem:[#allocation2 + $0x38] sm:$0x3] %vm166_vm1, %v6015_v0  ;;  %v501_v15 = vmax.f32 %v372_v62, %v437_v63  ;;  %v445_v24 = vld [vmem:[#allocation2 + $0x198] sm:$0x3]  ;;  %v510_v42 = vmax.f32 %v6153_v37, %v6320_v30  ;;  %v6340_v31 = vld [vmem:[#allocation2 + $0x1c0] sm:$0xff]  ;;  %v628_v40 = vmax.f32 %v500_v4, %v6176_v49 }
  0x31   : > { %v6219_v51 = vmax.f32 %v1451_v45, %v1516_v22  ;;  %v6221_v52 = vmax.f32 %v1453_v46, %v1520_v43  ;;  %169 = vst.msk [vmem:[#allocation2 + $0x58] sm:$0x3] %vm166_vm1, %v6015_v0  ;;  %v380_v22 = vld [vmem:[#allocation2 + $0x178] sm:$0x3]  ;;  %v6361_v43 = vld [vmem:[%s6058_s14 + $0xc0] sm:$0xff]  ;;  %v6371_v46 = vld [vmem:[%s6058_s14 + $0xc8] sm:$0xff]  ;;  %v756_v62 = vmax.f32 %v627_v39, %v6182_v53  ;;  %v514_v3 = vmax.f32 %v6320_v30, %v6340_v31 }
  0x32   : > { %v6225_v55 = vmax.f32 %v1452_v50, %v1518_v47  ;;  %170 = vst.msk [vmem:[#allocation2 + $0x78] sm:$0x3] %vm166_vm1, %v6015_v0  ;;  %v629_v27 = vmax.f32 %v501_v15, %v565_v19  ;;  %v509_v2 = vmax.f32 %v380_v22, %v445_v24  ;;  %v384_v32 = vld [vmem:[#allocation2 + $0x198] sm:$0x3]  ;;  %v638_v35 = vmax.f32 %v510_v42, %v6340_v31  ;;  %v6373_v50 = vld [vmem:[#allocation2 + $0x1e0] sm:$0xff] }
  0x33   : > { %v1983_v56 = vrot.slane %v6219_v51, 6  ;;  %v1986_v57 = vrot.slane %v6221_v52, 6  ;;  %171 = vst.msk [vmem:[#allocation2 + $0x98] sm:$0x3] %vm166_vm1, %v6015_v0  ;;  %v1870_v6 = vrot.slane %v6219_v51, 7  ;;  %v1873_v36 = vrot.slane %v6221_v52, 7 }
  0x34   : > { %v1984_v58 = vrot.slane %v6225_v55, 6  ;;  %172 = vst.msk [vmem:[#allocation2 + $0xb8] sm:$0x3] %vm166_vm1, %v6015_v0  ;;  %v757_v63 = vmax.f32 %v628_v40, %v6186_v54  ;;  %v6389_v15 = vld [vmem:[#allocation2 + $0x200] sm:$0xff]  ;;  %v261_v22 = vmax.f32 %v6371_v46, 0.0 }
  0x35   : > { %173 = vst.msk [vmem:[#allocation2 + $0xd8] sm:$0x3] %vm166_vm1, %v6015_v0 }
  0x36   : > { %v1985_v59 = vsel %vm1942_vm6, %v1983_v56, %v1984_v58  ;;  %v1987_v60 = vsel %vm1942_vm6, %v1984_v58, %v1986_v57  ;;  %174 = vst.msk [vmem:[#allocation2 + $0xf8] sm:$0x3] %vm166_vm1, %v6015_v0  ;;  %v6378_v57 = vld [vmem:[%s6058_s14 + $0xd0] sm:$0xff]  ;;  %v6381_v58 = vld [vmem:[%s6058_s14 + $0xd8] sm:$0xff] }
  0x37   : > { %v5681_v61 = vpack.i.bf16 %v1987_v60, %v1985_v59  ;;  %180 = vst.msk [vmem:[#allocation2 + $0x1b8] sm:$0x3] %vm166_vm1, %v6015_v0  ;;  %v767_v60 = vmax.f32 %v638_v35, %v6373_v50 }
  0x38   : > { %181 = vst.msk [vmem:[#allocation2 + $0x1d8] sm:$0x3] %vm166_vm1, %v6015_v0 }
  0x39   : > { %5682 = vrot.lane.b32.xlu0 %v5681_v61, %s6016_s15  ;;  %182 = vst.msk [vmem:[#allocation2 + $0x1f8] sm:$0x3] %vm166_vm1, %v6015_v0 }
  0x3a   : > { %183 = vst.msk [vmem:[#allocation2 + $0x218] sm:$0x3] %vm166_vm1, %v6015_v0 }
  0x3b   : > { %184 = vst.msk [vmem:[#allocation2 + $0x238] sm:$0x3] %vm166_vm1, %v6015_v0 }
  0x3c   : > { %185 = vst.msk [vmem:[#allocation2 + $0x258] sm:$0x3] %vm166_vm1, %v6015_v0 }
  0x3d   : > { %186 = vst.msk [vmem:[#allocation2 + $0x278] sm:$0x3] %vm166_vm1, %v6015_v0 }
  0x3e   : > { %188 = vst.msk [vmem:[#allocation2 + $0x8] sm:$0xff] %vm145_vm0, %v6015_v0  ;;  %v449_v33 = vld [vmem:[#allocation2 + $0x1b8] sm:$0x3] }
  0x3f   : > { %189 = vst.msk [vmem:[#allocation2 + $0x10] sm:$0xff] %vm145_vm0, %v6015_v0  ;;  %v702_v34 = vld [vmem:[#allocation2 + $0x1d8] sm:$0x3] }
  0x40   : > { %192 = vst.msk [vmem:[#allocation2 + $0x28] sm:$0xff] %vm145_vm0, %v6015_v0  ;;  %v577_v41 = vld [vmem:[#allocation2 + $0x1d8] sm:$0x3] }
  0x41   : > { %193 = vst.msk [vmem:[#allocation2 + $0x30] sm:$0xff] %vm145_vm0, %v6015_v0  ;;  %v706_v56 = vld [vmem:[#allocation2 + $0x1f8] sm:$0x3] }
  0x42   : > { %197 = vst.msk [vmem:[#allocation2 + $0x248] sm:$0xff] %vm145_vm0, %v6015_v0  ;;  %v831_v59 = vld [vmem:[#allocation2 + $0x1f8] sm:$0x3] }
  0x43   : > { %198 = vst.msk [vmem:[#allocation2 + $0x250] sm:$0xff] %vm145_vm0, %v6015_v0  ;;  %v835_v19 = vld [vmem:[#allocation2 + $0x218] sm:$0x3] }
  0x44   : > { %201 = vst.msk [vmem:[#allocation2 + $0x268] sm:$0xff] %vm145_vm0, %v6015_v0  ;;  %v388_v42 = vld [vmem:[#allocation2 + $0x1b8] sm:$0x3] }
  0x45   : > { %202 = vst.msk [vmem:[#allocation2 + $0x270] sm:$0xff] %vm145_vm0, %v6015_v0 }
  0x46   : > { %280 = vst.msk [vmem:[%s6278_s18 + $0x60] sm:$0xff] %vm145_vm0, %v248_v5  ;;  %v6305_v5 = vld [vmem:[%s6058_s14 + $0xb8] sm:$0xff] }
  0x47   : > { %281 = vst.msk [vmem:[%s6278_s18 + $0x68] sm:$0xff] %vm145_vm0, %v249_v7  ;;  %v694_v7 = vld [vmem:[#allocation2 + $0x198] sm:$0x3]  ;;  %v259_v8 = vmax.f32 %v6305_v5, 0.0 }
  0x48   : > { %282 = vst.msk [vmem:[%s6278_s18 + $0x70] sm:$0xff] %vm145_vm0, %v250_v9  ;;  %v755_v9 = vmax.f32 %v626_v18, %v6153_v37  ;;  %v758_v44 = vmax.f32 %v629_v27, %v694_v7  ;;  %v823_v37 = vld [vmem:[#allocation2 + $0x1b8] sm:$0x3]  ;;  %v260_v18 = vmax.f32 %v6361_v43, 0.0  ;;  %v6402_v27 = vld [vmem:[%s6058_s14 + $0xe8] sm:$0xff]  ;;  %v262_v7 = vmax.f32 %v6378_v57, 0.0 }
  0x49   : > { %283 = vst.msk [vmem:[%s6278_s18 + $0x78] sm:$0xff] %vm145_vm0, %v251_v11  ;;  %v573_v11 = vld [vmem:[#allocation2 + $0x1b8] sm:$0x3] }
  0x4a   : > { %284 = vst.msk [vmem:[%s6278_s18 + $0x80] sm:$0xff] %vm145_vm0, %v252_v13  ;;  %v1871_v13 = vrot.slane %v6225_v55, 7  ;;  %v6355_v16 = vmax.f32 %v755_v9, %v6320_v30  ;;  %v6367_v45 = vmax.f32 %v758_v44, %v823_v37  ;;  %v263_v9 = vmax.f32 %v6381_v58, 0.0  ;;  %v453_v44 = vld [vmem:[#allocation2 + $0x1d8] sm:$0x3] }
  0x4b   : > { %285 = vst.msk [vmem:[%s6278_s18 + $0x88] sm:$0xff] %vm145_vm0, %v253_v17  ;;  %v634_v17 = vmax.f32 %v506_v26, %v6320_v30  ;;  %v6399_v26 = vld [vmem:[%s6058_s14 + $0xe0] sm:$0xff]  ;;  %v507_v30 = vmax.f32 %v6172_v48, %v6182_v53  ;;  %v265_v48 = vmax.f32 %v6402_v27, 0.0  ;;  %v517_v40 = vmax.f32 %v388_v42, %v453_v44 }
  0x4c   : > { %286 = vst.msk [vmem:[%s6278_s18 + $0x90] sm:$0xff] %vm145_vm0, %v254_v21  ;;  %v1872_v28 = vsel %vm1813_vm7, %v1870_v6, %v1871_v13  ;;  %v1874_v10 = vsel %vm1813_vm7, %v1871_v13, %v1873_v36  ;;  %v637_v21 = vmax.f32 %v509_v2, %v573_v11  ;;  %v1006_v14 = vrot.slane %v6355_v16, 1  ;;  %v6405_v2 = vld [vmem:[%s6058_s14 + $0xf0] sm:$0xff]  ;;  %v6417_v6 = vld [vmem:[%s6058_s14 + $0xf8] sm:$0xff] }
  0x4d   : > { %287 = vst.msk [vmem:[%s6278_s18 + $0x98] sm:$0xff] %vm145_vm0, %v255_v23  ;;  %v1934_v12 = vsel %vm960_vm2, %v1874_v10, 0.0  ;;  %v513_v23 = vmax.f32 %v384_v32, %v449_v33  ;;  %v763_v20 = vmax.f32 %v634_v17, %v6340_v31  ;;  %v1347_v4 = vrot.slane %v6367_v45, 3 }
  0x4e   : > { %288 = vst.msk [vmem:[%s6278_s18 + $0xa0] sm:$0xff] %vm145_vm0, %v256_v25  ;;  %v5686_v25 = vpack.i.bf16 %v1934_v12, %v1872_v28  ;;  %v766_v47 = vmax.f32 %v637_v21, %v702_v34  ;;  %v1524_v13 = vrot.slane %v6367_v45, 4  ;;  %v6425_v36 = vmax.f32 %v767_v60, %v6389_v15 }
  0x4f   : > { %289 = vst.msk [vmem:[%s6278_s18 + $0xa8] sm:$0xff] %vm145_vm0, %v257_v29  ;;  %v641_v29 = vmax.f32 %v513_v23, %v577_v41  ;;  %v6396_v24 = vmax.f32 %v763_v20, %v6373_v50  ;;  %v508_v10 = vmax.f32 %v6176_v49, %v6186_v54  ;;  %v264_v21 = vmax.f32 %v6399_v26, 0.0 }
  0x50   : > { %323 = vst.msk [vmem:[#allocation2 + $0x1a8] sm:$0xff] %vm145_vm0, %v258_v38  ;;  %5687 = vrot.lane.b32.xlu0 %v5686_v25, %s6017_s19  ;;  %v6414_v11 = vmax.f32 %v766_v47, %v831_v59  ;;  %v266_v32 = vmax.f32 %v6405_v2, 0.0  ;;  %v267_v34 = vmax.f32 %v6417_v6, 0.0  ;;  %v642_v49 = vmax.f32 %v514_v3, %v6373_v50 }
  0x51   : > { %324 = vst.msk [vmem:[#allocation2 + $0x1b0] sm:$0xff] %vm145_vm0, %v259_v8  ;;  %v770_v61 = vmax.f32 %v641_v29, %v706_v56  ;;  %v1016_v12 = vrot.slane %v6396_v24, 1  ;;  %v1021_v20 = vrot.slane %v6425_v36, 1 }
  0x52   : > { %187 = vst.msk [vmem:[#allocation2] sm:$0xff] %vm145_vm0, %v6015_v0  ;;  %v1357_v35 = vrot.slane %v6414_v11, 3  ;;  %v1534_v39 = vrot.slane %v6414_v11, 4 }
  0x53   : > { %190 = vst.msk [vmem:[#allocation2 + $0x18] sm:$0x3] %vm166_vm1, %v6015_v0  ;;  %v6427_v17 = vmax.f32 %v770_v61, %v835_v19 }
  0x54   : > { %191 = vst.msk [vmem:[#allocation2 + $0x20] sm:$0xff] %vm145_vm0, %v6015_v0 }
  0x55   : > { %194 = vst.msk [vmem:[#allocation2 + $0x38] sm:$0x3] %vm166_vm1, %v6015_v0  ;;  %v1362_v29 = vrot.slane %v6427_v17, 3 }
  0x56   : > { %196 = vst.msk [vmem:[#allocation2 + $0x240] sm:$0xff] %vm145_vm0, %v6015_v0 }
  0x57   : > { %v6429_v28 = vld [vmem:[#allocation2 + $0x1a8] sm:$0xff]  ;;  %199 = vst.msk [vmem:[#allocation2 + $0x258] sm:$0x3] %vm166_vm1, %v6015_v0 }
  0x58   : > { %v6438_v33 = vld [vmem:[#allocation2 + $0x1b0] sm:$0xff]  ;;  %v885_v37 = vmax.f32 %v756_v62, %v6429_v28  ;;  %200 = vst.msk [vmem:[#allocation2 + $0x260] sm:$0xff] %vm145_vm0, %v6015_v0  ;;  %v635_v1 = vmax.f32 %v507_v30, %v6429_v28  ;;  %v511_v3 = vmax.f32 %v6182_v53, %v6429_v28  ;;  %v710_v53 = vld [vmem:[#allocation2 + $0x218] sm:$0x3] }
  0x59   : > { %v886_v23 = vmax.f32 %v757_v63, %v6438_v33  ;;  %203 = vst.msk [vmem:[#allocation2 + $0x278] sm:$0x3] %vm166_vm1, %v6015_v0  ;;  %v636_v43 = vmax.f32 %v508_v10, %v6438_v33 }
  0x5a   : > { %v1007_v25 = vrot.slane %v885_v37, 1  ;;  %v1165_v41 = vrot.slane %v885_v37, 2  ;;  %290 = vst.msk [vmem:[%s6278_s18 + $0xb0] sm:$0xff] %vm145_vm0, %v258_v38  ;;  %v1344_v56 = vrot.slane %v885_v37, 3  ;;  %v1521_v60 = vrot.slane %v885_v37, 4 }
  0x5b   : > { %v1009_v45 = vrot.slane %v886_v23, 1  ;;  %v1166_v47 = vrot.slane %v886_v23, 2  ;;  %v1345_v59 = vrot.slane %v886_v23, 3  ;;  %291 = vst.msk [vmem:[%s6278_s18 + $0xb8] sm:$0xff] %vm145_vm0, %v259_v8  ;;  %v1522_v61 = vrot.slane %v886_v23, 4 }
  0x5c   : > { %v1008_v0 = vsel %vm960_vm2, %v1006_v14, %v1007_v25  ;;  %325 = vst.msk [vmem:[#allocation2 + $0x1c8] sm:$0xff] %vm145_vm0, %v260_v18  ;;  %v581_v38 = vld [vmem:[#allocation2 + $0x1f8] sm:$0x3] }
  0x5d   : > { %v1010_v62 = vsel %vm960_vm2, %v1007_v25, %v1009_v45  ;;  %v1116_v63 = vmax.f32 %v6355_v16, %v1008_v0  ;;  %v1118_v19 = vmax.f32 %v886_v23, %v1009_v45  ;;  %v1167_v5 = vsel %vm1137_vm3, %v1165_v41, %v1166_v47  ;;  %326 = vst.msk [vmem:[#allocation2 + $0x1d0] sm:$0xff] %vm145_vm0, %v261_v22 }
  0x5e   : > { %v1117_v8 = vmax.f32 %v885_v37, %v1010_v62  ;;  %v1348_v14 = vsel %vm1298_vm4, %v1345_v59, %v1347_v4  ;;  %327 = vst.msk [vmem:[#allocation2 + $0x1e8] sm:$0xff] %vm145_vm0, %v262_v7  ;;  %v1539_v16 = vrot.slane %v6427_v17, 4  ;;  %v1346_v44 = vsel %vm1298_vm4, %v1344_v56, %v1345_v59  ;;  %v6483_v37 = vld [vmem:[#allocation2 + $0x220] sm:$0xff] }
  0x5f   : > { %v1261_v30 = vmax.f32 %v1116_v63, %v1165_v41  ;;  %v1263_v42 = vmax.f32 %v1118_v19, %v1166_v47  ;;  %328 = vst.msk [vmem:[#allocation2 + $0x1f0] sm:$0xff] %vm145_vm0, %v263_v9  ;;  %v645_v4 = vmax.f32 %v517_v40, %v581_v38  ;;  %v1525_v25 = vsel %vm1475_vm5, %v1522_v61, %v1524_v13 }
  0x60   : > { %v1262_v23 = vmax.f32 %v1117_v8, %v1167_v5  ;;  %292 = vst.msk [vmem:[%s6278_s18 + $0xc0] sm:$0xff] %vm145_vm0, %v260_v18  ;;  %v771_v41 = vmax.f32 %v642_v49, %v6389_v15  ;;  %v518_v45 = vmax.f32 %v6340_v31, %v6373_v50  ;;  %v1523_v40 = vsel %vm1475_vm5, %v1521_v60, %v1522_v61  ;;  %v839_v31 = vld [vmem:[#allocation2 + $0x238] sm:$0x3] }
  0x61   : > { %v1454_v47 = vmax.f32 %v1261_v30, %v1344_v56  ;;  %v1456_v59 = vmax.f32 %v1263_v42, %v1348_v14  ;;  %293 = vst.msk [vmem:[%s6278_s18 + $0xc8] sm:$0xff] %vm145_vm0, %v261_v22  ;;  %v774_v13 = vmax.f32 %v645_v4, %v710_v53  ;;  %v512_v18 = vmax.f32 %v6186_v54, %v6438_v33 }
  0x62   : > { %v1455_v0 = vmax.f32 %v1262_v23, %v1346_v44  ;;  %294 = vst.msk [vmem:[%s6278_s18 + $0xd0] sm:$0xff] %vm145_vm0, %v262_v7  ;;  %v6506_v49 = vmax.f32 %v771_v41, %v6483_v37  ;;  %v6521_v7 = vmax.f32 %v518_v45, %v6389_v15 }
  0x63   : > { %v6508_v56 = vmax.f32 %v1454_v47, %v1521_v60  ;;  %v6510_v46 = vmax.f32 %v1456_v59, %v1525_v25  ;;  %v6512_v22 = vld [vmem:[#allocation2 + $0x1c8] sm:$0xff]  ;;  %295 = vst.msk [vmem:[%s6278_s18 + $0xd8] sm:$0xff] %vm145_vm0, %v263_v9  ;;  %v6518_v57 = vmax.f32 %v774_v13, %v839_v31 }
  0x64   : > { %v6523_v54 = vmax.f32 %v1455_v0, %v1523_v40  ;;  %v6525_v10 = vld [vmem:[#allocation2 + $0x1d0] sm:$0xff]  ;;  %v764_v60 = vmax.f32 %v635_v1, %v6512_v22  ;;  %329 = vst.msk [vmem:[#allocation2 + $0x208] sm:$0xff] %vm145_vm0, %v264_v21  ;;  %v639_v58 = vmax.f32 %v511_v3, %v6512_v22  ;;  %v515_v9 = vmax.f32 %v6429_v28, %v6512_v22 }
  0x65   : > { %9435 = vst [vmem:[#allocation3_spill] sm:$0xff] %v6508_v56  ;;  %v1988_v61 = vrot.slane %v6508_v56, 6  ;;  %v1991_v38 = vrot.slane %v6510_v46, 6  ;;  %v1875_v62 = vrot.slane %v6508_v56, 7  ;;  %v1878_v63 = vrot.slane %v6510_v46, 7  ;;  %v6538_v19 = vld [vmem:[#allocation2 + $0x1e8] sm:$0xff] }
  0x66   : > { %9436 = vst [vmem:[#allocation4_spill] sm:$0xff] %v6510_v46  ;;  %v1989_v1 = vrot.slane %v6523_v54, 6  ;;  %v1876_v5 = vrot.slane %v6523_v54, 7  ;;  %v765_v28 = vmax.f32 %v636_v43, %v6525_v10  ;;  %v6546_v8 = vld [vmem:[#allocation2 + $0x1f0] sm:$0xff]  ;;  %v893_v14 = vmax.f32 %v764_v60, %v6538_v19 }
  0x67   : > { %9437 = vst [vmem:[#allocation5_spill] sm:$0xff] %v6523_v54  ;;  %v640_v3 = vmax.f32 %v512_v18, %v6525_v10  ;;  %v768_v30 = vmax.f32 %v639_v58, %v6538_v19  ;;  %v516_v42 = vmax.f32 %v6438_v33, %v6525_v10  ;;  %v6562_v44 = vmax.f32 %v515_v9, %v6538_v19 }
  0x68   : > { %330 = vst.msk [vmem:[#allocation2 + $0x210] sm:$0xff] %vm145_vm0, %v265_v48  ;;  %v1990_v4 = vsel %vm1942_vm6, %v1988_v61, %v1989_v1  ;;  %v1992_v26 = vsel %vm1942_vm6, %v1989_v1, %v1991_v38  ;;  %v1879_v23 = vsel %vm1813_vm7, %v1876_v5, %v1878_v63  ;;  %v894_v25 = vmax.f32 %v765_v28, %v6546_v8 }
  0x69   : > { %296 = vst.msk [vmem:[%s6278_s18 + $0xe0] sm:$0xff] %vm145_vm0, %v264_v21  ;;  %v1877_v21 = vsel %vm1813_vm7, %v1875_v62, %v1876_v5  ;;  %v5691_v27 = vpack.i.bf16 %v1992_v26, %v1990_v4  ;;  %v1017_v53 = vrot.slane %v893_v14, 1  ;;  %v1171_v45 = vrot.slane %v893_v14, 2 }
  0x6a   : > { %297 = vst.msk [vmem:[%s6278_s18 + $0xe8] sm:$0xff] %vm145_vm0, %v265_v48  ;;  %v1935_v48 = vsel %vm960_vm2, %v1879_v23, 0.0  ;;  %v1354_v47 = vrot.slane %v893_v14, 3  ;;  %v1531_v59 = vrot.slane %v893_v14, 4  ;;  %v1019_v13 = vrot.slane %v894_v25, 1 }
  0x6b   : > { %331 = vst.msk [vmem:[#allocation2 + $0x228] sm:$0xff] %vm145_vm0, %v266_v32  ;;  %v5696_v41 = vpack.i.bf16 %v1935_v48, %v1877_v21  ;;  %5692 = vrot.lane.b32.xlu1 %v5691_v27, %s6016_s15  ;;  %v1018_v40 = vsel %vm960_vm2, %v1016_v12, %v1017_v53  ;;  %v1172_v0 = vrot.slane %v894_v25, 2  ;;  %v1355_v43 = vrot.slane %v894_v25, 3  ;;  %v6584_v18 = vld [vmem:[#allocation2 + $0x208] sm:$0xff] }
  0x6c   : > { %332 = vst.msk [vmem:[#allocation2 + $0x230] sm:$0xff] %vm145_vm0, %v267_v34  ;;  %v1122_v31 = vmax.f32 %v6396_v24, %v1018_v40  ;;  %v1532_v2 = vrot.slane %v894_v25, 4  ;;  %v897_v58 = vmax.f32 %v768_v30, %v6584_v18  ;;  %v1020_v12 = vsel %vm960_vm2, %v1017_v53, %v1019_v13 }
  0x6d   : > { %298 = vst.msk [vmem:[%s6278_s18 + $0xf0] sm:$0xff] %vm145_vm0, %v266_v32  ;;  %v769_v32 = vmax.f32 %v640_v3, %v6546_v8  ;;  %v1124_v9 = vmax.f32 %v894_v25, %v1019_v13  ;;  %v1173_v61 = vsel %vm1137_vm3, %v1171_v45, %v1172_v0  ;;  %v1356_v38 = vsel %vm1298_vm4, %v1354_v47, %v1355_v43 }
  0x6e   : > { %299 = vst.msk [vmem:[%s6278_s18 + $0xf8] sm:$0xff] %vm145_vm0, %v267_v34  ;;  %v1123_v62 = vmax.f32 %v893_v14, %v1020_v12  ;;  %v1267_v6 = vmax.f32 %v1122_v31, %v1171_v45  ;;  %v1358_v24 = vsel %vm1298_vm4, %v1355_v43, %v1357_v35  ;;  %v1533_v34 = vsel %vm1475_vm5, %v1531_v59, %v1532_v2 }
  0x6f   : > { %v6592_v60 = vld [vmem:[#allocation2 + $0x210] sm:$0xff]  ;;  %v1269_v63 = vmax.f32 %v1124_v9, %v1172_v0  ;;  %v1535_v1 = vsel %vm1475_vm5, %v1532_v2, %v1534_v39  ;;  %v1022_v28 = vrot.slane %v897_v58, 1  ;;  %v1174_v4 = vrot.slane %v897_v58, 2 }
  0x70   : > { %v898_v5 = vmax.f32 %v769_v32, %v6592_v60  ;;  %v1268_v3 = vmax.f32 %v1123_v62, %v1173_v61  ;;  %v1460_v30 = vmax.f32 %v1267_v6, %v1354_v47  ;;  %v1359_v26 = vrot.slane %v897_v58, 3 }
  0x71   : > { %v1462_v14 = vmax.f32 %v1269_v63, %v1358_v24  ;;  %v1023_v21 = vsel %vm960_vm2, %v1021_v20, %v1022_v28  ;;  %v772_v17 = vmax.f32 %v6562_v44, %v6584_v18 }
  0x72   : > { %v1024_v35 = vrot.slane %v898_v5, 1  ;;  %v1175_v23 = vrot.slane %v898_v5, 2  ;;  %v1461_v27 = vmax.f32 %v1268_v3, %v1356_v38  ;;  %v6609_v48 = vmax.f32 %v1460_v30, %v1531_v59 }
  0x73   : > { %v1125_v11 = vmax.f32 %v6425_v36, %v1023_v21  ;;  %v1360_v39 = vrot.slane %v898_v5, 3  ;;  %5697 = vrot.lane.b32.xlu1 %v5696_v41, %s6017_s19  ;;  %v6613_v25 = vmax.f32 %v1462_v14, %v1535_v1  ;;  %v1536_v38 = vrot.slane %v897_v58, 4 }
  0x74   : > { %9438 = vst [vmem:[#allocation6_spill] sm:$0xff] %v6609_v48  ;;  %v1025_v53 = vsel %vm960_vm2, %v1022_v28, %v1024_v35  ;;  %v1127_v45 = vmax.f32 %v898_v5, %v1024_v35  ;;  %v1176_v47 = vsel %vm1137_vm3, %v1174_v4, %v1175_v23  ;;  %v6617_v40 = vmax.f32 %v1461_v27, %v1533_v34 }
  0x75   : > { %9439 = vst [vmem:[#allocation7_spill] sm:$0xff] %v6613_v25  ;;  %v1998_v20 = vrot.slane %v6609_v48, 6  ;;  %v1885_v13 = vrot.slane %v6609_v48, 7  ;;  %v1126_v59 = vmax.f32 %v897_v58, %v1025_v53  ;;  %v2001_v0 = vrot.slane %v6613_v25, 6 }
  0x76   : > { %9440 = vst [vmem:[#allocation8_spill] sm:$0xff] %v6617_v40  ;;  %v1888_v36 = vrot.slane %v6613_v25, 7  ;;  %v1270_v43 = vmax.f32 %v1125_v11, %v1174_v4  ;;  %v1272_v41 = vmax.f32 %v1127_v45, %v1175_v23  ;;  %v1999_v31 = vrot.slane %v6617_v40, 6  ;;  %v392_v23 = vld [vmem:[#allocation2 + $0x1d8] sm:$0x3]  ;;  %v6655_v11 = vld [vmem:[#allocation2 + $0x230] sm:$0xff] }
  0x77   : > { %v1886_v2 = vrot.slane %v6617_v40, 7  ;;  %v1271_v32 = vmax.f32 %v1126_v59, %v1176_v47  ;;  %v1361_v12 = vsel %vm1298_vm4, %v1359_v26, %v1360_v39  ;;  %v1363_v9 = vsel %vm1298_vm4, %v1360_v39, %v1362_v29 }
  0x78   : > { %v1463_v61 = vmax.f32 %v1270_v43, %v1359_v26  ;;  %v1537_v62 = vrot.slane %v898_v5, 4  ;;  %v2000_v6 = vsel %vm1942_vm6, %v1998_v20, %v1999_v31  ;;  %v2002_v24 = vsel %vm1942_vm6, %v1999_v31, %v2001_v0  ;;  %v6640_v5 = vld [vmem:[#allocation2 + $0x228] sm:$0xff] }
  0x79   : > { %v1887_v34 = vsel %vm1813_vm7, %v1885_v13, %v1886_v2  ;;  %v1889_v63 = vsel %vm1813_vm7, %v1886_v2, %v1888_v36  ;;  %v5711_v1 = vpack.i.bf16 %v2002_v24, %v2000_v6  ;;  %v1464_v3 = vmax.f32 %v1271_v32, %v1361_v12  ;;  %v585_v6 = vld [vmem:[#allocation2 + $0x218] sm:$0x3] }
  0x7a   : > { %v1937_v28 = vsel %vm960_vm2, %v1889_v63, 0.0  ;;  %v1465_v30 = vmax.f32 %v1272_v41, %v1363_v9  ;;  %v1538_v14 = vsel %vm1475_vm5, %v1536_v38, %v1537_v62  ;;  %v1540_v29 = vsel %vm1475_vm5, %v1537_v62, %v1539_v16  ;;  %v457_v16 = vld [vmem:[#allocation2 + $0x1f8] sm:$0x3] }
  0x7b   : > { %v5716_v4 = vpack.i.bf16 %v1937_v28, %v1887_v34  ;;  %v6638_v58 = vmax.f32 %v1463_v61, %v1536_v38  ;;  %5712 = vrot.lane.b32.xlu0 %v5711_v1, %s6016_s15  ;;  %v6643_v26 = vmax.f32 %v1464_v3, %v1538_v14  ;;  %v644_v35 = vmax.f32 %v516_v42, %v6546_v8  ;;  %v714_v14 = vld [vmem:[#allocation2 + $0x238] sm:$0x3] }
  0x7c   : > { %v6645_v21 = vmax.f32 %v1465_v30, %v1540_v29  ;;  %v1026_v39 = vrot.slane %v6506_v49, 1  ;;  %v1367_v53 = vrot.slane %v6518_v57, 3  ;;  %v1544_v45 = vrot.slane %v6518_v57, 4  ;;  %v6683_v29 = vld [vmem:[#allocation2 + $0x240] sm:$0xff] }
  0x7d   : > { %5717 = vrot.lane.b32.xlu1 %v5716_v4, %s6017_s19  ;;  %v1890_v27 = vrot.slane %v6638_v58, 7  ;;  %v1891_v33 = vrot.slane %v6643_v26, 7  ;;  %v773_v44 = vmax.f32 %v644_v35, %v6592_v60  ;;  %v901_v47 = vmax.f32 %v772_v17, %v6640_v5 }
  0x7e   : > { %v1893_v42 = vrot.slane %v6645_v21, 7  ;;  %v519_v20 = vmax.f32 %v6512_v22, %v6538_v19  ;;  %v520_v13 = vmax.f32 %v6525_v10, %v6546_v8  ;;  %v521_v59 = vmax.f32 %v392_v23, %v457_v16 }
  0x7f   : > { %v775_v0 = vmax.f32 %v6521_v7, %v6483_v37  ;;  %v1892_v57 = vsel %vm1813_vm7, %v1890_v27, %v1891_v33  ;;  %v902_v43 = vmax.f32 %v773_v44, %v6655_v11  ;;  %v1027_v41 = vrot.slane %v901_v47, 1  ;;  %v6687_v27 = vld [vmem:[#allocation2 + $0x248] sm:$0xff] }
  0x80   : > { %v1894_v36 = vsel %vm1813_vm7, %v1891_v33, %v1893_v42  ;;  %v1177_v2 = vrot.slane %v901_v47, 2  ;;  %v1364_v32 = vrot.slane %v901_v47, 3  ;;  %v1541_v12 = vrot.slane %v901_v47, 4 }
  0x81   : > { %v1938_v31 = vsel %vm960_vm2, %v1894_v36, 0.0  ;;  %v1028_v9 = vsel %vm960_vm2, %v1026_v39, %v1027_v41  ;;  %v1029_v10 = vrot.slane %v902_v43, 1  ;;  %v1178_v61 = vrot.slane %v902_v43, 2  ;;  %v6689_v39 = vld [vmem:[#allocation2 + $0x250] sm:$0xff] }
  0x82   : > { %v5726_v22 = vpack.i.bf16 %v1938_v31, %v1892_v57  ;;  %v1128_v38 = vmax.f32 %v6506_v49, %v1028_v9  ;;  %v1365_v7 = vrot.slane %v902_v43, 3  ;;  %v1542_v62 = vrot.slane %v902_v43, 4 }
  0x83   : > { %v647_v24 = vmax.f32 %v519_v20, %v6584_v18  ;;  %v1030_v34 = vsel %vm960_vm2, %v1027_v41, %v1029_v10  ;;  %v1130_v63 = vmax.f32 %v902_v43, %v1029_v10  ;;  %v1179_v1 = vsel %vm1137_vm3, %v1177_v2, %v1178_v61 }
  0x84   : > { %5727 = vrot.lane.b32.xlu0 %v5726_v22, %s6017_s19  ;;  %v648_v28 = vmax.f32 %v520_v13, %v6592_v60  ;;  %v1129_v3 = vmax.f32 %v901_v47, %v1030_v34  ;;  %v1273_v30 = vmax.f32 %v1128_v38, %v1177_v2  ;;  %v1366_v4 = vsel %vm1298_vm4, %v1364_v32, %v1365_v7 }
  0x85   : > { %v1368_v49 = vsel %vm1298_vm4, %v1365_v7, %v1367_v53  ;;  %v1275_v35 = vmax.f32 %v1130_v63, %v1178_v61  ;;  %v1543_v17 = vsel %vm1475_vm5, %v1541_v12, %v1542_v62  ;;  %v1545_v23 = vsel %vm1475_vm5, %v1542_v62, %v1544_v45  ;;  %v843_v53 = vld [vmem:[#allocation2 + $0x258] sm:$0x3] }
  0x86   : > { %v649_v16 = vmax.f32 %v521_v59, %v585_v6  ;;  %v1274_v33 = vmax.f32 %v1129_v3, %v1179_v1  ;;  %v1466_v42 = vmax.f32 %v1273_v30, %v1364_v32  ;;  %v776_v44 = vmax.f32 %v647_v24, %v6640_v5 }
  0x87   : > { %v777_v47 = vmax.f32 %v648_v28, %v6655_v11  ;;  %v1468_v20 = vmax.f32 %v1275_v35, %v1368_v49  ;;  %v904_v57 = vmax.f32 %v775_v0, %v6683_v29  ;;  %v522_v36 = vmax.f32 %v6373_v50, %v6389_v15 }
  0x88   : > { %v778_v13 = vmax.f32 %v649_v16, %v714_v14  ;;  %v1467_v45 = vmax.f32 %v1274_v33, %v1366_v4  ;;  %v6696_v59 = vmax.f32 %v1466_v42, %v1541_v12  ;;  %v905_v43 = vmax.f32 %v776_v44, %v6687_v27 }
  0x89   : > { %v906_v41 = vmax.f32 %v777_v47, %v6689_v39  ;;  %v6700_v31 = vmax.f32 %v1468_v20, %v1545_v23  ;;  %v1031_v32 = vrot.slane %v904_v57, 1  ;;  %v523_v22 = vmax.f32 %v6538_v19, %v6584_v18  ;;  %v461_v23 = vld [vmem:[#allocation2 + $0x218] sm:$0x3] }
  0x8a   : > { %v907_v2 = vmax.f32 %v778_v13, %v843_v53  ;;  %v6704_v9 = vmax.f32 %v1467_v45, %v1543_v17  ;;  %v2008_v0 = vrot.slane %v6696_v59, 6  ;;  %v1032_v10 = vrot.slane %v905_v43, 1  ;;  %v396_v17 = vld [vmem:[#allocation2 + $0x1f8] sm:$0x3]  ;;  %v204_v45 = vld [vmem:[%s6058_s14] sm:$0xff] }
  0x8b   : > { %v1034_v50 = vrot.slane %v906_v41, 1  ;;  %v2011_v15 = vrot.slane %v6700_v31, 6  ;;  %v1180_v12 = vrot.slane %v905_v43, 2  ;;  %v1181_v61 = vrot.slane %v906_v41, 2 }
  0x8c   : > { %v1369_v38 = vrot.slane %v905_v43, 3  ;;  %v2009_v7 = vrot.slane %v6704_v9, 6  ;;  %v1033_v62 = vsel %vm960_vm2, %v1031_v32, %v1032_v10  ;;  %v1370_v63 = vrot.slane %v906_v41, 3 }
  0x8d   : > { %v1035_v6 = vsel %vm960_vm2, %v1032_v10, %v1034_v50  ;;  %v1133_v24 = vmax.f32 %v906_v41, %v1034_v50  ;;  %v1131_v34 = vmax.f32 %v904_v57, %v1033_v62  ;;  %v1182_v18 = vsel %vm1137_vm3, %v1180_v12, %v1181_v61  ;;  %v589_v57 = vld [vmem:[#allocation2 + $0x238] sm:$0x3] }
  0x8e   : > { %v1132_v19 = vmax.f32 %v905_v43, %v1035_v6  ;;  %v2010_v1 = vsel %vm1942_vm6, %v2008_v0, %v2009_v7  ;;  %v2012_v28 = vsel %vm1942_vm6, %v2009_v7, %v2011_v15  ;;  %v1372_v30 = vrot.slane %v907_v2, 3 }
  0x8f   : > { %v1278_v3 = vmax.f32 %v1133_v24, %v1181_v61  ;;  %v5731_v4 = vpack.i.bf16 %v2012_v28, %v2010_v1  ;;  %v1276_v49 = vmax.f32 %v1131_v34, %v1180_v12  ;;  %v1371_v35 = vsel %vm1298_vm4, %v1369_v38, %v1370_v63  ;;  %v845_v24 = vld [vmem:[#allocation2 + $0x268] sm:$0xff]  ;;  %v846_v34 = vld [vmem:[#allocation2 + $0x270] sm:$0xff] }
  0x90   : > { %v1277_v14 = vmax.f32 %v1132_v19, %v1182_v18  ;;  %v1373_v16 = vsel %vm1298_vm4, %v1370_v63, %v1372_v30  ;;  %v1546_v33 = vrot.slane %v905_v43, 4  ;;  %v1547_v42 = vrot.slane %v906_v41, 4  ;;  %v847_v19 = vld [vmem:[#allocation2 + $0x278] sm:$0x3] }
  0x91   : > { %v1549_v44 = vrot.slane %v907_v2, 4  ;;  %5732 = vrot.lane.b32.xlu1 %v5731_v4, %s6016_s15  ;;  %v1469_v47 = vmax.f32 %v1276_v49, %v1369_v38  ;;  %v1471_v20 = vmax.f32 %v1278_v3, %v1373_v16  ;;  %v524_v13 = vmax.f32 %v6546_v8, %v6592_v60  ;;  %v718_v60 = vld [vmem:[#allocation2 + $0x258] sm:$0x3]  ;;  %v844_v38 = vld [vmem:[#allocation2 + $0x260] sm:$0xff] }
  0x92   : > { %v1470_v53 = vmax.f32 %v1277_v14, %v1371_v35  ;;  %v1548_v32 = vsel %vm1475_vm5, %v1546_v33, %v1547_v42  ;;  %v525_v10 = vmax.f32 %v396_v17, %v461_v23  ;;  %v650_v50 = vmax.f32 %v522_v36, %v6483_v37 }
  0x93   : > { %v1550_v0 = vsel %vm1475_vm5, %v1547_v42, %v1549_v44  ;;  %v6723_v43 = vmax.f32 %v1469_v47, %v1546_v33  ;;  %v651_v15 = vmax.f32 %v523_v22, %v6640_v5  ;;  %v652_v12 = vmax.f32 %v524_v13, %v6655_v11 }
  0x94   : > { %v6725_v41 = vmax.f32 %v1470_v53, %v1548_v32  ;;  %v6727_v2 = vmax.f32 %v1471_v20, %v1550_v0  ;;  %v653_v8 = vmax.f32 %v525_v10, %v589_v57  ;;  %v779_v61 = vmax.f32 %v650_v50, %v6683_v29  ;;  %v6755_v20 = vld [vmem:[%s6058_s14 + $0x8] sm:$0xff]  ;;  %v6761_v0 = vld [vmem:[%s6058_s14 + $0x10] sm:$0xff]  ;;  %v6764_v10 = vld [vmem:[%s6058_s14 + $0x18] sm:$0xff] }
  0x95   : > { %9441 = vst [vmem:[#allocation9_spill] sm:$0xff] %v6723_v43  ;;  %v236_v7 = vmax.f32 %v204_v45, 0.0  ;;  %v2013_v62 = vrot.slane %v6723_v43, 6  ;;  %v1900_v6 = vrot.slane %v6723_v43, 7  ;;  %v780_v22 = vmax.f32 %v651_v15, %v6687_v27  ;;  %v6767_v50 = vld [vmem:[%s6058_s14 + $0x20] sm:$0xff] }
  0x96   : > { %9442 = vst [vmem:[#allocation10_spill] sm:$0xff] %v6725_v41  ;;  %v2014_v37 = vrot.slane %v6725_v41, 6  ;;  %v2016_v36 = vrot.slane %v6727_v2, 6  ;;  %v1901_v5 = vrot.slane %v6725_v41, 7  ;;  %v1903_v11 = vrot.slane %v6727_v2, 7 }
  0x97   : > { %9443 = vst [vmem:[#allocation11_spill] sm:$0xff] %v6727_v2  ;;  %v781_v29 = vmax.f32 %v652_v12, %v6689_v39  ;;  %v782_v1 = vmax.f32 %v653_v8, %v718_v60  ;;  %v908_v28 = vmax.f32 %v779_v61, %v844_v38  ;;  %v6747_v4 = vmax.f32 %v780_v22, %v845_v24  ;;  %v6772_v61 = vld [vmem:[%s6058_s14 + $0x28] sm:$0xff]  ;;  %v6775_v38 = vld [vmem:[%s6058_s14 + $0x30] sm:$0xff]  ;;  %v337_v24 = vld [vmem:[#allocation2 + $0x20] sm:$0xff] }
  0x98   : > { %301 = vst.msk [vmem:[#allocation2 + $0x48] sm:$0xff] %vm145_vm0, %v236_v7  ;;  %v2015_v18 = vsel %vm1942_vm6, %v2013_v62, %v2014_v37  ;;  %v2017_v63 = vsel %vm1942_vm6, %v2014_v37, %v2016_v36  ;;  %v1902_v30 = vsel %vm1813_vm7, %v1900_v6, %v1901_v5  ;;  %v1904_v27 = vsel %vm1813_vm7, %v1901_v5, %v1903_v11  ;;  %v6784_v5 = vld [vmem:[#allocation2 + $0x28] sm:$0xff]  ;;  %v6786_v11 = vld [vmem:[#allocation2 + $0x40] sm:$0xff] }
  0x99   : > { %268 = vst.msk [vmem:[%s6278_s18] sm:$0xff] %vm145_vm0, %v236_v7  ;;  %v5741_v3 = vpack.i.bf16 %v2017_v63, %v2015_v18  ;;  %v1940_v39 = vsel %vm960_vm2, %v1904_v27, 0.0  ;;  %v910_v49 = vmax.f32 %v781_v29, %v846_v34  ;;  %v911_v14 = vmax.f32 %v782_v1, %v847_v19  ;;  %v6778_v7 = vld [vmem:[%s6058_s14 + $0x38] sm:$0xff] }
  0x9a   : > { %v1036_v35 = vrot.slane %v908_v28, 1  ;;  %v5746_v17 = vpack.i.bf16 %v1940_v39, %v1902_v30  ;;  %v1037_v23 = vrot.slane %v6747_v4, 1  ;;  %v1183_v16 = vrot.slane %v6747_v4, 2  ;;  %v340_v18 = vld [vmem:[#allocation2 + $0x38] sm:$0x3] }
  0x9b   : > { %5742 = vrot.lane.b32.xlu0 %v5741_v3, %s6016_s15  ;;  %v1374_v33 = vrot.slane %v6747_v4, 3  ;;  %v1039_v42 = vrot.slane %v910_v49, 1  ;;  %v1184_v44 = vrot.slane %v910_v49, 2  ;;  %v1375_v47 = vrot.slane %v910_v49, 3  ;;  %v405_v1 = vld [vmem:[#allocation2 + $0x58] sm:$0x3] }
  0x9c   : > { %v1377_v53 = vrot.slane %v911_v14, 3  ;;  %5747 = vrot.lane.b32.xlu1 %v5746_v17, %s6017_s19  ;;  %v1038_v13 = vsel %vm960_vm2, %v1036_v35, %v1037_v23  ;;  %v1551_v57 = vrot.slane %v6747_v4, 4  ;;  %v1552_v45 = vrot.slane %v910_v49, 4  ;;  %v533_v39 = vld [vmem:[#allocation2 + $0x78] sm:$0x3] }
  0x9d   : > { %v1554_v32 = vrot.slane %v911_v14, 4  ;;  %v1040_v15 = vsel %vm960_vm2, %v1037_v23, %v1039_v42  ;;  %v1134_v12 = vmax.f32 %v908_v28, %v1038_v13  ;;  %v1136_v8 = vmax.f32 %v910_v49, %v1039_v42  ;;  %v6792_v28 = vld [vmem:[#allocation2 + $0x60] sm:$0xff] }
  0x9e   : > { %v1185_v60 = vsel %vm1137_vm3, %v1183_v16, %v1184_v44  ;;  %v1135_v62 = vmax.f32 %v6747_v4, %v1040_v15  ;;  %v1376_v37 = vsel %vm1298_vm4, %v1374_v33, %v1375_v47  ;;  %v1378_v36 = vsel %vm1298_vm4, %v1375_v47, %v1377_v53  ;;  %v333_v49 = vld [vmem:[#allocation2] sm:$0xff]  ;;  %v335_v47 = vld [vmem:[#allocation2 + $0x10] sm:$0xff]  ;;  %v401_v15 = vld [vmem:[#allocation2 + $0x38] sm:$0x3] }
  0x9f   : > { %v1553_v6 = vsel %vm1475_vm5, %v1551_v57, %v1552_v45  ;;  %v1279_v22 = vmax.f32 %v1134_v12, %v1183_v16  ;;  %v1281_v29 = vmax.f32 %v1136_v8, %v1184_v44  ;;  %v1555_v34 = vsel %vm1475_vm5, %v1552_v45, %v1554_v32  ;;  %v6790_v63 = vld [vmem:[#allocation2 + $0x48] sm:$0xff]  ;;  %v6802_v16 = vld [vmem:[#allocation2 + $0x30] sm:$0xff]  ;;  %v6804_v42 = vld [vmem:[#allocation2 + $0x80] sm:$0xff] }
  0xa0   : > { %v237_v19 = vmax.f32 %v6755_v20, 0.0  ;;  %v1280_v3 = vmax.f32 %v1135_v62, %v1185_v60  ;;  %v238_v30 = vmax.f32 %v6761_v0, 0.0  ;;  %v239_v27 = vmax.f32 %v6764_v10, 0.0  ;;  %v334_v44 = vld [vmem:[#allocation2 + $0x8] sm:$0xff]  ;;  %v336_v32 = vld [vmem:[#allocation2 + $0x18] sm:$0x3] }
  0xa1   : > { %v9400_v4 = vmax.f32 %v6767_v50, 0.0  ;;  %v1472_v14 = vmax.f32 %v1279_v22, %v1374_v33  ;;  %v1474_v35 = vmax.f32 %v1281_v29, %v1378_v36  ;;  %v241_v17 = vmax.f32 %v6772_v61, 0.0  ;;  %v662_v62 = vld [vmem:[#allocation2 + $0x98] sm:$0x3]  ;;  %v6820_v36 = vld [vmem:[#allocation2 + $0x140] sm:$0xff]  ;;  %v6822_v22 = vld [vmem:[#allocation2 + $0x148] sm:$0xff] }
  0xa2   : > { %v9401_v23 = vmax.f32 %v6775_v38, 0.0  ;;  %302 = vst.msk [vmem:[#allocation2 + $0x50] sm:$0xff] %vm145_vm0, %v237_v19  ;;  %v1473_v53 = vmax.f32 %v1280_v3, %v1376_v37  ;;  %v9402_v13 = vmax.f32 %v6778_v7, 0.0  ;;  %v466_v33 = vmax.f32 %v337_v24, %v6786_v11 }
  0xa3   : > { %303 = vst.msk [vmem:[#allocation2 + $0x68] sm:$0xff] %vm145_vm0, %v238_v30  ;;  %v467_v45 = vmax.f32 %v6784_v5, %v6790_v63  ;;  %v6813_v12 = vmax.f32 %v1472_v14, %v1551_v57  ;;  %v6815_v8 = vmax.f32 %v1474_v35, %v1555_v34  ;;  %v469_v60 = vmax.f32 %v340_v18, %v405_v1  ;;  %v529_v14 = vld [vmem:[#allocation2 + $0x58] sm:$0x3]  ;;  %v6832_v18 = vld [vmem:[#allocation2 + $0x160] sm:$0xff] }
  0xa4   : > { %304 = vst.msk [vmem:[#allocation2 + $0x70] sm:$0xff] %vm145_vm0, %v239_v27  ;;  %v462_v37 = vmax.f32 %v333_v49, %v337_v24  ;;  %v6824_v29 = vmax.f32 %v1473_v53, %v1553_v6  ;;  %v594_v57 = vmax.f32 %v466_v33, %v6792_v28  ;;  %v463_v34 = vmax.f32 %v334_v44, %v6784_v5  ;;  %v6834_v24 = vld [vmem:[#allocation2 + $0x168] sm:$0xff]  ;;  %v6841_v35 = vld [vmem:[#allocation2 + $0xa0] sm:$0xff] }
  0xa5   : > { %9444 = vst [vmem:[#allocation12_spill] sm:$0xff] %v6813_v12  ;;  %v464_v3 = vmax.f32 %v335_v47, %v6802_v16  ;;  %v1905_v1 = vrot.slane %v6813_v12, 7  ;;  %v1908_v6 = vrot.slane %v6815_v8, 7  ;;  %v597_v49 = vmax.f32 %v469_v60, %v533_v39  ;;  %v791_v47 = vld [vmem:[#allocation2 + $0xb8] sm:$0x3] }
  0xa6   : > { %9445 = vst [vmem:[#allocation13_spill] sm:$0xff] %v6815_v8  ;;  %v465_v53 = vmax.f32 %v336_v32, %v401_v15  ;;  %v1906_v5 = vrot.slane %v6824_v29, 7  ;;  %v723_v44 = vmax.f32 %v594_v57, %v6804_v42  ;;  %v590_v33 = vmax.f32 %v462_v37, %v6786_v11 }
  0xa7   : > { %9446 = vst [vmem:[#allocation14_spill] sm:$0xff] %v6824_v29  ;;  %v726_v39 = vmax.f32 %v597_v49, %v662_v62  ;;  %v9447_v60 = vmax.f32 %v6767_v50, 0.0 }
  0xa8   : > { %305 = vst.msk [vmem:[#allocation2 + $0x88] sm:$0xff] %vm145_vm0, %v9400_v4  ;;  %v591_v4 = vmax.f32 %v463_v34, %v6790_v63  ;;  %v593_v32 = vmax.f32 %v465_v53, %v529_v14  ;;  %v1907_v57 = vsel %vm1813_vm7, %v1905_v1, %v1906_v5  ;;  %v1909_v37 = vsel %vm1813_vm7, %v1906_v5, %v1908_v6  ;;  %v6869_v14 = vld [vmem:[#allocation2 + $0x150] sm:$0xff]  ;;  %v6883_v5 = vld [vmem:[#allocation2 + $0x158] sm:$0x3] }
  0xa9   : > { %306 = vst.msk [vmem:[#allocation2 + $0x90] sm:$0xff] %vm145_vm0, %v241_v17  ;;  %v6862_v34 = vmax.f32 %v723_v44, %v6841_v35  ;;  %v719_v62 = vmax.f32 %v590_v33, %v6792_v28  ;;  %v1941_v49 = vsel %vm960_vm2, %v1909_v37, 0.0  ;;  %v6876_v53 = vmax.f32 %v726_v39, %v791_v47  ;;  %v212_v44 = vld [vmem:[%s6058_s14 + $0x40] sm:$0xff] }
  0xaa   : > { %307 = vst.msk [vmem:[#allocation2 + $0xa8] sm:$0xff] %vm145_vm0, %v9401_v23  ;;  %v6859_v23 = vld [vmem:[#allocation2 + $0x50] sm:$0xff]  ;;  %v6874_v6 = vld [vmem:[#allocation2 + $0x68] sm:$0xff]  ;;  %v5756_v33 = vpack.i.bf16 %v1941_v49, %v1907_v57  ;;  %v244_v50 = vmax.f32 %v212_v44, 0.0 }
  0xab   : > { %308 = vst.msk [vmem:[#allocation2 + $0xb0] sm:$0xff] %vm145_vm0, %v9402_v13  ;;  %v468_v1 = vmax.f32 %v6802_v16, %v6859_v23  ;;  %v592_v20 = vmax.f32 %v464_v3, %v6859_v23  ;;  %v6886_v37 = vld [vmem:[#allocation2 + $0x70] sm:$0xff]  ;;  %v595_v16 = vmax.f32 %v467_v45, %v6874_v6  ;;  %v966_v47 = vrot.slane %v6862_v34, 1  ;;  %v6897_v3 = vld [vmem:[#allocation2 + $0x178] sm:$0x3] }
  0xac   : > { %269 = vst.msk [vmem:[%s6278_s18 + $0x8] sm:$0xff] %vm145_vm0, %v237_v19  ;;  %v658_v19 = vld [vmem:[#allocation2 + $0x78] sm:$0x3]  ;;  %v720_v0 = vmax.f32 %v591_v4, %v6874_v6  ;;  %v1307_v45 = vrot.slane %v6876_v53, 3  ;;  %v1484_v49 = vrot.slane %v6876_v53, 4  ;;  %5757 = vrot.lane.b32.xlu0 %v5756_v33, %s6017_s19  ;;  %v848_v53 = vmax.f32 %v719_v62, %v6804_v42 }
  0xad   : > { %270 = vst.msk [vmem:[%s6278_s18 + $0x10] sm:$0xff] %vm145_vm0, %v238_v30  ;;  %v6895_v30 = vld [vmem:[#allocation2 + $0x170] sm:$0xff]  ;;  %v596_v39 = vmax.f32 %v468_v1, %v6886_v37  ;;  %v721_v10 = vmax.f32 %v592_v20, %v6886_v37  ;;  %v722_v15 = vmax.f32 %v593_v32, %v658_v19  ;;  %v9448_v20 = vmax.f32 %v6775_v38, 0.0 }
  0xae   : > { %271 = vst.msk [vmem:[%s6278_s18 + $0x18] sm:$0xff] %vm145_vm0, %v239_v27  ;;  %v787_v27 = vld [vmem:[#allocation2 + $0x98] sm:$0x3]  ;;  %v9449_v62 = vmax.f32 %v6778_v7, 0.0  ;;  %v961_v19 = vrot.slane %v848_v53, 1 }
  0xaf   : > { %v6900_v57 = vld [vmem:[#allocation2 + $0x88] sm:$0xff]  ;;  %272 = vst.msk [vmem:[%s6278_s18 + $0x20] sm:$0xff] %vm145_vm0, %v9447_v60  ;;  %v6940_v38 = vmax.f32 %v722_v15, %v787_v27 }
  0xb0   : > { %v6910_v4 = vld [vmem:[#allocation2 + $0x90] sm:$0xff]  ;;  %v724_v1 = vmax.f32 %v595_v16, %v6900_v57  ;;  %273 = vst.msk [vmem:[%s6278_s18 + $0x28] sm:$0xff] %vm145_vm0, %v241_v17  ;;  %v6926_v33 = vmax.f32 %v720_v0, %v6900_v57 }
  0xb1   : > { %v725_v60 = vmax.f32 %v596_v39, %v6910_v4  ;;  %v6919_v13 = vld [vmem:[#allocation2 + $0xa8] sm:$0xff]  ;;  %274 = vst.msk [vmem:[%s6278_s18 + $0x30] sm:$0xff] %vm145_vm0, %v9448_v20  ;;  %v6929_v16 = vmax.f32 %v721_v10, %v6910_v4 }
  0xb2   : > { %v6933_v17 = vld [vmem:[#allocation2 + $0xb0] sm:$0xff]  ;;  %v853_v32 = vmax.f32 %v724_v1, %v6919_v13  ;;  %275 = vst.msk [vmem:[%s6278_s18 + $0x38] sm:$0xff] %vm145_vm0, %v9449_v62  ;;  %v962_v39 = vrot.slane %v6926_v33, 1  ;;  %v1138_v20 = vrot.slane %v6926_v33, 2 }
  0xb3   : > { %v854_v0 = vmax.f32 %v725_v60, %v6933_v17  ;;  %v964_v10 = vrot.slane %v6929_v16, 1  ;;  %309 = vst.msk [vmem:[#allocation2 + $0xc8] sm:$0xff] %vm145_vm0, %v244_v50 }
  0xb4   : > { %v967_v1 = vrot.slane %v853_v32, 1  ;;  %v1141_v7 = vrot.slane %v853_v32, 2  ;;  %v1304_v61 = vrot.slane %v853_v32, 3  ;;  %v1481_v62 = vrot.slane %v853_v32, 4  ;;  %276 = vst.msk [vmem:[%s6278_s18 + $0x40] sm:$0xff] %vm145_vm0, %v244_v50 }
  0xb5   : > { %v969_v15 = vrot.slane %v854_v0, 1  ;;  %v1142_v27 = vrot.slane %v854_v0, 2  ;;  %v1305_v2 = vrot.slane %v854_v0, 3  ;;  %v1482_v44 = vrot.slane %v854_v0, 4 }
  0xb6   : > { %v968_v60 = vsel %vm960_vm2, %v966_v47, %v967_v1  ;;  %v963_v41 = vsel %vm960_vm2, %v961_v19, %v962_v39  ;;  %v965_v43 = vsel %vm960_vm2, %v962_v39, %v964_v10  ;;  %v1091_v25 = vmax.f32 %v6929_v16, %v964_v10 }
  0xb7   : > { %v970_v40 = vsel %vm960_vm2, %v967_v1, %v969_v15  ;;  %v1092_v48 = vmax.f32 %v6862_v34, %v968_v60  ;;  %v1094_v46 = vmax.f32 %v854_v0, %v969_v15  ;;  %v1143_v56 = vsel %vm1137_vm3, %v1141_v7, %v1142_v27 }
  0xb8   : > { %v1093_v50 = vmax.f32 %v853_v32, %v970_v40  ;;  %v1306_v54 = vsel %vm1298_vm4, %v1304_v61, %v1305_v2  ;;  %v1308_v8 = vsel %vm1298_vm4, %v1305_v2, %v1307_v45  ;;  %v1483_v47 = vsel %vm1475_vm5, %v1481_v62, %v1482_v44 }
  0xb9   : > { %v1237_v29 = vmax.f32 %v1092_v48, %v1141_v7  ;;  %v1239_v19 = vmax.f32 %v1094_v46, %v1142_v27  ;;  %v1485_v39 = vsel %vm1475_vm5, %v1482_v44, %v1484_v49  ;;  %v1089_v12 = vmax.f32 %v848_v53, %v963_v41  ;;  %v566_v53 = vld [vmem:[#allocation2 + $0x180] sm:$0xff] }
  0xba   : > { %v1238_v10 = vmax.f32 %v1093_v50, %v1143_v56  ;;  %v1090_v1 = vmax.f32 %v6926_v33, %v965_v43  ;;  %v1139_v34 = vrot.slane %v6929_v16, 2  ;;  %v1299_v0 = vrot.slane %v6926_v33, 3 }
  0xbb   : > { %v1430_v15 = vmax.f32 %v1237_v29, %v1304_v61  ;;  %v1432_v40 = vmax.f32 %v1239_v19, %v1308_v8  ;;  %v1234_v32 = vmax.f32 %v1089_v12, %v1138_v20  ;;  %v1300_v60 = vrot.slane %v6929_v16, 3  ;;  %v567_v29 = vld [vmem:[#allocation2 + $0x188] sm:$0xff]  ;;  %v568_v61 = vld [vmem:[#allocation2 + $0x190] sm:$0xff] }
  0xbc   : > { %v1431_v2 = vmax.f32 %v1238_v10, %v1306_v54  ;;  %v1140_v45 = vsel %vm1137_vm3, %v1138_v20, %v1139_v34  ;;  %v1236_v48 = vmax.f32 %v1091_v25, %v1139_v34  ;;  %v1302_v46 = vrot.slane %v6940_v38, 3  ;;  %v569_v25 = vld [vmem:[#allocation2 + $0x198] sm:$0x3]  ;;  %v695_v10 = vld [vmem:[#allocation2 + $0x1a0] sm:$0xff] }
  0xbd   : > { %v6968_v49 = vmax.f32 %v1430_v15, %v1481_v62  ;;  %v6970_v56 = vmax.f32 %v1432_v40, %v1485_v39  ;;  %v1235_v43 = vmax.f32 %v1090_v1, %v1140_v45  ;;  %v1301_v41 = vsel %vm1298_vm4, %v1299_v0, %v1300_v60 }
  0xbe   : > { %v6973_v44 = vmax.f32 %v1431_v2, %v1483_v47  ;;  %v1303_v12 = vsel %vm1298_vm4, %v1300_v60, %v1302_v46  ;;  %v1427_v8 = vmax.f32 %v1234_v32, %v1299_v0  ;;  %v1476_v54 = vrot.slane %v6926_v33, 4  ;;  %v697_v60 = vld [vmem:[#allocation2 + $0x1b0] sm:$0xff]  ;;  %v698_v2 = vld [vmem:[#allocation2 + $0x1b8] sm:$0x3]  ;;  %v824_v46 = vld [vmem:[#allocation2 + $0x1c0] sm:$0xff] }
  0xbf   : > { %v1948_v20 = vrot.slane %v6968_v49, 6  ;;  %v1951_v7 = vrot.slane %v6970_v56, 6  ;;  %v1428_v62 = vmax.f32 %v1235_v43, %v1301_v41  ;;  %v1429_v27 = vmax.f32 %v1236_v48, %v1303_v12  ;;  %v827_v12 = vld [vmem:[#allocation2 + $0x1d8] sm:$0x3] }
  0xc0   : > { %v1949_v50 = vrot.slane %v6973_v44, 6  ;;  %v1477_v19 = vrot.slane %v6929_v16, 4  ;;  %v1479_v47 = vrot.slane %v6940_v38, 4  ;;  %v6982_v39 = vmax.f32 %v1427_v8, %v1476_v54  ;;  %v696_v38 = vld [vmem:[#allocation2 + $0x1a8] sm:$0xff] }
  0xc1   : > { %v9451_v33 = vmax.f32 %v6820_v36, %v6832_v18  ;;  %v9452_v34 = vmax.f32 %v6822_v22, %v6834_v24  ;;  %v9453_v15 = vmax.f32 %v6869_v14, %v6895_v30  ;;  %v9454_v16 = vmax.f32 %v6883_v5, %v6897_v3  ;;  %v825_v3 = vld [vmem:[#allocation2 + $0x1c8] sm:$0xff] }
  0xc2   : > { %9450 = vst [vmem:[#allocation15_spill] sm:$0xff] %v6982_v39  ;;  %v1950_v45 = vsel %vm1942_vm6, %v1948_v20, %v1949_v50  ;;  %v1952_v18 = vsel %vm1942_vm6, %v1949_v50, %v1951_v7  ;;  %v1478_v48 = vsel %vm1475_vm5, %v1476_v54, %v1477_v19  ;;  %v1480_v24 = vsel %vm1475_vm5, %v1477_v19, %v1479_v47 }
  0xc3   : > { %v630_v1 = vmax.f32 %v9451_v33, %v566_v53  ;;  %v631_v0 = vmax.f32 %v9452_v34, %v567_v29  ;;  %v632_v40 = vmax.f32 %v9453_v15, %v568_v61  ;;  %v633_v32 = vmax.f32 %v9454_v16, %v569_v25  ;;  %v826_v53 = vld [vmem:[#allocation2 + $0x1d0] sm:$0xff] }
  0xc4   : > { %v5761_v43 = vpack.i.bf16 %v1952_v18, %v1950_v45  ;;  %v7000_v41 = vmax.f32 %v1428_v62, %v1478_v48  ;;  %v7002_v30 = vmax.f32 %v1429_v27, %v1480_v24  ;;  %v1943_v5 = vrot.slane %v6982_v39, 6 }
  0xc5   : > { %v759_v8 = vmax.f32 %v630_v1, %v695_v10  ;;  %v760_v29 = vmax.f32 %v631_v0, %v696_v38  ;;  %v761_v61 = vmax.f32 %v632_v40, %v697_v60  ;;  %v762_v25 = vmax.f32 %v633_v32, %v698_v2 }
  0xc6   : > { %9455 = vst [vmem:[#allocation16_spill] sm:$0xff] %v7000_v41  ;;  %5762 = vrot.lane.b32.xlu1 %v5761_v43, %s6016_s15  ;;  %v1944_v54 = vrot.slane %v7000_v41, 6  ;;  %v1946_v20 = vrot.slane %v7002_v30, 6  ;;  %v1830_v7 = vrot.slane %v6982_v39, 7  ;;  %v1831_v62 = vrot.slane %v7000_v41, 7 }
  0xc7   : > { %9456 = vst [vmem:[#allocation17_spill] sm:$0xff] %v7002_v30  ;;  %v888_v27 = vmax.f32 %v759_v8, %v824_v46  ;;  %v889_v50 = vmax.f32 %v760_v29, %v825_v3  ;;  %v890_v19 = vmax.f32 %v761_v61, %v826_v53  ;;  %v891_v47 = vmax.f32 %v762_v25, %v827_v12  ;;  %v213_v53 = vld [vmem:[%s6058_s14 + $0x48] sm:$0xff] }
  0xc8   : > { %v1945_v33 = vsel %vm1942_vm6, %v1943_v5, %v1944_v54  ;;  %v1947_v10 = vsel %vm1942_vm6, %v1944_v54, %v1946_v20  ;;  %v1832_v1 = vsel %vm1813_vm7, %v1830_v7, %v1831_v62  ;;  %v1833_v34 = vrot.slane %v7002_v30, 7 }
  0xc9   : > { %v5771_v0 = vpack.i.bf16 %v1947_v10, %v1945_v33  ;;  %v1011_v15 = vrot.slane %v888_v27, 1  ;;  %v1012_v40 = vrot.slane %v889_v50, 1  ;;  %v1014_v16 = vrot.slane %v890_v19, 1  ;;  %v214_v33 = vld [vmem:[%s6058_s14 + $0x50] sm:$0xff] }
  0xca   : > { %v1168_v32 = vrot.slane %v889_v50, 2  ;;  %v1169_v38 = vrot.slane %v890_v19, 2  ;;  %v1349_v60 = vrot.slane %v889_v50, 3  ;;  %v1350_v2 = vrot.slane %v890_v19, 3 }
  0xcb   : > { %5772 = vrot.lane.b32.xlu0 %v5771_v0, %s6016_s15  ;;  %v1013_v45 = vsel %vm960_vm2, %v1011_v15, %v1012_v40  ;;  %v1015_v18 = vsel %vm960_vm2, %v1012_v40, %v1014_v16  ;;  %v1121_v48 = vmax.f32 %v890_v19, %v1014_v16  ;;  %v1352_v24 = vrot.slane %v891_v47, 3  ;;  %v344_v40 = vld [vmem:[#allocation2 + $0x58] sm:$0x3] }
  0xcc   : > { %v1119_v46 = vmax.f32 %v888_v27, %v1013_v45  ;;  %v1120_v43 = vmax.f32 %v889_v50, %v1015_v18  ;;  %v1170_v5 = vsel %vm1137_vm3, %v1168_v32, %v1169_v38  ;;  %v1351_v3 = vsel %vm1298_vm4, %v1349_v60, %v1350_v2  ;;  %v409_v16 = vld [vmem:[#allocation2 + $0x78] sm:$0x3] }
  0xcd   : > { %v1266_v12 = vmax.f32 %v1121_v48, %v1169_v38  ;;  %v1353_v8 = vsel %vm1298_vm4, %v1350_v2, %v1352_v24  ;;  %v1526_v29 = vrot.slane %v889_v50, 4  ;;  %v1527_v61 = vrot.slane %v890_v19, 4  ;;  %v537_v2 = vld [vmem:[#allocation2 + $0x98] sm:$0x3] }
  0xce   : > { %v1264_v25 = vmax.f32 %v1119_v46, %v1168_v32  ;;  %v1265_v54 = vmax.f32 %v1120_v43, %v1170_v5  ;;  %v1529_v20 = vrot.slane %v891_v47, 4  ;;  %v1834_v7 = vsel %vm1813_vm7, %v1831_v62, %v1833_v34  ;;  %v666_v46 = vld [vmem:[#allocation2 + $0xb8] sm:$0x3] }
  0xcf   : > { %v1459_v10 = vmax.f32 %v1266_v12, %v1353_v8  ;;  %v1528_v27 = vsel %vm1475_vm5, %v1526_v29, %v1527_v61  ;;  %v1926_v0 = vsel %vm960_vm2, %v1834_v7, 0.0  ;;  %v245_v15 = vmax.f32 %v213_v53, 0.0  ;;  %v7048_v53 = vld [vmem:[#allocation2 + $0xc0] sm:$0xff]  ;;  %v7050_v12 = vld [vmem:[#allocation2 + $0xc8] sm:$0xff]  ;;  %v215_v7 = vld [vmem:[%s6058_s14 + $0x58] sm:$0xff] }
  0xd0   : > { %v1457_v38 = vmax.f32 %v1264_v25, %v1349_v60  ;;  %v1458_v45 = vmax.f32 %v1265_v54, %v1351_v3  ;;  %v1530_v50 = vsel %vm1475_vm5, %v1527_v61, %v1529_v20  ;;  %v5776_v19 = vpack.i.bf16 %v1926_v0, %v1832_v1  ;;  %v795_v54 = vld [vmem:[#allocation2 + $0xd8] sm:$0x3] }
  0xd1   : > { %v7026_v32 = vmax.f32 %v1459_v10, %v1530_v50  ;;  %310 = vst.msk [vmem:[#allocation2 + $0xd0] sm:$0xff] %vm145_vm0, %v245_v15  ;;  %v470_v62 = vmax.f32 %v6786_v11, %v6792_v28  ;;  %v471_v47 = vmax.f32 %v6790_v63, %v6874_v6  ;;  %v472_v34 = vmax.f32 %v6859_v23, %v6886_v37 }
  0xd2   : > { %v7035_v18 = vmax.f32 %v1457_v38, %v1526_v29  ;;  %v7037_v60 = vmax.f32 %v1458_v45, %v1528_v27  ;;  %5777 = vrot.lane.b32.xlu1 %v5776_v19, %s6017_s19  ;;  %v473_v1 = vmax.f32 %v344_v40, %v409_v16  ;;  %277 = vst.msk [vmem:[%s6278_s18 + $0x48] sm:$0xff] %vm145_vm0, %v245_v15  ;;  %v246_v48 = vmax.f32 %v214_v33, 0.0 }
  0xd3   : > { %v1996_v24 = vrot.slane %v7026_v32, 6  ;;  %v598_v11 = vmax.f32 %v470_v62, %v6804_v42  ;;  %v599_v63 = vmax.f32 %v471_v47, %v6900_v57  ;;  %v600_v23 = vmax.f32 %v472_v34, %v6910_v4 }
  0xd4   : > { %v1993_v43 = vrot.slane %v7035_v18, 6  ;;  %v1994_v5 = vrot.slane %v7037_v60, 6  ;;  %v601_v3 = vmax.f32 %v473_v1, %v537_v2  ;;  %v1880_v8 = vrot.slane %v7035_v18, 7  ;;  %311 = vst.msk [vmem:[#allocation2 + $0xe8] sm:$0xff] %vm145_vm0, %v246_v48 }
  0xd5   : > { %v727_v29 = vmax.f32 %v598_v11, %v6841_v35  ;;  %v728_v61 = vmax.f32 %v599_v63, %v6919_v13  ;;  %v729_v25 = vmax.f32 %v600_v23, %v6933_v17  ;;  %v1881_v20 = vrot.slane %v7037_v60, 7  ;;  %278 = vst.msk [vmem:[%s6278_s18 + $0x50] sm:$0xff] %vm145_vm0, %v246_v48 }
  0xd6   : > { %v1995_v33 = vsel %vm1942_vm6, %v1993_v43, %v1994_v5  ;;  %v1997_v10 = vsel %vm1942_vm6, %v1994_v5, %v1996_v24  ;;  %v730_v27 = vmax.f32 %v601_v3, %v666_v46  ;;  %v1883_v0 = vrot.slane %v7026_v32, 7 }
  0xd7   : > { %v5701_v15 = vpack.i.bf16 %v1997_v10, %v1995_v33  ;;  %v856_v40 = vmax.f32 %v727_v29, %v7048_v53  ;;  %v857_v16 = vmax.f32 %v728_v61, %v7050_v12  ;;  %v1882_v38 = vsel %vm1813_vm7, %v1880_v8, %v1881_v20  ;;  %v348_v33 = vld [vmem:[#allocation2 + $0x78] sm:$0x3] }
  0xd8   : > { %v7067_v45 = vld [vmem:[#allocation2 + $0xd0] sm:$0xff]  ;;  %v859_v50 = vmax.f32 %v730_v27, %v795_v54  ;;  %v1884_v19 = vsel %vm1813_vm7, %v1881_v20, %v1883_v0  ;;  %v247_v62 = vmax.f32 %v215_v7, 0.0  ;;  %v474_v47 = vmax.f32 %v6792_v28, %v6804_v42  ;;  %v413_v10 = vld [vmem:[#allocation2 + $0x98] sm:$0x3] }
  0xd9   : > { %5702 = vrot.lane.b32.xlu2 %v5701_v15, %s6016_s15  ;;  %v858_v34 = vmax.f32 %v729_v25, %v7067_v45  ;;  %v971_v2 = vrot.slane %v856_v40, 1  ;;  %v972_v1 = vrot.slane %v857_v16, 1  ;;  %v1144_v48 = vrot.slane %v857_v16, 2 }
  0xda   : > { %v1309_v24 = vrot.slane %v857_v16, 3  ;;  %v1312_v11 = vrot.slane %v859_v50, 3  ;;  %v1486_v63 = vrot.slane %v857_v16, 4  ;;  %v1489_v23 = vrot.slane %v859_v50, 4  ;;  %312 = vst.msk [vmem:[#allocation2 + $0xf0] sm:$0xff] %vm145_vm0, %v247_v62 }
  0xdb   : > { %v973_v46 = vsel %vm960_vm2, %v971_v2, %v972_v1  ;;  %v974_v43 = vrot.slane %v858_v34, 1  ;;  %v1145_v5 = vrot.slane %v858_v34, 2  ;;  %v1310_v3 = vrot.slane %v858_v34, 3  ;;  %279 = vst.msk [vmem:[%s6278_s18 + $0x58] sm:$0xff] %vm145_vm0, %v247_v62 }
  0xdc   : > { %v1095_v28 = vmax.f32 %v856_v40, %v973_v46  ;;  %v1487_v8 = vrot.slane %v858_v34, 4  ;;  %v1936_v29 = vsel %vm960_vm2, %v1884_v19, 0.0  ;;  %v475_v61 = vmax.f32 %v6874_v6, %v6900_v57 }
  0xdd   : > { %v975_v25 = vsel %vm960_vm2, %v972_v1, %v974_v43  ;;  %v1097_v54 = vmax.f32 %v858_v34, %v974_v43  ;;  %v1146_v20 = vsel %vm1137_vm3, %v1144_v48, %v1145_v5  ;;  %v1311_v7 = vsel %vm1298_vm4, %v1309_v24, %v1310_v3  ;;  %v541_v34 = vld [vmem:[#allocation2 + $0xb8] sm:$0x3] }
  0xde   : > { %v1096_v27 = vmax.f32 %v857_v16, %v975_v25  ;;  %v1240_v0 = vmax.f32 %v1095_v28, %v1144_v48  ;;  %v1313_v15 = vsel %vm1298_vm4, %v1310_v3, %v1312_v11  ;;  %v1488_v40 = vsel %vm1475_vm5, %v1486_v63, %v1487_v8  ;;  %v670_v11 = vld [vmem:[#allocation2 + $0xd8] sm:$0x3] }
  0xdf   : > { %v1242_v50 = vmax.f32 %v1097_v54, %v1145_v5  ;;  %v1490_v19 = vsel %vm1475_vm5, %v1487_v8, %v1489_v23  ;;  %v5706_v62 = vpack.i.bf16 %v1936_v29, %v1882_v38  ;;  %v476_v6 = vmax.f32 %v6886_v37, %v6910_v4  ;;  %v7093_v5 = vld [vmem:[#allocation2 + $0xe0] sm:$0xff]  ;;  %v799_v25 = vld [vmem:[#allocation2 + $0xf8] sm:$0x3] }
  0xe0   : > { %v1241_v2 = vmax.f32 %v1096_v27, %v1146_v20  ;;  %v1433_v1 = vmax.f32 %v1240_v0, %v1309_v24  ;;  %v477_v46 = vmax.f32 %v348_v33, %v413_v10  ;;  %v602_v43 = vmax.f32 %v474_v47, %v6841_v35  ;;  %v7100_v47 = vld [vmem:[#allocation2 + $0xe8] sm:$0xff]  ;;  %v352_v54 = vld [vmem:[#allocation2 + $0x98] sm:$0x3] }
  0xe1   : > { %v1435_v30 = vmax.f32 %v1242_v50, %v1313_v15  ;;  %5707 = vrot.lane.b32.xlu2 %v5706_v62, %s6017_s19  ;;  %v603_v16 = vmax.f32 %v475_v61, %v6919_v13  ;;  %v604_v48 = vmax.f32 %v476_v6, %v6933_v17  ;;  %v478_v38 = vmax.f32 %v6804_v42, %v6841_v35  ;;  %v7102_v28 = vld [vmem:[#allocation2 + $0xf0] sm:$0xff]  ;;  %v417_v20 = vld [vmem:[#allocation2 + $0xb8] sm:$0x3] }
  0xe2   : > { %v1434_v37 = vmax.f32 %v1241_v2, %v1311_v7  ;;  %v7097_v23 = vmax.f32 %v1433_v1, %v1486_v63  ;;  %v605_v24 = vmax.f32 %v477_v46, %v541_v34  ;;  %v731_v3 = vmax.f32 %v602_v43, %v7048_v53 }
  0xe3   : > { %v7104_v8 = vmax.f32 %v1435_v30, %v1490_v19  ;;  %v732_v29 = vmax.f32 %v603_v16, %v7050_v12  ;;  %v733_v61 = vmax.f32 %v604_v48, %v7067_v45  ;;  %v479_v42 = vmax.f32 %v6900_v57, %v6919_v13 }
  0xe4   : > { %v7110_v63 = vmax.f32 %v1434_v37, %v1488_v40  ;;  %v1840_v7 = vrot.slane %v7097_v23, 7  ;;  %v734_v33 = vmax.f32 %v605_v24, %v670_v11  ;;  %v860_v10 = vmax.f32 %v731_v3, %v7093_v5 }
  0xe5   : > { %v1843_v30 = vrot.slane %v7104_v8, 7  ;;  %v861_v27 = vmax.f32 %v732_v29, %v7100_v47  ;;  %v862_v0 = vmax.f32 %v733_v61, %v7102_v28  ;;  %v480_v15 = vmax.f32 %v6910_v4, %v6933_v17 }
  0xe6   : > { %v1841_v50 = vrot.slane %v7110_v63, 7  ;;  %v863_v19 = vmax.f32 %v734_v33, %v799_v25  ;;  %v976_v57 = vrot.slane %v860_v10, 1  ;;  %v481_v40 = vmax.f32 %v352_v54, %v417_v20 }
  0xe7   : > { %v977_v62 = vrot.slane %v861_v27, 1  ;;  %v979_v6 = vrot.slane %v862_v0, 1  ;;  %v1147_v34 = vrot.slane %v861_v27, 2  ;;  %v1148_v2 = vrot.slane %v862_v0, 2 }
  0xe8   : > { %v1842_v1 = vsel %vm1813_vm7, %v1840_v7, %v1841_v50  ;;  %v1844_v46 = vsel %vm1813_vm7, %v1841_v50, %v1843_v30  ;;  %v1314_v43 = vrot.slane %v861_v27, 3  ;;  %v1315_v16 = vrot.slane %v862_v0, 3 }
  0xe9   : > { %v1928_v48 = vsel %vm960_vm2, %v1844_v46, 0.0  ;;  %v978_v11 = vsel %vm960_vm2, %v976_v57, %v977_v62  ;;  %v980_v4 = vsel %vm960_vm2, %v977_v62, %v979_v6  ;;  %v1100_v37 = vmax.f32 %v862_v0, %v979_v6  ;;  %v545_v57 = vld [vmem:[#allocation2 + $0xd8] sm:$0x3] }
  0xea   : > { %v5786_v24 = vpack.i.bf16 %v1928_v48, %v1842_v1  ;;  %v1098_v3 = vmax.f32 %v860_v10, %v978_v11  ;;  %v1099_v29 = vmax.f32 %v861_v27, %v980_v4  ;;  %v1149_v61 = vsel %vm1137_vm3, %v1147_v34, %v1148_v2  ;;  %v674_v4 = vld [vmem:[#allocation2 + $0xf8] sm:$0x3] }
  0xeb   : > { %v1245_v25 = vmax.f32 %v1100_v37, %v1148_v2  ;;  %v1316_v54 = vsel %vm1298_vm4, %v1314_v43, %v1315_v16  ;;  %v1317_v20 = vrot.slane %v863_v19, 3  ;;  %v1491_v7 = vrot.slane %v861_v27, 4  ;;  %v7133_v37 = vld [vmem:[#allocation2 + $0x100] sm:$0xff] }
  0xec   : > { %5787 = vrot.lane.b32.xlu0 %v5786_v24, %s6017_s19  ;;  %v1243_v33 = vmax.f32 %v1098_v3, %v1147_v34  ;;  %v1244_v30 = vmax.f32 %v1099_v29, %v1149_v61  ;;  %v1492_v50 = vrot.slane %v862_v0, 4  ;;  %v1494_v46 = vrot.slane %v863_v19, 4  ;;  %v7135_v34 = vld [vmem:[#allocation2 + $0x108] sm:$0xff]  ;;  %v803_v29 = vld [vmem:[#allocation2 + $0x118] sm:$0x3] }
  0xed   : > { %v1318_v62 = vsel %vm1298_vm4, %v1315_v16, %v1317_v20  ;;  %v606_v6 = vmax.f32 %v478_v38, %v7048_v53  ;;  %v607_v10 = vmax.f32 %v479_v42, %v7050_v12  ;;  %v608_v1 = vmax.f32 %v480_v15, %v7067_v45  ;;  %v7140_v42 = vld [vmem:[#allocation2 + $0x110] sm:$0xff] }
  0xee   : > { %v1436_v2 = vmax.f32 %v1243_v33, %v1314_v43  ;;  %v1437_v48 = vmax.f32 %v1244_v30, %v1316_v54  ;;  %v1438_v11 = vmax.f32 %v1245_v25, %v1318_v62  ;;  %v1493_v27 = vsel %vm1475_vm5, %v1491_v7, %v1492_v50 }
  0xef   : > { %v1495_v0 = vsel %vm1475_vm5, %v1492_v50, %v1494_v46  ;;  %v609_v19 = vmax.f32 %v481_v40, %v545_v57  ;;  %v735_v16 = vmax.f32 %v606_v6, %v7093_v5  ;;  %v736_v38 = vmax.f32 %v607_v10, %v7100_v47 }
  0xf0   : > { %v7142_v15 = vmax.f32 %v1436_v2, %v1491_v7  ;;  %v7144_v43 = vmax.f32 %v1437_v48, %v1493_v27  ;;  %v7146_v24 = vmax.f32 %v1438_v11, %v1495_v0  ;;  %v737_v3 = vmax.f32 %v608_v1, %v7102_v28 }
  0xf1   : > { %v738_v61 = vmax.f32 %v609_v19, %v674_v4  ;;  %v864_v25 = vmax.f32 %v735_v16, %v7133_v37  ;;  %v865_v40 = vmax.f32 %v736_v38, %v7135_v34  ;;  %v482_v54 = vmax.f32 %v6841_v35, %v7048_v53 }
  0xf2   : > { %9457 = vst [vmem:[#allocation18_spill] sm:$0xff] %v7142_v15  ;;  %v1958_v20 = vrot.slane %v7142_v15, 6  ;;  %v1959_v7 = vrot.slane %v7144_v43, 6  ;;  %v1961_v33 = vrot.slane %v7146_v24, 6  ;;  %v866_v30 = vmax.f32 %v737_v3, %v7140_v42 }
  0xf3   : > { %9458 = vst [vmem:[#allocation19_spill] sm:$0xff] %v7144_v43  ;;  %v867_v50 = vmax.f32 %v738_v61, %v803_v29  ;;  %v981_v46 = vrot.slane %v864_v25, 1  ;;  %v982_v57 = vrot.slane %v865_v40, 1  ;;  %v1150_v62 = vrot.slane %v865_v40, 2 }
  0xf4   : > { %9459 = vst [vmem:[#allocation20_spill] sm:$0xff] %v7146_v24  ;;  %v1960_v6 = vsel %vm1942_vm6, %v1958_v20, %v1959_v7  ;;  %v1962_v10 = vsel %vm1942_vm6, %v1959_v7, %v1961_v33  ;;  %v984_v1 = vrot.slane %v866_v30, 1  ;;  %v1151_v2 = vrot.slane %v866_v30, 2 }
  0xf5   : > { %v5791_v48 = vpack.i.bf16 %v1962_v10, %v1960_v6  ;;  %v983_v35 = vsel %vm960_vm2, %v981_v46, %v982_v57  ;;  %v1319_v11 = vrot.slane %v865_v40, 3  ;;  %v1320_v27 = vrot.slane %v866_v30, 3  ;;  %v356_v46 = vld [vmem:[#allocation2 + $0xb8] sm:$0x3] }
  0xf6   : > { %v985_v4 = vsel %vm960_vm2, %v982_v57, %v984_v1  ;;  %v1101_v0 = vmax.f32 %v864_v25, %v983_v35  ;;  %v1103_v19 = vmax.f32 %v866_v30, %v984_v1  ;;  %v1152_v16 = vsel %vm1137_vm3, %v1150_v62, %v1151_v2  ;;  %v421_v10 = vld [vmem:[#allocation2 + $0xd8] sm:$0x3] }
  0xf7   : > { %5792 = vrot.lane.b32.xlu1 %v5791_v48, %s6016_s15  ;;  %v1102_v38 = vmax.f32 %v865_v40, %v985_v4  ;;  %v1321_v3 = vsel %vm1298_vm4, %v1319_v11, %v1320_v27  ;;  %v1322_v29 = vrot.slane %v867_v50, 3  ;;  %v1496_v61 = vrot.slane %v865_v40, 4 }
  0xf8   : > { %v1246_v20 = vmax.f32 %v1101_v0, %v1150_v62  ;;  %v1248_v7 = vmax.f32 %v1103_v19, %v1151_v2  ;;  %v1497_v33 = vrot.slane %v866_v30, 4  ;;  %v1499_v6 = vrot.slane %v867_v50, 4  ;;  %v549_v62 = vld [vmem:[#allocation2 + $0xf8] sm:$0x3] }
  0xf9   : > { %v1247_v39 = vmax.f32 %v1102_v38, %v1152_v16  ;;  %v1323_v57 = vsel %vm1298_vm4, %v1320_v27, %v1322_v29  ;;  %v483_v25 = vmax.f32 %v6919_v13, %v7050_v12  ;;  %v484_v1 = vmax.f32 %v6933_v17, %v7067_v45  ;;  %v678_v17 = vld [vmem:[#allocation2 + $0x118] sm:$0x3]  ;;  %v7186_v29 = vld [vmem:[#allocation2 + $0x128] sm:$0xff] }
  0xfa   : > { %v1439_v48 = vmax.f32 %v1246_v20, %v1319_v11  ;;  %v1441_v35 = vmax.f32 %v1248_v7, %v1323_v57  ;;  %v1498_v4 = vsel %vm1475_vm5, %v1496_v61, %v1497_v33  ;;  %v1500_v40 = vsel %vm1475_vm5, %v1497_v33, %v1499_v6  ;;  %v7195_v57 = vld [vmem:[#allocation2 + $0x130] sm:$0xff] }
  0xfb   : > { %v1440_v30 = vmax.f32 %v1247_v39, %v1321_v3  ;;  %v485_v50 = vmax.f32 %v356_v46, %v421_v10  ;;  %v610_v2 = vmax.f32 %v482_v54, %v7093_v5  ;;  %v611_v0 = vmax.f32 %v483_v25, %v7100_v47  ;;  %v7184_v54 = vld [vmem:[#allocation2 + $0x120] sm:$0xff]  ;;  %v807_v25 = vld [vmem:[#allocation2 + $0x138] sm:$0x3] }
  0xfc   : > { %v7173_v27 = vmax.f32 %v1439_v48, %v1496_v61  ;;  %v7175_v19 = vmax.f32 %v1441_v35, %v1500_v40  ;;  %v612_v13 = vmax.f32 %v484_v1, %v7102_v28  ;;  %v486_v11 = vmax.f32 %v7048_v53, %v7093_v5 }
  0xfd   : > { %v7180_v16 = vmax.f32 %v1440_v30, %v1498_v4  ;;  %v613_v38 = vmax.f32 %v485_v50, %v549_v62  ;;  %v739_v39 = vmax.f32 %v610_v2, %v7133_v37  ;;  %v740_v3 = vmax.f32 %v611_v0, %v7135_v34 }
  0xfe   : > { %9460 = vst [vmem:[#allocation21_spill] sm:$0xff] %v7173_v27  ;;  %v1963_v61 = vrot.slane %v7173_v27, 6  ;;  %v1966_v20 = vrot.slane %v7175_v19, 6  ;;  %v1850_v7 = vrot.slane %v7173_v27, 7  ;;  %v1853_v33 = vrot.slane %v7175_v19, 7 }
  0xff   : > { %9461 = vst [vmem:[#allocation22_spill] sm:$0xff] %v7175_v19  ;;  %v1964_v53 = vrot.slane %v7180_v16, 6  ;;  %v1851_v6 = vrot.slane %v7180_v16, 7  ;;  %v741_v46 = vmax.f32 %v612_v13, %v7140_v42  ;;  %v742_v10 = vmax.f32 %v613_v38, %v678_v17 }
 0x100   : > { %9462 = vst [vmem:[#allocation23_spill] sm:$0xff] %v7180_v16  ;;  %v868_v1 = vmax.f32 %v739_v39, %v7184_v54  ;;  %v869_v48 = vmax.f32 %v740_v3, %v7186_v29  ;;  %v487_v35 = vmax.f32 %v7050_v12, %v7100_v47  ;;  %v488_v4 = vmax.f32 %v7067_v45, %v7102_v28 }
 0x101   : > { %v1965_v40 = vsel %vm1942_vm6, %v1963_v61, %v1964_v53  ;;  %v1967_v62 = vsel %vm1942_vm6, %v1964_v53, %v1966_v20  ;;  %v1852_v30 = vsel %vm1813_vm7, %v1850_v7, %v1851_v6  ;;  %v1854_v50 = vsel %vm1813_vm7, %v1851_v6, %v1853_v33  ;;  %v360_v53 = vld [vmem:[#allocation2 + $0xd8] sm:$0x3] }
 0x102   : > { %v5801_v2 = vpack.i.bf16 %v1967_v62, %v1965_v40  ;;  %v1930_v0 = vsel %vm960_vm2, %v1854_v50, 0.0  ;;  %v870_v13 = vmax.f32 %v741_v46, %v7195_v57  ;;  %v871_v17 = vmax.f32 %v742_v10, %v807_v25  ;;  %v425_v46 = vld [vmem:[#allocation2 + $0xf8] sm:$0x3] }
 0x103   : > { %v5806_v38 = vpack.i.bf16 %v1930_v0, %v1852_v30  ;;  %v986_v39 = vrot.slane %v868_v1, 1  ;;  %v987_v12 = vrot.slane %v869_v48, 1  ;;  %v1153_v3 = vrot.slane %v869_v48, 2 }
 0x104   : > { %5802 = vrot.lane.b32.xlu0 %v5801_v2, %s6016_s15  ;;  %v989_v45 = vrot.slane %v870_v13, 1  ;;  %v1154_v61 = vrot.slane %v870_v13, 2  ;;  %v1324_v19 = vrot.slane %v869_v48, 3  ;;  %v1325_v20 = vrot.slane %v870_v13, 3 }
 0x105   : > { %5807 = vrot.lane.b32.xlu1 %v5806_v38, %s6017_s19  ;;  %v988_v7 = vsel %vm960_vm2, %v986_v39, %v987_v12  ;;  %v1327_v33 = vrot.slane %v871_v17, 3  ;;  %v1501_v6 = vrot.slane %v869_v48, 4  ;;  %v1502_v40 = vrot.slane %v870_v13, 4  ;;  %v553_v38 = vld [vmem:[#allocation2 + $0x118] sm:$0x3] }
 0x106   : > { %v990_v10 = vsel %vm960_vm2, %v987_v12, %v989_v45  ;;  %v1104_v25 = vmax.f32 %v868_v1, %v988_v7  ;;  %v1106_v62 = vmax.f32 %v870_v13, %v989_v45  ;;  %v1155_v30 = vsel %vm1137_vm3, %v1153_v3, %v1154_v61  ;;  %v682_v12 = vld [vmem:[#allocation2 + $0x138] sm:$0x3] }
 0x107   : > { %v1105_v50 = vmax.f32 %v869_v48, %v990_v10  ;;  %v1326_v2 = vsel %vm1298_vm4, %v1324_v19, %v1325_v20  ;;  %v1328_v0 = vsel %vm1298_vm4, %v1325_v20, %v1327_v33  ;;  %v1503_v16 = vsel %vm1475_vm5, %v1501_v6, %v1502_v40 }
 0x108   : > { %v1249_v27 = vmax.f32 %v1104_v25, %v1153_v3  ;;  %v1251_v39 = vmax.f32 %v1106_v62, %v1154_v61  ;;  %v1504_v41 = vrot.slane %v871_v17, 4  ;;  %v489_v24 = vmax.f32 %v360_v53, %v425_v46  ;;  %v811_v61 = vld [vmem:[#allocation2 + $0x158] sm:$0x3] }
 0x109   : > { %v1250_v43 = vmax.f32 %v1105_v50, %v1155_v30  ;;  %v614_v15 = vmax.f32 %v486_v11, %v7133_v37  ;;  %v615_v1 = vmax.f32 %v487_v35, %v7135_v34  ;;  %v616_v13 = vmax.f32 %v488_v4, %v7140_v42 }
 0x10a   : > { %v1442_v48 = vmax.f32 %v1249_v27, %v1324_v19  ;;  %v1444_v45 = vmax.f32 %v1251_v39, %v1328_v0  ;;  %v1505_v7 = vsel %vm1475_vm5, %v1502_v40, %v1504_v41  ;;  %v617_v20 = vmax.f32 %v489_v24, %v553_v38 }
 0x10b   : > { %v1443_v33 = vmax.f32 %v1250_v43, %v1326_v2  ;;  %v743_v10 = vmax.f32 %v614_v15, %v7184_v54  ;;  %v744_v3 = vmax.f32 %v615_v1, %v7186_v29  ;;  %v745_v17 = vmax.f32 %v616_v13, %v7195_v57 }
 0x10c   : > { %v7224_v53 = vmax.f32 %v1442_v48, %v1501_v6  ;;  %v7226_v11 = vmax.f32 %v1444_v45, %v1505_v7  ;;  %v746_v35 = vmax.f32 %v617_v20, %v682_v12  ;;  %v490_v27 = vmax.f32 %v7093_v5, %v7133_v37  ;;  %v364_v48 = vld [vmem:[#allocation2 + $0xf8] sm:$0x3] }
 0x10d   : > { %v7230_v19 = vmax.f32 %v1443_v33, %v1503_v16  ;;  %v872_v41 = vmax.f32 %v743_v10, %v6820_v36  ;;  %v873_v43 = vmax.f32 %v744_v3, %v6822_v22  ;;  %v874_v15 = vmax.f32 %v745_v17, %v6869_v14  ;;  %v429_v45 = vld [vmem:[#allocation2 + $0x118] sm:$0x3] }
 0x10e   : > { %v1855_v24 = vrot.slane %v7224_v53, 7  ;;  %v1858_v4 = vrot.slane %v7226_v11, 7  ;;  %v875_v6 = vmax.f32 %v746_v35, %v811_v61  ;;  %v491_v40 = vmax.f32 %v7100_v47, %v7135_v34 }
 0x10f   : > { %v1856_v46 = vrot.slane %v7230_v19, 7  ;;  %v991_v25 = vrot.slane %v872_v41, 1  ;;  %v992_v5 = vrot.slane %v873_v43, 1  ;;  %v994_v37 = vrot.slane %v874_v15, 1 }
 0x110   : > { %v1156_v16 = vrot.slane %v873_v43, 2  ;;  %v1157_v62 = vrot.slane %v874_v15, 2  ;;  %v1329_v36 = vrot.slane %v873_v43, 3  ;;  %v1330_v30 = vrot.slane %v874_v15, 3 }
 0x111   : > { %v1857_v22 = vsel %vm1813_vm7, %v1855_v24, %v1856_v46  ;;  %v1859_v14 = vsel %vm1813_vm7, %v1856_v46, %v1858_v4  ;;  %v993_v50 = vsel %vm960_vm2, %v991_v25, %v992_v5  ;;  %v995_v2 = vsel %vm960_vm2, %v992_v5, %v994_v37  ;;  %v557_v25 = vld [vmem:[#allocation2 + $0x138] sm:$0x3] }
 0x112   : > { %v1931_v0 = vsel %vm960_vm2, %v1859_v14, 0.0  ;;  %v1107_v47 = vmax.f32 %v872_v41, %v993_v50  ;;  %v1108_v34 = vmax.f32 %v873_v43, %v995_v2  ;;  %v1109_v38 = vmax.f32 %v874_v15, %v994_v37  ;;  %v6002_v14 = vld [vmem:[#allocation2 + $0x148] sm:$0xff] }
 0x113   : > { %v5816_v39 = vpack.i.bf16 %v1931_v0, %v1857_v22  ;;  %v1158_v1 = vsel %vm1137_vm3, %v1156_v16, %v1157_v62  ;;  %v1331_v13 = vsel %vm1298_vm4, %v1329_v36, %v1330_v30  ;;  %v1332_v12 = vrot.slane %v875_v6, 3 }
 0x114   : > { %v1252_v7 = vmax.f32 %v1107_v47, %v1156_v16  ;;  %v1253_v20 = vmax.f32 %v1108_v34, %v1158_v1  ;;  %v1254_v33 = vmax.f32 %v1109_v38, %v1157_v62  ;;  %v1506_v10 = vrot.slane %v873_v43, 4  ;;  %v815_v47 = vld [vmem:[#allocation2 + $0x178] sm:$0x3]  ;;  %v6004_v38 = vld [vmem:[#allocation2 + $0x160] sm:$0xff] }
 0x115   : > { %5817 = vrot.lane.b32.xlu0 %v5816_v39, %s6017_s19  ;;  %v1333_v3 = vsel %vm1298_vm4, %v1330_v30, %v1332_v12  ;;  %v1507_v17 = vrot.slane %v874_v15, 4  ;;  %v1509_v61 = vrot.slane %v875_v6, 4  ;;  %v492_v35 = vmax.f32 %v7102_v28, %v7140_v42  ;;  %v686_v42 = vld [vmem:[#allocation2 + $0x158] sm:$0x3]  ;;  %v6001_v30 = vld [vmem:[#allocation2 + $0x140] sm:$0xff]  ;;  %v6005_v39 = vld [vmem:[#allocation2 + $0x168] sm:$0xff] }
 0x116   : > { %v1445_v41 = vmax.f32 %v1252_v7, %v1329_v36  ;;  %v1446_v24 = vmax.f32 %v1253_v20, %v1331_v13  ;;  %v1447_v4 = vmax.f32 %v1254_v33, %v1333_v3  ;;  %v493_v46 = vmax.f32 %v364_v48, %v429_v45  ;;  %v6006_v45 = vld [vmem:[#allocation2 + $0x170] sm:$0xff] }
 0x117   : > { %v1508_v5 = vsel %vm1475_vm5, %v1506_v10, %v1507_v17  ;;  %v1510_v37 = vsel %vm1475_vm5, %v1507_v17, %v1509_v61  ;;  %v618_v43 = vmax.f32 %v490_v27, %v7184_v54  ;;  %v619_v16 = vmax.f32 %v491_v40, %v7186_v29  ;;  %v6003_v40 = vld [vmem:[#allocation2 + $0x150] sm:$0xff] }
 0x118   : > { %v7255_v62 = vmax.f32 %v1445_v41, %v1506_v10  ;;  %v7257_v15 = vmax.f32 %v1446_v24, %v1508_v5  ;;  %v7259_v6 = vmax.f32 %v1447_v4, %v1510_v37  ;;  %v620_v28 = vmax.f32 %v492_v35, %v7195_v57 }
 0x119   : > { %v621_v36 = vmax.f32 %v493_v46, %v557_v25  ;;  %v747_v22 = vmax.f32 %v618_v43, %v6001_v30  ;;  %v748_v50 = vmax.f32 %v619_v16, %v6002_v14  ;;  %v2003_v2 = vrot.slane %v6638_v58, 6 }
 0x11a   : > { %v1973_v54 = vrot.slane %v7255_v62, 6  ;;  %v1974_v29 = vrot.slane %v7257_v15, 6  ;;  %v1976_v27 = vrot.slane %v7259_v6, 6  ;;  %v749_v0 = vmax.f32 %v620_v28, %v6003_v40 }
 0x11b   : > { %v750_v34 = vmax.f32 %v621_v36, %v686_v42  ;;  %v876_v57 = vmax.f32 %v747_v22, %v6004_v38  ;;  %v877_v1 = vmax.f32 %v748_v50, %v6005_v39  ;;  %v2004_v13 = vrot.slane %v6643_v26, 6 }
 0x11c   : > { %v1975_v12 = vsel %vm1942_vm6, %v1973_v54, %v1974_v29  ;;  %v1977_v48 = vsel %vm1942_vm6, %v1974_v29, %v1976_v27  ;;  %v878_v7 = vmax.f32 %v749_v0, %v6006_v45  ;;  %v2006_v20 = vrot.slane %v6645_v21, 6  ;;  %v5683_v27 = vpop.permute.xlu0 %5682 }
 0x11d   : > { %v5821_v33 = vpack.i.bf16 %v1977_v48, %v1975_v12  ;;  %v879_v10 = vmax.f32 %v750_v34, %v815_v47  ;;  %v996_v3 = vrot.slane %v876_v57, 1  ;;  %v997_v17 = vrot.slane %v877_v1, 1 }
 0x11e   : > { %v999_v61 = vrot.slane %v878_v7, 1  ;;  %v1159_v35 = vrot.slane %v877_v1, 2  ;;  %v1160_v41 = vrot.slane %v878_v7, 2  ;;  %v1334_v24 = vrot.slane %v877_v1, 3 }
 0x11f   : > { %5822 = vrot.lane.b32.xlu1 %v5821_v33, %s6016_s15  ;;  %v998_v4 = vsel %vm960_vm2, %v996_v3, %v997_v17  ;;  %v1335_v46 = vrot.slane %v878_v7, 3  ;;  %v1337_v25 = vrot.slane %v879_v10, 3  ;;  %v1511_v5 = vrot.slane %v877_v1, 4 }
 0x120   : > { %v1000_v37 = vsel %vm960_vm2, %v997_v17, %v999_v61  ;;  %v1110_v43 = vmax.f32 %v876_v57, %v998_v4  ;;  %v1112_v16 = vmax.f32 %v878_v7, %v999_v61  ;;  %v1161_v28 = vsel %vm1137_vm3, %v1159_v35, %v1160_v41 }
 0x121   : > { %v1111_v42 = vmax.f32 %v877_v1, %v1000_v37  ;;  %v1336_v36 = vsel %vm1298_vm4, %v1334_v24, %v1335_v46  ;;  %v1338_v30 = vsel %vm1298_vm4, %v1335_v46, %v1337_v25  ;;  %v1512_v22 = vrot.slane %v878_v7, 4 }
 0x122   : > { %v1255_v14 = vmax.f32 %v1110_v43, %v1159_v35  ;;  %v1257_v50 = vmax.f32 %v1112_v16, %v1160_v41  ;;  %v1514_v54 = vrot.slane %v879_v10, 4  ;;  %v2005_v29 = vsel %vm1942_vm6, %v2003_v2, %v2004_v13 }
 0x123   : > { %v1256_v40 = vmax.f32 %v1111_v42, %v1161_v28  ;;  %v1513_v0 = vsel %vm1475_vm5, %v1511_v5, %v1512_v22  ;;  %v2007_v47 = vsel %vm1942_vm6, %v2004_v13, %v2006_v20  ;;  %v1895_v34 = vrot.slane %v6696_v59, 7 }
 0x124   : > { %v1448_v38 = vmax.f32 %v1255_v14, %v1334_v24  ;;  %v1450_v57 = vmax.f32 %v1257_v50, %v1338_v30  ;;  %v1515_v39 = vsel %vm1475_vm5, %v1512_v22, %v1514_v54  ;;  %v5721_v1 = vpack.i.bf16 %v2007_v47, %v2005_v29  ;;  %v5688_v30 = vpop.permute.xlu0 %5687  ;;  %v5533_v54 = vld [vmem:[%s9398_s1 + $0x8] sm:$0xf]  ;;  %v5662_v29 = vld [vmem:[%s9398_s1 + $0x8] sm:$0x30] }
 0x125   : > { %v1449_v12 = vmax.f32 %v1256_v40, %v1336_v36  ;;  %v1896_v48 = vrot.slane %v6704_v9, 7  ;;  %v1898_v45 = vrot.slane %v6700_v31, 7  ;;  %v1742_v4 = vrot.slane %v6225_v55, 5  ;;  %v9463_v47 = vld [vmem:[#allocation12_spill] sm:$0xff] }
 0x126   : > { %v7283_v7 = vmax.f32 %v1448_v38, %v1511_v5  ;;  %v7285_v2 = vmax.f32 %v1450_v57, %v1515_v39  ;;  %5722 = vrot.lane.b32.xlu2 %v5721_v1, %s6016_s15  ;;  %v1744_v25 = vrot.slane %v6221_v52, 5  ;;  %v1741_v5 = vrot.slane %v6219_v51, 5  ;;  %v9464_v57 = vld [vmem:[#allocation14_spill] sm:$0xff] }
 0x127   : > { %v7288_v33 = vmax.f32 %v1449_v12, %v1513_v0  ;;  %v1897_v13 = vsel %vm1813_vm7, %v1895_v34, %v1896_v48  ;;  %v1899_v20 = vsel %vm1813_vm7, %v1896_v48, %v1898_v45  ;;  %v5685_v51 = vunpack.i.h.bf16 %v5683_v27  ;;  %v9466_v45 = vld [vmem:[#allocation5_spill] sm:$0xff] }
 0x128   : > { %v1978_v10 = vrot.slane %v7283_v7, 6  ;;  %v1981_v3 = vrot.slane %v7285_v2, 6  ;;  %v1865_v17 = vrot.slane %v7283_v7, 7  ;;  %v1868_v61 = vrot.slane %v7285_v2, 7 }
 0x129   : > { %v1979_v35 = vrot.slane %v7288_v33, 6  ;;  %v1866_v41 = vrot.slane %v7288_v33, 7  ;;  %v1939_v24 = vsel %vm960_vm2, %v1899_v20, 0.0  ;;  %v1743_v55 = vsel %vm1700_vm8, %v1741_v5, %v1742_v4  ;;  %v5693_v20 = vpop.permute.xlu1 %5692 }
 0x12a   : > { %v5736_v46 = vpack.i.bf16 %v1939_v24, %v1897_v13  ;;  %v1745_v52 = vsel %vm1700_vm8, %v1742_v4, %v1744_v25  ;;  %v5684_v14 = vunpack.i.l.bf16 %v5683_v27  ;;  %v5690_v50 = vunpack.i.h.bf16 %v5688_v30  ;;  %v9465_v27 = vld [vmem:[#allocation13_spill] sm:$0xff] }
 0x12b   : > { %v1980_v37 = vsel %vm1942_vm6, %v1978_v10, %v1979_v35  ;;  %v1982_v43 = vsel %vm1942_vm6, %v1979_v35, %v1981_v3  ;;  %v1867_v16 = vsel %vm1813_vm7, %v1865_v17, %v1866_v41  ;;  %v1869_v28 = vsel %vm1813_vm7, %v1866_v41, %v1868_v61  ;;  %v9467_v10 = vld [vmem:[#allocation3_spill] sm:$0xff]  ;;  %v5663_v25 = vld [vmem:[%s9398_s1 + $0x10] sm:$0x30] }
 0x12c   : > { %v5831_v42 = vpack.i.bf16 %v1982_v43, %v1980_v37  ;;  %v1933_v36 = vsel %vm960_vm2, %v1869_v28, 0.0  ;;  %v1822_v40 = vsel %vm1813_vm7, 0.0, %v1743_v55  ;;  %v5689_v0 = vunpack.i.l.bf16 %v5688_v30  ;;  %v9468_v43 = vld [vmem:[#allocation4_spill] sm:$0xff] }
 0x12d   : > { %v5836_v22 = vpack.i.bf16 %v1933_v36, %v1867_v16  ;;  %v2018_v34 = vrot.slane %v9463_v47, 6  ;;  %v2248_v38 = vsel %vm145_vm0, %v1745_v52, %v5685_v51  ;;  %v2019_v39 = vrot.slane %v9464_v57, 6 }
 0x12e   : > { %5832 = vrot.lane.b32.xlu0 %v5831_v42, %s6016_s15  ;;  %5737 = vrot.lane.b32.xlu2 %v5736_v46, %s6017_s19  ;;  %v2021_v1 = vrot.slane %v9465_v27, 6  ;;  %v5534_v12 = vor.u32 %v5662_v29, %v5533_v54  ;;  %v2247_v48 = vsel %vm145_vm0, %v1822_v40, %v5684_v14  ;;  %v1747_v13 = vrot.slane %v9466_v45, 5  ;;  %v5574_v46 = vld [vmem:[%s9398_s1 + $0x10] sm:$0xf] }
 0x12f   : > { %5837 = vrot.lane.b32.xlu1 %v5836_v22, %s6017_s19  ;;  %v1746_v3 = vrot.slane %v9467_v10, 5  ;;  %v2281_v17 = vsel %vm2263_vm9, %v2248_v38, %v5690_v50  ;;  %v2280_v61 = vsel %vm2263_vm9, %v2247_v48, %v5689_v0  ;;  %v2020_v35 = vsel %vm1942_vm6, %v2018_v34, %v2019_v39 }
 0x130   : > { %v2022_v41 = vsel %vm1942_vm6, %v2019_v39, %v2021_v1  ;;  %v2468_v24 = vsel %vm1137_vm3, %v5534_v12, 0  ;;  %v2312_v5 = vpack.c.bf16 %v2280_v61, %v2280_v61  ;;  %v2313_v37 = vpack.c.bf16 %v2281_v17, %v2281_v17 }
 0x131   : > { %v5751_v4 = vpack.i.bf16 %v2022_v41, %v2020_v35  ;;  %5667 = vmatpush.bf16.msra.mxu2 %v2468_v24  ;;  %2477 = vmatpush.bf16.msra.mxu0 %v2468_v24  ;;  %v1749_v16 = vrot.slane %v9468_v43, 5  ;;  %v1748_v28 = vsel %vm1700_vm8, %v1746_v3, %v1747_v13  ;;  %v5575_v42 = vor.u32 %v5663_v25, %v5574_v46  ;;  %v5698_v39 = vpop.permute.xlu1 %5697 }
 0x132   : > { %v1835_v36 = vrot.slane %v6968_v49, 7  ;;  %v2374_v30 = vunpack.c.l.b16 %v2312_v5  ;;  %v2375_v22 = vunpack.c.l.b16 %v2313_v37  ;;  %v1836_v55 = vrot.slane %v6973_v44, 7 }
 0x133   : > { %v1838_v51 = vrot.slane %v6970_v56, 7  ;;  %v5695_v52 = vunpack.i.h.bf16 %v5693_v20  ;;  %v2674_v14 = vsel %vm1137_vm3, %v5575_v42, 0  ;;  %v5694_v50 = vunpack.i.l.bf16 %v5693_v20  ;;  %v5703_v10 = vpop.permute.xlu2 %5702 }
 0x134   : > { %v7344_v54 = vpack.c.b16 %v2375_v22, %v2374_v30  ;;  %v1837_v29 = vsel %vm1813_vm7, %v1835_v36, %v1836_v55  ;;  %v1750_v0 = vsel %vm1700_vm8, %v1747_v13, %v1749_v16  ;;  %v1823_v34 = vsel %vm1813_vm7, 0.0, %v1748_v28 }
 0x135   : > { %2683 = vmatpush.bf16.msrb.mxu2 %v2674_v14  ;;  %v1839_v40 = vsel %vm1813_vm7, %v1836_v55, %v1838_v51  ;;  %v5700_v12 = vunpack.i.h.bf16 %v5698_v39  ;;  %v5699_v48 = vunpack.i.l.bf16 %v5698_v39  ;;  %v2250_v45 = vsel %vm145_vm0, %v1750_v0, %v5695_v52  ;;  %v5713_v39 = vpop.permute.xlu0 %5712 }
 0x136   : > { %5752 = vrot.lane.b32.xlu2 %v5751_v4, %s6016_s15  ;;  %v1927_v38 = vsel %vm960_vm2, %v1839_v40, 0.0  ;;  %5543 = vmatmul.msk.bf16.vlgmr.msra.gmra.mxu2 %vm2418_vm10, %v7344_v54  ;;  %v2249_v20 = vsel %vm145_vm0, %v1823_v34, %v5694_v50  ;;  %v1752_v17 = vrot.slane %v7037_v60, 5  ;;  %v1751_v61 = vrot.slane %v7035_v18, 5  ;;  %v9469_v50 = vld [vmem:[#allocation18_spill] sm:$0xff]  ;;  %v9470_v40 = vld [vmem:[#allocation19_spill] sm:$0xff]  ;;  %v9471_v34 = vld [vmem:[#allocation20_spill] sm:$0xff] }
 0x137   : > { %v5766_v1 = vpack.i.bf16 %v1927_v38, %v1837_v29  ;;  %v2283_v13 = vsel %vm2263_vm9, %v2250_v45, %v5700_v12  ;;  %v2282_v3 = vsel %vm2263_vm9, %v2249_v20, %v5699_v48  ;;  %v1754_v24 = vrot.slane %v7026_v32, 5  ;;  %v9472_v48 = vld [vmem:[#allocation6_spill] sm:$0xff]  ;;  %v9473_v20 = vld [vmem:[#allocation8_spill] sm:$0xff] }
 0x138   : > { %v2314_v35 = vpack.c.bf16 %v2282_v3, %v2282_v3  ;;  %v2315_v41 = vpack.c.bf16 %v2283_v13, %v2283_v13  ;;  %v1953_v4 = vrot.slane %v7097_v23, 6  ;;  %v1954_v46 = vrot.slane %v7110_v63, 6 }
 0x139   : > { %v1956_v25 = vrot.slane %v7104_v8, 6  ;;  %v1753_v5 = vsel %vm1700_vm8, %v1751_v61, %v1752_v17  ;;  %v5705_v28 = vunpack.i.h.bf16 %v5703_v10  ;;  %v5704_v18 = vunpack.i.l.bf16 %v5703_v10  ;;  %v5718_v13 = vpop.permute.xlu1 %5717 }
 0x13a   : > { %v2376_v37 = vunpack.c.l.b16 %v2314_v35  ;;  %v2377_v43 = vunpack.c.l.b16 %v2315_v41  ;;  %v1955_v16 = vsel %vm1942_vm6, %v1953_v4, %v1954_v46  ;;  %v1755_v32 = vsel %vm1700_vm8, %v1752_v17, %v1754_v24  ;;  %v9474_v4 = vld [vmem:[#allocation7_spill] sm:$0xff] }
 0x13b   : > { %v1957_v60 = vsel %vm1942_vm6, %v1954_v46, %v1956_v25  ;;  %v5708_v42 = vpop.permute.xlu2 %5707  ;;  %v1824_v30 = vsel %vm1813_vm7, 0.0, %v1753_v5  ;;  %v2252_v52 = vsel %vm145_vm0, %v1755_v32, %v5705_v28  ;;  %v1845_v29 = vrot.slane %v9469_v50, 7 }
 0x13c   : > { %v5781_v36 = vpack.i.bf16 %v1957_v60, %v1955_v16  ;;  %v7369_v22 = vpack.c.b16 %v2377_v43, %v2376_v37  ;;  %v5710_v55 = vunpack.i.h.bf16 %v5708_v42  ;;  %v5709_v51 = vunpack.i.l.bf16 %v5708_v42 }
 0x13d   : > { %v2251_v14 = vsel %vm145_vm0, %v1824_v30, %v5704_v18  ;;  %v1846_v0 = vrot.slane %v9470_v40, 7  ;;  %v1848_v38 = vrot.slane %v9471_v34, 7  ;;  %v1756_v45 = vrot.slane %v9472_v48, 5 }
 0x13e   : > { %5767 = vrot.lane.b32.xlu2 %v5766_v1, %s6017_s19  ;;  %v2285_v1 = vsel %vm2263_vm9, %v2252_v52, %v5710_v55  ;;  %v2284_v12 = vsel %vm2263_vm9, %v2251_v14, %v5709_v51  ;;  %v1757_v10 = vrot.slane %v9473_v20, 5  ;;  %v1759_v46 = vrot.slane %v9474_v4, 5 }
 0x13f   : > { %v1847_v3 = vsel %vm1813_vm7, %v1845_v29, %v1846_v0  ;;  %v1849_v17 = vsel %vm1813_vm7, %v1846_v0, %v1848_v38  ;;  %v2316_v35 = vpack.c.bf16 %v2284_v12, %v2284_v12  ;;  %v2317_v41 = vpack.c.bf16 %v2285_v1, %v2285_v1 }
 0x140   : > { %v1929_v61 = vsel %vm960_vm2, %v1849_v17, 0.0  ;;  %v1758_v25 = vsel %vm1700_vm8, %v1756_v45, %v1757_v10  ;;  %v5715_v5 = vunpack.i.h.bf16 %v5713_v39  ;;  %v5714_v37 = vunpack.i.l.bf16 %v5713_v39 }
 0x141   : > { %v5796_v24 = vpack.i.bf16 %v1929_v61, %v1847_v3  ;;  %v2378_v43 = vunpack.c.l.b16 %v2316_v35  ;;  %v2379_v16 = vunpack.c.l.b16 %v2317_v41  ;;  %v1760_v60 = vsel %vm1700_vm8, %v1757_v10, %v1759_v46  ;;  %v7393_v55 = vpop.permute.xlu1 %5732  ;;  %v9476_v46 = vld [vmem:[#allocation15_spill] sm:$0xff] }
 0x142   : > { %v1825_v28 = vsel %vm1813_vm7, 0.0, %v1758_v25  ;;  %v5720_v18 = vunpack.i.h.bf16 %v5718_v13  ;;  %v5719_v42 = vunpack.i.l.bf16 %v5718_v13  ;;  %v2254_v32 = vsel %vm145_vm0, %v1760_v60, %v5715_v5 }
 0x143   : > { %v2253_v30 = vsel %vm145_vm0, %v1825_v28, %v5714_v37  ;;  %v7395_v51 = vpack.c.b16 %v2379_v16, %v2378_v43  ;;  %v1761_v3 = vrot.slane %v6638_v58, 5  ;;  %v1762_v17 = vrot.slane %v6643_v26, 5 }
 0x144   : > { %v2286_v52 = vsel %vm2263_vm9, %v2253_v30, %v5719_v42  ;;  %v2287_v14 = vsel %vm2263_vm9, %v2254_v32, %v5720_v18  ;;  %v1766_v61 = vrot.slane %v6696_v59, 5  ;;  %v1767_v35 = vrot.slane %v6704_v9, 5 }
 0x145   : > { %v2318_v29 = vpack.c.bf16 %v2286_v52, %v2286_v52  ;;  %v2319_v0 = vpack.c.bf16 %v2287_v14, %v2287_v14  ;;  %v1764_v41 = vrot.slane %v6645_v21, 5  ;;  %v1701_v25 = vrot.slane %v9476_v46, 5  ;;  %v9477_v52 = vld [vmem:[#allocation17_spill] sm:$0xff] }
 0x146   : > { %5782 = vrot.lane.b32.xlu2 %v5781_v36, %s6016_s15  ;;  %5544 = vmatmul.msk.bf16.gmra.mxu2 %vm2418_vm10, %v7369_v22  ;;  %v5728_v36 = vpop.permute.xlu0 %5727  ;;  %v1763_v5 = vsel %vm1700_vm8, %v1761_v3, %v1762_v17  ;;  %v1769_v43 = vrot.slane %v6700_v31, 5  ;;  %v1768_v58 = vsel %vm1700_vm8, %v1766_v61, %v1767_v35  ;;  %v5735_v26 = vunpack.i.h.bf16 %v7393_v55 }
 0x147   : > { %v2380_v1 = vunpack.c.l.b16 %v2318_v29  ;;  %v2381_v12 = vunpack.c.l.b16 %v2319_v0  ;;  %v5730_v37 = vunpack.i.h.bf16 %v5728_v36  ;;  %v5729_v16 = vunpack.i.l.bf16 %v5728_v36 }
 0x148   : > { %v1765_v59 = vsel %vm1700_vm8, %v1762_v17, %v1764_v41  ;;  %v1826_v9 = vsel %vm1813_vm7, 0.0, %v1763_v5  ;;  %v1968_v21 = vrot.slane %v7224_v53, 6  ;;  %v1969_v28 = vrot.slane %v7230_v19, 6  ;;  %v5661_v5 = vld [vmem:[%s9398_s1] sm:$0x30] }
 0x149   : > { %v7403_v39 = vpop.permute.xlu1 %5747  ;;  %v7405_v48 = vpack.c.b16 %v2381_v12, %v2380_v1  ;;  %v1971_v18 = vrot.slane %v7226_v11, 6  ;;  %v5734_v42 = vunpack.i.l.bf16 %v7393_v55  ;;  %v1770_v30 = vsel %vm1700_vm8, %v1767_v35, %v1769_v43 }
 0x14a   : > { %v1704_v14 = vrot.slane %v9477_v52, 5  ;;  %v1970_v0 = vsel %vm1942_vm6, %v1968_v21, %v1969_v28  ;;  %v1827_v41 = vsel %vm1813_vm7, 0.0, %v1768_v58 }
 0x14b   : > { %v1972_v1 = vsel %vm1942_vm6, %v1969_v28, %v1971_v18 }
 0x14c   : > { %v5811_v61 = vpack.i.bf16 %v1972_v1, %v1970_v0 }
 0x14e   : > { %5797 = vrot.lane.b32.xlu2 %v5796_v24, %s6017_s19  ;;  %v7401_v38 = vpop.permute.xlu0 %5742  ;;  %v9475_v24 = vld [vmem:[#allocation16_spill] sm:$0xff] }
 0x14f   : > { %v1702_v4 = vrot.slane %v9475_v24, 5 }
 0x151   : > { %v7411_v20 = vpop.permute.xlu1 %5762  ;;  %v1703_v31 = vsel %vm1700_vm8, %v1701_v25, %v1702_v4  ;;  %v5553_v25 = vld [vmem:[%s9398_s1] sm:$0xf] }
 0x152   : > { %v1814_v35 = vsel %vm1813_vm7, 0.0, %v1703_v31  ;;  %v5554_v58 = vor.u32 %v5661_v5, %v5553_v25  ;;  %v2258_v31 = vsel %vm145_vm0, %v1770_v30, %v5735_v26 }
 0x154   : > { %v2568_v18 = vsel %vm1137_vm3, %v5554_v58, 0 }
 0x155   : > { %5668 = vmatpush.bf16.msra.mxu3 %v2568_v18  ;;  %2577 = vmatpush.bf16.msra.mxu1 %v2568_v18 }
 0x156   : > { %5545 = vmatmul.msk.bf16.gmra.mxu2 %vm2418_vm10, %v7395_v51  ;;  %v7409_v45 = vpop.permute.xlu0 %5757  ;;  %5812 = vrot.lane.b32.xlu2 %v5811_v61, %s6016_s15  ;;  %v1863_v61 = vrot.slane %v7259_v6, 7 }
 0x159   : > { %v7413_v13 = vpop.permute.xlu1 %5777 }
 0x15e   : > { %v5773_v10 = vpop.permute.xlu0 %5772 }
 0x15f   : > { %v5774_v12 = vunpack.i.l.bf16 %v5773_v10  ;;  %v5775_v43 = vunpack.i.h.bf16 %v5773_v10  ;;  %v5780_v10 = vunpack.i.h.bf16 %v7413_v13 }
 0x166   : > { %5546 = vmatmul.msk.bf16.gmra.mxu2 %vm2418_vm10, %v7405_v48  ;;  %v7435_v29 = vpop.permute.xlu0 %5787 }
 0x169   : > { %v7439_v3 = vpop.permute.xlu1 %5792 }
 0x176   : > { %v7470_v30 = vpop.permute.xlu0 %5802 }
 0x180   : > { %v5723_v60 = vpop.permute.xlu2 %5722 }
 0x181   : > { %v5725_v36 = vunpack.i.h.bf16 %v5723_v60  ;;  %v5724_v32 = vunpack.i.l.bf16 %v5723_v60  ;;  %v1705_v60 = vsel %vm1700_vm8, %v1702_v4, %v1704_v14 }
 0x182   : > { %v2232_v52 = vsel %vm145_vm0, %v1705_v60, %v5775_v43 }
 0x183   : > { %v2256_v17 = vsel %vm145_vm0, %v1765_v59, %v5725_v36  ;;  %v2255_v55 = vsel %vm145_vm0, %v1826_v9, %v5724_v32  ;;  %v2257_v36 = vsel %vm145_vm0, %v1827_v41, %v5734_v42 }
 0x184   : > { %v2288_v24 = vsel %vm2263_vm9, %v2255_v55, %v5729_v16  ;;  %v2289_v46 = vsel %vm2263_vm9, %v2256_v17, %v5730_v37  ;;  %v5779_v16 = vunpack.i.l.bf16 %v7413_v13  ;;  %v2231_v37 = vsel %vm145_vm0, %v1814_v35, %v5774_v12  ;;  %v7473_v17 = vpop.permute.xlu1 %5807  ;;  %v9478_v35 = vld [vmem:[#allocation9_spill] sm:$0xff] }
 0x185   : > { %v2320_v59 = vpack.c.bf16 %v2288_v24, %v2288_v24  ;;  %v2321_v9 = vpack.c.bf16 %v2289_v46, %v2289_v46  ;;  %v2265_v13 = vsel %vm2263_vm9, %v2232_v52, %v5780_v10  ;;  %v1860_v12 = vrot.slane %v7255_v62, 7  ;;  %v9479_v46 = vld [vmem:[#allocation10_spill] sm:$0xff] }
 0x186   : > { %v2264_v1 = vsel %vm2263_vm9, %v2231_v37, %v5779_v16  ;;  %v1861_v55 = vrot.slane %v7257_v15, 7  ;;  %v1771_v24 = vrot.slane %v9478_v35, 5  ;;  %v1772_v25 = vrot.slane %v9479_v46, 5 }
 0x187   : > { %v2382_v21 = vunpack.c.l.b16 %v2320_v59  ;;  %v2383_v28 = vunpack.c.l.b16 %v2321_v9  ;;  %v2296_v41 = vpack.c.bf16 %v2264_v1, %v2264_v1  ;;  %v2297_v58 = vpack.c.bf16 %v2265_v13, %v2265_v13 }
 0x188   : > { %v5738_v32 = vpop.permute.xlu2 %5737  ;;  %v1862_v59 = vsel %vm1813_vm7, %v1860_v12, %v1861_v55  ;;  %v1864_v9 = vsel %vm1813_vm7, %v1861_v55, %v1863_v61  ;;  %v1707_v37 = vrot.slane %v6973_v44, 5  ;;  %v1773_v10 = vsel %vm1700_vm8, %v1771_v24, %v1772_v25  ;;  %v7497_v55 = vpop.permute.xlu0 %5817 }
 0x189   : > { %v7462_v4 = vpack.c.b16 %v2383_v28, %v2382_v21  ;;  %v5740_v14 = vunpack.i.h.bf16 %v5738_v32  ;;  %v5739_v0 = vunpack.i.l.bf16 %v5738_v32  ;;  %v2358_v60 = vunpack.c.l.b16 %v2296_v41  ;;  %v9480_v32 = vld [vmem:[#allocation11_spill] sm:$0xff] }
 0x18a   : > { %v1932_v16 = vsel %vm960_vm2, %v1864_v9, 0.0  ;;  %v1706_v21 = vrot.slane %v6968_v49, 5  ;;  %v1774_v52 = vrot.slane %v9480_v32, 5  ;;  %v5744_v44 = vunpack.i.l.bf16 %v7401_v38 }
 0x18b   : > { %5547 = vmatmul.msk.bf16.gmra.mxu2 %vm2418_vm10, %v7462_v4  ;;  %v2290_v26 = vsel %vm2263_vm9, %v2257_v36, %v5739_v0  ;;  %v2291_v42 = vsel %vm2263_vm9, %v2258_v31, %v5740_v14  ;;  %v5826_v18 = vpack.i.bf16 %v1932_v16, %v1862_v59  ;;  %v2359_v31 = vunpack.c.l.b16 %v2297_v58 }
 0x18c   : > { %v2322_v5 = vpack.c.bf16 %v2290_v26, %v2290_v26  ;;  %v2323_v43 = vpack.c.bf16 %v2291_v42, %v2291_v42  ;;  %v9430_v36 = vmov 0   ;;  %v1709_v49 = vrot.slane %v6970_v56, 5 }
 0x18d   : > { %2578 = vmatmul.bf16.vlgmr.msra.gmra.mxu1 %v9430_v36  ;;  %5827 = vrot.lane.b32.xlu2 %v5826_v18, %s6017_s19  ;;  %v2388_v1 = vpack.c.b16 %v2359_v31, %v2358_v60  ;;  %v1828_v26 = vsel %vm1813_vm7, 0.0, %v1773_v10  ;;  %v5745_v42 = vunpack.i.h.bf16 %v7401_v38  ;;  %v1708_v13 = vsel %vm1700_vm8, %v1706_v21, %v1707_v37 }
 0x18e   : > { %v2384_v14 = vunpack.c.l.b16 %v2322_v5  ;;  %v2385_v0 = vunpack.c.l.b16 %v2323_v43  ;;  %v1775_v12 = vsel %vm1700_vm8, %v1772_v25, %v1774_v52  ;;  %v5749_v61 = vunpack.i.l.bf16 %v7403_v39 }
 0x18f   : > { %5535 = vmatmul.msk.bf16.vlgmr.msra.gmra.mxu0 %vm2418_vm10, %v2388_v1  ;;  %v5765_v41 = vunpack.i.h.bf16 %v7411_v20  ;;  %v5764_v35 = vunpack.i.l.bf16 %v7411_v20  ;;  %v2259_v38 = vsel %vm145_vm0, %v1828_v26, %v5744_v44  ;;  %v5750_v46 = vunpack.i.h.bf16 %v7403_v39 }
 0x190   : > { %v7484_v28 = vpop.permute.xlu2 %5752  ;;  %v7504_v56 = vpack.c.b16 %v2385_v0, %v2384_v14  ;;  %v1710_v5 = vsel %vm1700_vm8, %v1707_v37, %v1709_v49  ;;  %v1815_v25 = vsel %vm1813_vm7, 0.0, %v1708_v13  ;;  %v2260_v43 = vsel %vm145_vm0, %v1775_v12, %v5745_v42 }
 0x191   : > { %v7502_v24 = vpop.permute.xlu1 %5822  ;;  %v1736_v59 = vrot.slane %v7283_v7, 5  ;;  %v1737_v9 = vrot.slane %v7288_v33, 5  ;;  %v2292_v20 = vsel %vm2263_vm9, %v2259_v38, %v5749_v61  ;;  %v2234_v58 = vsel %vm145_vm0, %v1710_v5, %v5765_v41 }
 0x192   : > { %v2233_v60 = vsel %vm145_vm0, %v1815_v25, %v5764_v35  ;;  %v2293_v16 = vsel %vm2263_vm9, %v2260_v43, %v5750_v46  ;;  %v1739_v37 = vrot.slane %v7285_v2, 5  ;;  %v1776_v33 = vrot.slane %v9463_v47, 5 }
 0x193   : > { %v1738_v7 = vsel %vm1700_vm8, %v1736_v59, %v1737_v9  ;;  %v1777_v31 = vrot.slane %v9464_v57, 5  ;;  %v2324_v52 = vpack.c.bf16 %v2292_v20, %v2292_v20  ;;  %v2325_v14 = vpack.c.bf16 %v2293_v16, %v2293_v16 }
 0x194   : > { %v1740_v49 = vsel %vm1700_vm8, %v1737_v9, %v1739_v37  ;;  %v1821_v2 = vsel %vm1813_vm7, 0.0, %v1738_v7  ;;  %v1779_v42 = vrot.slane %v9465_v27, 5  ;;  %v5760_v7 = vunpack.i.h.bf16 %v7409_v45 }
 0x195   : > { %v1778_v38 = vsel %vm1700_vm8, %v1776_v33, %v1777_v31  ;;  %v2386_v46 = vunpack.c.l.b16 %v2324_v52  ;;  %v2387_v43 = vunpack.c.l.b16 %v2325_v14  ;;  %v5759_v33 = vunpack.i.l.bf16 %v7409_v45 }
 0x196   : > { %v1829_v16 = vsel %vm1813_vm7, 0.0, %v1778_v38  ;;  %v5790_v52 = vunpack.i.h.bf16 %v7435_v29  ;;  %v1712_v14 = vrot.slane %v7110_v63, 5  ;;  %v1714_v45 = vrot.slane %v7104_v8, 5 }
 0x197   : > { %v1717_v38 = vrot.slane %v9470_v40, 5 }
 0x198   : > { %v5768_v39 = vpop.permute.xlu2 %5767 }
 0x199   : > { %v5770_v21 = vunpack.i.h.bf16 %v5768_v39  ;;  %v5769_v18 = vunpack.i.l.bf16 %v5768_v39  ;;  %v1780_v39 = vsel %vm1700_vm8, %v1777_v31, %v1779_v42  ;;  %v5789_v31 = vunpack.i.l.bf16 %v7435_v29 }
 0x19a   : > { %v1715_v29 = vsel %vm1700_vm8, %v1712_v14, %v1714_v45 }
 0x19b   : > { %5548 = vmatmul.msk.bf16.gmra.mxu2 %vm2418_vm10, %v7504_v56  ;;  %v2267_v10 = vsel %vm2263_vm9, %v2234_v58, %v5770_v21  ;;  %v2266_v32 = vsel %vm2263_vm9, %v2233_v60, %v5769_v18  ;;  %v5754_v60 = vunpack.i.l.bf16 %v7484_v28  ;;  %v7542_v18 = vpack.c.b16 %v2387_v43, %v2386_v46 }
 0x19c   : > { %v2298_v0 = vpack.c.bf16 %v2266_v32, %v2266_v32  ;;  %v2299_v44 = vpack.c.bf16 %v2267_v10, %v2267_v10 }
 0x19d   : > { %5555 = vmatmul.msk.bf16.gmra.mxu1 %vm2418_vm10, %v2388_v1  ;;  %v5755_v1 = vunpack.i.h.bf16 %v7484_v28  ;;  %v2261_v28 = vsel %vm145_vm0, %v1829_v16, %v5754_v60  ;;  %v5794_v60 = vunpack.i.l.bf16 %v7439_v3 }
 0x19e   : > { %v2360_v61 = vunpack.c.l.b16 %v2298_v0  ;;  %v2361_v57 = vunpack.c.l.b16 %v2299_v44  ;;  %v1711_v44 = vrot.slane %v7097_v23, 5 }
 0x19f   : > { %v2262_v32 = vsel %vm145_vm0, %v1780_v39, %v5755_v1  ;;  %v5795_v1 = vunpack.i.h.bf16 %v7439_v3 }
 0x1a0   : > { %v5833_v26 = vpop.permute.xlu0 %5832  ;;  %v7532_v59 = vpack.c.b16 %v2361_v57, %v2360_v61  ;;  %v5783_v0 = vpop.permute.xlu2 %5782  ;;  %v2295_v42 = vsel %vm2263_vm9, %v2262_v32, %v5760_v7  ;;  %v9482_v7 = vld [vmem:[#allocation23_spill] sm:$0xff] }
 0x1a1   : > { %v5835_v13 = vunpack.i.h.bf16 %v5833_v26  ;;  %v5834_v12 = vunpack.i.l.bf16 %v5833_v26  ;;  %v5838_v47 = vpop.permute.xlu1 %5837  ;;  %v2294_v26 = vsel %vm2263_vm9, %v2261_v28, %v5759_v33  ;;  %v2327_v61 = vpack.c.bf16 %v2295_v42, %v2295_v42 }
 0x1a2   : > { %v5840_v41 = vunpack.i.h.bf16 %v5838_v47  ;;  %v5839_v35 = vunpack.i.l.bf16 %v5838_v47  ;;  %5536 = vmatmul.msk.bf16.gmra.mxu0 %vm2418_vm10, %v7532_v59  ;;  %v2326_v8 = vpack.c.bf16 %v2294_v26, %v2294_v26  ;;  %v1722_v33 = vrot.slane %v9482_v7, 5 }
 0x1a3   : > { %v2246_v5 = vsel %vm145_vm0, %v1740_v49, %v5835_v13  ;;  %v2245_v25 = vsel %vm145_vm0, %v1821_v2, %v5834_v12  ;;  %v5785_v49 = vunpack.i.h.bf16 %v5783_v0  ;;  %v5784_v2 = vunpack.i.l.bf16 %v5783_v0 }
 0x1a4   : > { %v2278_v27 = vsel %vm2263_vm9, %v2245_v25, %v5839_v35  ;;  %v2279_v9 = vsel %vm2263_vm9, %v2246_v5, %v5840_v41  ;;  %v1713_v13 = vsel %vm1700_vm8, %v1711_v44, %v1712_v14  ;;  %v1716_v35 = vrot.slane %v9469_v50, 5 }
 0x1a5   : > { %v2310_v20 = vpack.c.bf16 %v2278_v27, %v2278_v27  ;;  %v2311_v58 = vpack.c.bf16 %v2279_v9, %v2279_v9  ;;  %v2236_v12 = vsel %vm145_vm0, %v1715_v29, %v5785_v49  ;;  %v1816_v47 = vsel %vm1813_vm7, 0.0, %v1713_v13 }
 0x1a6   : > { %v2235_v63 = vsel %vm145_vm0, %v1816_v47, %v5784_v2  ;;  %v2269_v23 = vsel %vm2263_vm9, %v2236_v12, %v5790_v52  ;;  %v2410_v25 = vunpack.c.l.b16 %v2326_v8  ;;  %v2411_v43 = vunpack.c.l.b16 %v2327_v61  ;;  %v9483_v52 = vld [vmem:[#allocation22_spill] sm:$0xff] }
 0x1a7   : > { %v2372_v37 = vunpack.c.l.b16 %v2310_v20  ;;  %v2373_v21 = vunpack.c.l.b16 %v2311_v58  ;;  %v2268_v57 = vsel %vm2263_vm9, %v2235_v63, %v5789_v31  ;;  %v2301_v41 = vpack.c.bf16 %v2269_v23, %v2269_v23 }
 0x1a8   : > { %v2300_v46 = vpack.c.bf16 %v2268_v57, %v2268_v57  ;;  %v1719_v9 = vrot.slane %v9471_v34, 5  ;;  %v1718_v20 = vsel %vm1700_vm8, %v1716_v35, %v1717_v38  ;;  %v7576_v50 = vpack.c.b16 %v2411_v43, %v2410_v25  ;;  %v9481_v34 = vld [vmem:[#allocation21_spill] sm:$0xff]  ;;  %v5798_v3 = vpop.permute.xlu2 %5797 }
 0x1a9   : > { %v7546_v10 = vpack.c.b16 %v2373_v21, %v2372_v37  ;;  %v2363_v5 = vunpack.c.l.b16 %v2301_v41  ;;  %v1817_v39 = vsel %vm1813_vm7, 0.0, %v1718_v20  ;;  %v1721_v21 = vrot.slane %v9481_v34, 5 }
 0x1aa   : > { %v2362_v27 = vunpack.c.l.b16 %v2300_v46  ;;  %v1720_v40 = vsel %vm1700_vm8, %v1717_v38, %v1719_v9  ;;  %v2237_v37 = vsel %vm145_vm0, %v1817_v39, %v5794_v60  ;;  %v5800_v32 = vunpack.i.h.bf16 %v5798_v3 }
 0x1ab   : > { %5562 = vmatmul.msk.bf16.vlgmr.msra.gmra.mxu3 %vm2418_vm10, %v7546_v10  ;;  %5549 = vmatmul.msk.bf16.gmra.mxu2 %vm2418_vm10, %v7542_v18  ;;  %v2238_v16 = vsel %vm145_vm0, %v1720_v40, %v5795_v1  ;;  %v5799_v28 = vunpack.i.l.bf16 %v5798_v3  ;;  %v1724_v31 = vrot.slane %v9483_v52, 5  ;;  %v1723_v0 = vsel %vm1700_vm8, %v1721_v21, %v1722_v33 }
 0x1ac   : > { %v2390_v58 = vpack.c.b16 %v2363_v5, %v2362_v27  ;;  %v2271_v14 = vsel %vm2263_vm9, %v2238_v16, %v5800_v32  ;;  %v5805_v2 = vunpack.i.h.bf16 %v7470_v30  ;;  %v5804_v26 = vunpack.i.l.bf16 %v7470_v30 }
 0x1ad   : > { %5556 = vmatmul.msk.bf16.gmra.mxu1 %vm2418_vm10, %v7532_v59  ;;  %v2270_v45 = vsel %vm2263_vm9, %v2237_v37, %v5799_v28  ;;  %v2303_v49 = vpack.c.bf16 %v2271_v14, %v2271_v14  ;;  %v1725_v12 = vsel %vm1700_vm8, %v1722_v33, %v1724_v31  ;;  %v1818_v47 = vsel %vm1813_vm7, 0.0, %v1723_v0 }
 0x1ae   : > { %v2302_v44 = vpack.c.bf16 %v2270_v45, %v2270_v45  ;;  %v5810_v8 = vunpack.i.h.bf16 %v7473_v17  ;;  %v5809_v61 = vunpack.i.l.bf16 %v7473_v17  ;;  %v2240_v23 = vsel %vm145_vm0, %v1725_v12, %v5805_v2 }
 0x1af   : > { %v2365_v13 = vunpack.c.l.b16 %v2303_v49  ;;  %v2239_v57 = vsel %vm145_vm0, %v1818_v47, %v5804_v26  ;;  %v1727_v27 = vrot.slane %v7230_v19, 5  ;;  %v1729_v9 = vrot.slane %v7226_v11, 5 }
 0x1b0   : > { %v2364_v29 = vunpack.c.l.b16 %v2302_v44  ;;  %v2272_v30 = vsel %vm2263_vm9, %v2239_v57, %v5809_v61  ;;  %v2273_v41 = vsel %vm2263_vm9, %v2240_v23, %v5810_v8  ;;  %v5820_v60 = vunpack.i.h.bf16 %v7497_v55  ;;  %v5813_v37 = vpop.permute.xlu2 %5812 }
 0x1b1   : > { %v2304_v38 = vpack.c.bf16 %v2272_v30, %v2272_v30  ;;  %v2305_v17 = vpack.c.bf16 %v2273_v41, %v2273_v41  ;;  %v5819_v40 = vunpack.i.l.bf16 %v7497_v55  ;;  %v1730_v39 = vsel %vm1700_vm8, %v1727_v27, %v1729_v9 }
 0x1b2   : > { %5537 = vmatmul.msk.bf16.gmra.mxu0 %vm2418_vm10, %v2390_v58  ;;  %v2391_v63 = vpack.c.b16 %v2365_v13, %v2364_v29  ;;  %v5814_v34 = vunpack.i.l.bf16 %v5813_v37  ;;  %v1731_v19 = vrot.slane %v7255_v62, 5  ;;  %v1732_v21 = vrot.slane %v7257_v15, 5 }
 0x1b3   : > { %v2366_v46 = vunpack.c.l.b16 %v2304_v38  ;;  %v2367_v5 = vunpack.c.l.b16 %v2305_v17  ;;  %v1734_v32 = vrot.slane %v7259_v6, 5  ;;  %v5825_v0 = vunpack.i.h.bf16 %v7502_v24 }
 0x1b4   : > { %v1733_v14 = vsel %vm1700_vm8, %v1731_v19, %v1732_v21  ;;  %v5824_v62 = vunpack.i.l.bf16 %v7502_v24 }
 0x1b5   : > { %v2392_v43 = vpack.c.b16 %v2367_v5, %v2366_v46  ;;  %v1735_v15 = vsel %vm1700_vm8, %v1732_v21, %v1734_v32  ;;  %v1820_v44 = vsel %vm1813_vm7, 0.0, %v1733_v14 }
 0x1b6   : > { %v2244_v6 = vsel %vm145_vm0, %v1735_v15, %v5825_v0  ;;  %v2243_v49 = vsel %vm145_vm0, %v1820_v44, %v5824_v62 }
 0x1b9   : > { %v7595_v42 = vpop.f32.mrf.mxu2 }
 0x1bb   : > { %5563 = vmatmul.msk.bf16.gmra.mxu3 %vm2418_vm10, %v7344_v54  ;;  %5550 = vmatmul.msk.bf16.gmra.mxu2 %vm2418_vm10, %v7576_v50 }
 0x1bd   : > { %5557 = vmatmul.msk.bf16.gmra.mxu1 %vm2418_vm10, %v2390_v58 }
 0x1c1   : > { %v7611_v35 = vpop.f32.mrf.mxu2 }
 0x1c2   : > { %5538 = vmatmul.msk.bf16.gmra.mxu0 %vm2418_vm10, %v2391_v63 }
 0x1c9   : > { %v7614_v25 = vpop.f32.mrf.mxu2 }
 0x1cb   : > { %5564 = vmatmul.msk.bf16.gmra.mxu3 %vm2418_vm10, %v7369_v22  ;;  %5576 = vmatmul.msk.bf16.vlgmr.msrb.gmra.mxu2 %vm2418_vm10, %v7532_v59  ;;  %v1726_v59 = vrot.slane %v7224_v53, 5 }
 0x1cd   : > { %5558 = vmatmul.msk.bf16.gmra.mxu1 %vm2418_vm10, %v2391_v63  ;;  %v1728_v1 = vsel %vm1700_vm8, %v1726_v59, %v1727_v27 }
 0x1ce   : > { %v1819_v16 = vsel %vm1813_vm7, 0.0, %v1728_v1 }
 0x1cf   : > { %v2241_v11 = vsel %vm145_vm0, %v1819_v16, %v5814_v34 }
 0x1d0   : > { %v2274_v7 = vsel %vm2263_vm9, %v2241_v11, %v5819_v40 }
 0x1d1   : > { %v7623_v20 = vpop.f32.mrf.mxu2  ;;  %v2306_v33 = vpack.c.bf16 %v2274_v7, %v2274_v7 }
 0x1d2   : > { %5539 = vmatmul.msk.bf16.gmra.mxu0 %vm2418_vm10, %v2392_v43 }
 0x1d3   : > { %v2368_v52 = vunpack.c.l.b16 %v2306_v33 }
 0x1d9   : > { %v7638_v28 = vpop.f32.mrf.mxu2 }
 0x1db   : > { %5565 = vmatmul.msk.bf16.gmra.mxu3 %vm2418_vm10, %v7395_v51  ;;  %5577 = vmatmul.msk.bf16.gmra.mxu2 %vm2418_vm10, %v2390_v58  ;;  %v5815_v58 = vunpack.i.h.bf16 %v5813_v37 }
 0x1dd   : > { %5559 = vmatmul.msk.bf16.gmra.mxu1 %vm2418_vm10, %v2392_v43  ;;  %v2242_v53 = vsel %vm145_vm0, %v1730_v39, %v5815_v58 }
 0x1de   : > { %v2275_v55 = vsel %vm2263_vm9, %v2242_v53, %v5820_v60 }
 0x1df   : > { %v2307_v3 = vpack.c.bf16 %v2275_v55, %v2275_v55 }
 0x1e1   : > { %v2369_v31 = vunpack.c.l.b16 %v2307_v3  ;;  %v7651_v13 = vpop.f32.mrf.mxu2 }
 0x1e3   : > { %v2393_v45 = vpack.c.b16 %v2369_v31, %v2368_v52  ;;  %v2797_v31 = vld [vmem:[%s6278_s18] sm:$0xff] }
 0x1e5   : > { %5540 = vmatmul.msk.bf16.gmra.mxu0 %vm2418_vm10, %v2393_v45 }
 0x1e7   : > { %v5828_v2 = vpop.permute.xlu2 %5827 }
 0x1e8   : > { %v5830_v26 = vunpack.i.h.bf16 %v5828_v2  ;;  %v5829_v29 = vunpack.i.l.bf16 %v5828_v2 }
 0x1e9   : > { %v7656_v57 = vpop.f32.mrf.mxu2 }
 0x1ea   : > { %v2277_v24 = vsel %vm2263_vm9, %v2244_v6, %v5830_v26  ;;  %v2276_v12 = vsel %vm2263_vm9, %v2243_v49, %v5829_v29  ;;  %v2798_v6 = vld [vmem:[%s6278_s18 + $0x8] sm:$0xff] }
 0x1eb   : > { %5566 = vmatmul.msk.bf16.gmra.mxu3 %vm2418_vm10, %v7405_v48  ;;  %5578 = vmatmul.msk.bf16.gmra.mxu2 %vm2418_vm10, %v2391_v63  ;;  %v2308_v47 = vpack.c.bf16 %v2276_v12, %v2276_v12  ;;  %v2309_v8 = vpack.c.bf16 %v2277_v24, %v2277_v24 }
 0x1ed   : > { %5560 = vmatmul.msk.bf16.gmra.mxu1 %vm2418_vm10, %v2393_v45  ;;  %v2370_v61 = vunpack.c.l.b16 %v2308_v47  ;;  %v2371_v23 = vunpack.c.l.b16 %v2309_v8  ;;  %v2799_v8 = vld [vmem:[%s6278_s18 + $0x10] sm:$0xff] }
 0x1ef   : > { %v2394_v63 = vpack.c.b16 %v2371_v23, %v2370_v61 }
 0x1f1   : > { %v7663_v30 = vpop.f32.mrf.mxu2 }
 0x1f5   : > { %5541 = vmatmul.msk.bf16.gmra.mxu0 %vm2418_vm10, %v2394_v63 }
 0x1fb   : > { %5567 = vmatmul.msk.bf16.gmra.mxu3 %vm2418_vm10, %v7462_v4  ;;  %5579 = vmatmul.msk.bf16.gmra.mxu2 %vm2418_vm10, %v2392_v43 }
 0x1fd   : > { %5561 = vmatmul.msk.bf16.gmra.mxu1 %vm2418_vm10, %v2394_v63 }
 0x205   : > { %5542 = vmatmul.msk.bf16.gmra.mxu0 %vm2418_vm10, %v7546_v10 }
 0x20a   : > { %v2579_v38 = vpop.f32.mrf.mxu1 }
 0x20b   : > { %5568 = vmatmul.msk.bf16.gmra.mxu3 %vm2418_vm10, %v7504_v56  ;;  %5580 = vmatmul.msk.bf16.gmra.mxu2 %vm2418_vm10, %v2393_v45 }
 0x20c   : > { %v2479_v17 = vpop.f32.mrf.mxu0 }
 0x20d   : > { %v2580_v32 = vadd.f32 %v2579_v38, %v2479_v17 }
 0x20e   : > { %v7670_v41 = vpop.f32.mrf.mxu2 }
 0x212   : > { %v2581_v5 = vpop.f32.mrf.mxu1 }
 0x214   : > { %v2481_v43 = vpop.f32.mrf.mxu0 }
 0x215   : > { %v2582_v15 = vadd.f32 %v2581_v5, %v2481_v43  ;;  %v2800_v43 = vld [vmem:[%s6278_s18 + $0x18] sm:$0xff] }
 0x216   : > { %v7672_v46 = vpop.f32.mrf.mxu2 }
 0x21a   : > { %v2584_v27 = vpop.f32.mrf.mxu1 }
 0x21b   : > { %5569 = vmatmul.msk.bf16.gmra.mxu3 %vm2418_vm10, %v7542_v18  ;;  %5581 = vmatmul.msk.bf16.gmra.mxu2 %vm2418_vm10, %v2394_v63 }
 0x21e   : > { %v7677_v59 = vpop.f32.mrf.mxu2 }
 0x21f   : > { %v2484_v9 = vpop.f32.mrf.mxu0 }
 0x220   : > { %v2585_v24 = vadd.f32 %v2584_v27, %v2484_v9 }
 0x222   : > { %v2586_v40 = vpop.f32.mrf.mxu1 }
 0x226   : > { %v7679_v1 = vpop.f32.mrf.mxu2 }
 0x227   : > { %v2486_v60 = vpop.f32.mrf.mxu0 }
 0x228   : > { %v2587_v17 = vadd.f32 %v2586_v40, %v2486_v60  ;;  %v7758_v60 = vld [vmem:[#allocation2 + $0x40] sm:$0xff] }
 0x22a   : > { %v2589_v58 = vpop.f32.mrf.mxu1 }
 0x22b   : > { %5582 = vmatmul.msk.bf16.gmra.mxu2 %vm2418_vm10, %v7546_v10 }
 0x22e   : > { %v7683_v39 = vpop.f32.mrf.mxu3  ;;  %v7685_v16 = vpop.f32.mrf.mxu2 }
 0x22f   : > { %v2489_v37 = vpop.f32.mrf.mxu0 }
 0x230   : > { %v2590_v40 = vadd.f32 %v2589_v58, %v2489_v37  ;;  %v2927_v37 = vld [vmem:[#allocation2 + $0x10] sm:$0xff]  ;;  %v2928_v58 = vld [vmem:[#allocation2 + $0x18] sm:$0x3] }
 0x232   : > { %v7699_v21 = vpop.f32.mrf.mxu1 }
 0x236   : > { %v7687_v34 = vpop.f32.mrf.mxu3  ;;  %v7689_v53 = vpop.f32.mrf.mxu2 }
 0x237   : > { %v7697_v10 = vpop.f32.mrf.mxu0 }
 0x23a   : > { %v7707_v3 = vpop.f32.mrf.mxu1 }
 0x23b   : > { %5583 = vmatmul.msk.bf16.gmra.mxu2 %vm2418_vm10, %v7344_v54 }
 0x23e   : > { %v7693_v11 = vpop.f32.mrf.mxu3  ;;  %v7695_v19 = vpop.f32.mrf.mxu2 }
 0x23f   : > { %v7705_v33 = vpop.f32.mrf.mxu0 }
 0x242   : > { %v7716_v0 = vpop.f32.mrf.mxu1 }
 0x246   : > { %v7701_v7 = vpop.f32.mrf.mxu3  ;;  %v7703_v55 = vpop.f32.mrf.mxu2 }
 0x247   : > { %v7714_v45 = vpop.f32.mrf.mxu0 }
 0x24a   : > { %v7726_v26 = vpop.f32.mrf.mxu1 }
 0x24b   : > { %5584 = vmatmul.msk.bf16.gmra.mxu2 %vm2418_vm10, %v7369_v22 }
 0x24e   : > { %v7711_v54 = vpop.f32.mrf.mxu3  ;;  %v2685_v52 = vpop.f32.mrf.mxu2 }
 0x24f   : > { %v2765_v14 = vadd.f32 %v2685_v52, %v2580_v32  ;;  %v7724_v2 = vpop.f32.mrf.mxu0 }
 0x251   : > { %v2829_v62 = vadd.f32 %v2797_v31, %v2765_v14  ;;  %2893 = vst.msk [vmem:[#allocation2 + $0x48] sm:$0xff] %vm145_vm0, %v2765_v14  ;;  %v2925_v31 = vld [vmem:[#allocation2] sm:$0xff] }
 0x252   : > { %v7738_v63 = vpop.f32.mrf.mxu1  ;;  %v7751_v14 = vld [vmem:[#allocation2 + $0x20] sm:$0xff] }
 0x253   : > { %2861 = vst.msk [vmem:[%s6278_s18] sm:$0xff] %vm145_vm0, %v2829_v62  ;;  %v3053_v62 = vmax.f32 %v2925_v31, %v7751_v14 }
 0x256   : > { %v7721_v44 = vpop.f32.mrf.mxu3  ;;  %v2687_v22 = vpop.f32.mrf.mxu2 }
 0x257   : > { %v2766_v49 = vadd.f32 %v2687_v22, %v2582_v15  ;;  %v7736_v23 = vpop.f32.mrf.mxu0  ;;  %v2926_v15 = vld [vmem:[#allocation2 + $0x8] sm:$0xff]  ;;  %v3181_v22 = vmax.f32 %v3053_v62, %v7758_v60 }
 0x258   : > { %v7774_v62 = vld [vmem:[#allocation2 + $0x48] sm:$0xff] }
 0x259   : > { %v2830_v29 = vadd.f32 %v2798_v6, %v2766_v49  ;;  %2894 = vst.msk [vmem:[#allocation2 + $0x50] sm:$0xff] %vm145_vm0, %v2766_v49 }
 0x25a   : > { %v7748_v32 = vpop.f32.mrf.mxu1 }
 0x25b   : > { %2862 = vst.msk [vmem:[%s6278_s18 + $0x8] sm:$0xff] %vm145_vm0, %v2830_v29  ;;  %5585 = vmatmul.msk.bf16.gmra.mxu2 %vm2418_vm10, %v7395_v51  ;;  %v2801_v29 = vld [vmem:[%s6278_s18 + $0x20] sm:$0xff] }
 0x25e   : > { %v7733_v12 = vpop.f32.mrf.mxu3  ;;  %v2690_v47 = vpop.f32.mrf.mxu2 }
 0x25f   : > { %v2767_v61 = vadd.f32 %v2690_v47, %v2585_v24  ;;  %v7764_v24 = vld [vmem:[#allocation2 + $0x28] sm:$0xff]  ;;  %v7766_v47 = vld [vmem:[#allocation2 + $0x60] sm:$0xff] }
 0x261   : > { %v2831_v38 = vadd.f32 %v2799_v8, %v2767_v61  ;;  %2895 = vst.msk [vmem:[#allocation2 + $0x68] sm:$0xff] %vm145_vm0, %v2767_v61  ;;  %v2663_v8 = vunpack.c.l.b16 %v9430_v36  ;;  %v7776_v36 = vld [vmem:[#allocation2 + $0x80] sm:$0xff] }
 0x262   : > { %v7746_v9 = vpop.f32.mrf.mxu0 }
 0x263   : > { %2863 = vst.msk [vmem:[%s6278_s18 + $0x10] sm:$0xff] %vm145_vm0, %v2831_v38 }
 0x266   : > { %v7743_v5 = vpop.f32.mrf.mxu3  ;;  %v2692_v51 = vpop.f32.mrf.mxu2 }
 0x267   : > { %v2768_v27 = vadd.f32 %v2692_v51, %v2587_v17  ;;  %v2992_v51 = vld [vmem:[#allocation2 + $0x38] sm:$0x3] }
 0x268   : > { %v3056_v31 = vmax.f32 %v2928_v58, %v2992_v51  ;;  %v7792_v58 = vld [vmem:[#allocation2 + $0x68] sm:$0xff] }
 0x269   : > { %v2832_v52 = vadd.f32 %v2800_v43, %v2768_v27  ;;  %2896 = vst.msk [vmem:[#allocation2 + $0x70] sm:$0xff] %vm145_vm0, %v2768_v27  ;;  %v3054_v43 = vmax.f32 %v2926_v15, %v7764_v24  ;;  %v3309_v27 = vmax.f32 %v3181_v22, %v7766_v47  ;;  %v7788_v15 = vadd.f32 %v7687_v34, %v7611_v35 }
 0x26a   : > { %v7769_v38 = vpop.f32.mrf.mxu0  ;;  %v2592_v22 = vadd.f32 %v7699_v21, %v7697_v10  ;;  %v7802_v35 = vadd.f32 %v7701_v7, %v7623_v20  ;;  %v7806_v34 = vadd.f32 %v7711_v54, %v7638_v28  ;;  %v2595_v10 = vadd.f32 %v7707_v3, %v7705_v33 }
 0x26b   : > { %2864 = vst.msk [vmem:[%s6278_s18 + $0x18] sm:$0xff] %vm145_vm0, %v2832_v52  ;;  %5586 = vmatmul.msk.bf16.gmra.mxu2 %vm2418_vm10, %v7405_v48  ;;  %v2606_v48 = vpop.f32.mrf.mxu1  ;;  %v2991_v52 = vld [vmem:[#allocation2 + $0x30] sm:$0xff]  ;;  %v3182_v51 = vmax.f32 %v3054_v43, %v7774_v62  ;;  %v7819_v20 = vadd.f32 %v7721_v44, %v7651_v13  ;;  %v7824_v33 = vadd.f32 %v7733_v12, %v7656_v57 }
 0x26c   : > { %v7815_v43 = vld [vmem:[#allocation2 + $0x50] sm:$0xff]  ;;  %v7828_v3 = vadd.f32 %v7726_v26, %v7724_v2  ;;  %v3058_v44 = vmax.f32 %v7764_v24, %v7774_v62  ;;  %v3057_v24 = vmax.f32 %v7751_v14, %v7758_v60  ;;  %v7873_v14 = vadd.f32 %v2606_v48, %v7769_v38 }
 0x26d   : > { %v3310_v54 = vmax.f32 %v3182_v51, %v7792_v58 }
 0x26e   : > { %v7761_v6 = vpop.f32.mrf.mxu3  ;;  %v2695_v49 = vpop.f32.mrf.mxu2 }
 0x26f   : > { %v2769_v61 = vadd.f32 %v2695_v49, %v2590_v40  ;;  %v7778_v40 = vpack.c.b16 %v2663_v8, %v2663_v8  ;;  %v3120_v49 = vld [vmem:[#allocation2 + $0x58] sm:$0x3]  ;;  %v7796_v8 = vadd.f32 %v7693_v11, %v7614_v25  ;;  %v7812_v25 = vadd.f32 %v7716_v0, %v7714_v45 }
 0x270   : > { %v7832_v45 = vadd.f32 %v7738_v63, %v7736_v23  ;;  %v3376_v0 = vld [vmem:[#allocation2 + $0x98] sm:$0x3]  ;;  %v7840_v12 = vld [vmem:[#allocation2 + $0x70] sm:$0xff]  ;;  %v7847_v23 = vadd.f32 %v7743_v5, %v7663_v30  ;;  %v7851_v63 = vadd.f32 %v7748_v32, %v7746_v9  ;;  %v7864_v5 = vmax.f32 %v3058_v44, %v7792_v58  ;;  %v7894_v44 = vld [vmem:[#allocation2 + $0xa0] sm:$0xff] }
 0x271   : > { %v2833_v17 = vadd.f32 %v2801_v29, %v2769_v61  ;;  %2897 = vst.msk [vmem:[#allocation2 + $0x88] sm:$0xff] %vm145_vm0, %v2769_v61  ;;  %v7784_v29 = vadd.f32 %v7683_v39, %v7595_v42  ;;  %v3184_v61 = vmax.f32 %v3056_v31, %v3120_v49  ;;  %v3248_v42 = vld [vmem:[#allocation2 + $0x78] sm:$0x3]  ;;  %v3437_v39 = vmax.f32 %v3309_v27, %v7776_v36 }
 0x272   : > { %9484 = vst [vmem:[#allocation12_spill] sm:$0xff] %v7778_v40  ;;  %v2509_v27 = vpop.f32.mrf.mxu0  ;;  %v3062_v9 = vmax.f32 %v7774_v62, %v7792_v58  ;;  %v7870_v32 = vadd.f32 %v7761_v6, %v7670_v41  ;;  %v3063_v62 = vmax.f32 %v7815_v43, %v7840_v12 }
 0x273   : > { %2865 = vst.msk [vmem:[%s6278_s18 + $0x20] sm:$0xff] %vm145_vm0, %v2833_v17  ;;  %v3055_v17 = vmax.f32 %v2927_v37, %v2991_v52  ;;  %v2802_v37 = vld [vmem:[%s6278_s18 + $0x28] sm:$0xff]  ;;  %v2609_v28 = vpop.f32.mrf.mxu1  ;;  %v3312_v31 = vmax.f32 %v3184_v61, %v3248_v42  ;;  %v3549_v26 = vrot.slane %v3437_v39, 1 }
 0x274   : > { %9485 = vst [vmem:[#allocation14_spill] sm:$0xff] %v7870_v32  ;;  %v7887_v38 = vadd.f32 %v2609_v28, %v2509_v27 }
 0x275   : > { %v3183_v57 = vmax.f32 %v3055_v17, %v7815_v43  ;;  %v7860_v61 = vmax.f32 %v3312_v31, %v3376_v0 }
 0x276   : > { %v2641_v11 = vpop.f32.mrf.mxu3  ;;  %v2697_v21 = vpop.f32.mrf.mxu2 }
 0x277   : > { %v2770_v7 = vadd.f32 %v2697_v21, %v2592_v22  ;;  %v3059_v22 = vmax.f32 %v2991_v52, %v7815_v43  ;;  %v3311_v52 = vmax.f32 %v3183_v57, %v7840_v12  ;;  %v7878_v17 = vadd.f32 %v2641_v11, %v7672_v46  ;;  %v2803_v21 = vld [vmem:[%s6278_s18 + $0x30] sm:$0xff] }
 0x278   : > { %v7834_v13 = vld [vmem:[#allocation2 + $0x88] sm:$0xff]  ;;  %v3888_v31 = vrot.slane %v7860_v61, 3 }
 0x279   : > { %v2834_v49 = vadd.f32 %v2802_v37, %v2770_v7  ;;  %2898 = vst.msk [vmem:[#allocation2 + $0x90] sm:$0xff] %vm145_vm0, %v2770_v7  ;;  %v7843_v2 = vmax.f32 %v3310_v54, %v7834_v13  ;;  %v7882_v42 = vmax.f32 %v3059_v22, %v7840_v12  ;;  %v7897_v43 = vmax.f32 %v3062_v9, %v7834_v13  ;;  %v2932_v22 = vld [vmem:[#allocation2 + $0x38] sm:$0x3] }
 0x27a   : > { %9486 = vst [vmem:[#allocation13_spill] sm:$0xff] %v7878_v17  ;;  %v2511_v11 = vpop.f32.mrf.mxu0  ;;  %v2996_v9 = vld [vmem:[#allocation2 + $0x58] sm:$0x3] }
 0x27b   : > { %2866 = vst.msk [vmem:[%s6278_s18 + $0x28] sm:$0xff] %vm145_vm0, %v2834_v49  ;;  %5587 = vmatmul.msk.bf16.gmra.mxu2 %vm2418_vm10, %v7462_v4  ;;  %v3550_v30 = vrot.slane %v7843_v2, 1  ;;  %v3185_v4 = vmax.f32 %v3057_v24, %v7766_v47  ;;  %v3725_v37 = vrot.slane %v7843_v2, 2  ;;  %v2611_v54 = vpop.f32.mrf.mxu1  ;;  %v3885_v28 = vrot.slane %v7843_v2, 3 }
 0x27c   : > { %v4061_v24 = vrot.slane %v7843_v2, 4  ;;  %v3060_v17 = vmax.f32 %v2932_v22, %v2996_v9 }
 0x27d   : > { %v3551_v51 = vsel %vm960_vm2, %v3549_v26, %v3550_v30  ;;  %v3313_v7 = vmax.f32 %v3185_v4, %v7776_v36  ;;  %v3124_v4 = vld [vmem:[#allocation2 + $0x78] sm:$0x3] }
 0x27e   : > { %v2644_v41 = vpop.f32.mrf.mxu3  ;;  %v2700_v6 = vpop.f32.mrf.mxu2  ;;  %v3677_v48 = vmax.f32 %v3437_v39, %v3551_v51 }
 0x27f   : > { %v2771_v46 = vadd.f32 %v2700_v6, %v2595_v10  ;;  %v4064_v10 = vrot.slane %v7860_v61, 4  ;;  %v7904_v49 = vmax.f32 %v3313_v7, %v7894_v44  ;;  %v7912_v51 = vadd.f32 %v2644_v41, %v7677_v59 }
 0x280   : > { %v7899_v27 = vld [vmem:[#allocation2 + $0x90] sm:$0xff]  ;;  %v3821_v39 = vmax.f32 %v3677_v48, %v3725_v37  ;;  %v7914_v6 = vadd.f32 %v2611_v54, %v2511_v11 }
 0x281   : > { %v2835_v57 = vadd.f32 %v2803_v21, %v2771_v46  ;;  %2899 = vst.msk [vmem:[#allocation2 + $0xa8] sm:$0xff] %vm145_vm0, %v2771_v46  ;;  %v3439_v26 = vmax.f32 %v3311_v52, %v7899_v27  ;;  %v7924_v59 = vmax.f32 %v3063_v62, %v7899_v27 }
 0x282   : > { %9487 = vst [vmem:[#allocation5_spill] sm:$0xff] %v7912_v51  ;;  %v4013_v61 = vmax.f32 %v3821_v39, %v3885_v28  ;;  %v2804_v51 = vld [vmem:[%s6278_s18 + $0x38] sm:$0xff] }
 0x283   : > { %2867 = vst.msk [vmem:[%s6278_s18 + $0x30] sm:$0xff] %vm145_vm0, %v2835_v57  ;;  %v3552_v52 = vrot.slane %v3439_v26, 1  ;;  %v3726_v48 = vrot.slane %v3439_v26, 2  ;;  %v3886_v7 = vrot.slane %v3439_v26, 3  ;;  %v4062_v46 = vrot.slane %v3439_v26, 4 }
 0x284   : > { %v7920_v0 = vmax.f32 %v4013_v61, %v4061_v24 }
 0x285   : > { %v3553_v41 = vsel %vm960_vm2, %v3550_v30, %v3552_v52  ;;  %v3679_v11 = vmax.f32 %v3439_v26, %v3552_v52  ;;  %v3727_v54 = vsel %vm1137_vm3, %v3725_v37, %v3726_v48  ;;  %v3887_v22 = vsel %vm1298_vm4, %v3885_v28, %v3886_v7  ;;  %v2514_v26 = vpop.f32.mrf.mxu0  ;;  %v2614_v52 = vpop.f32.mrf.mxu1  ;;  %v3252_v28 = vld [vmem:[#allocation2 + $0x98] sm:$0x3] }
 0x286   : > { %v2646_v57 = vpop.f32.mrf.mxu3  ;;  %v2702_v21 = vpop.f32.mrf.mxu2  ;;  %v3678_v61 = vmax.f32 %v7843_v2, %v3553_v41  ;;  %v3889_v9 = vsel %vm1298_vm4, %v3886_v7, %v3888_v31  ;;  %v4063_v62 = vsel %vm1475_vm5, %v4061_v24, %v4062_v46  ;;  %v4065_v32 = vsel %vm1475_vm5, %v4062_v46, %v4064_v10  ;;  %v5598_v2 = vld [vmem:[%s9398_s1 + $0x20] sm:$0xf]  ;;  %v5665_v31 = vld [vmem:[%s9398_s1 + $0x20] sm:$0x30]  ;;  %v5618_v10 = vld [vmem:[%s9398_s1 + $0x18] sm:$0xf] }
 0x287   : > { %v7936_v30 = vadd.f32 %v2646_v57, %v7679_v1  ;;  %v2772_v37 = vadd.f32 %v2702_v21, %v7812_v25  ;;  %v3823_v39 = vmax.f32 %v3679_v11, %v3726_v48  ;;  %v7946_v24 = vadd.f32 %v2614_v52, %v2514_v26  ;;  %v5664_v21 = vld [vmem:[%s9398_s1 + $0x18] sm:$0x30]  ;;  %v5639_v11 = vld [vmem:[%s9398_s1 + $0x28] sm:$0xf] }
 0x288   : > { %v3822_v1 = vmax.f32 %v3678_v61, %v3727_v54  ;;  %v4525_v7 = vrot.slane %v7920_v0, 6  ;;  %v5599_v25 = vor.u32 %v5665_v31, %v5598_v2  ;;  %v5619_v41 = vor.u32 %v5664_v21, %v5618_v10  ;;  %v5666_v54 = vld [vmem:[%s9398_s1 + $0x28] sm:$0x30] }
 0x289   : > { %9488 = vst [vmem:[#allocation3_spill] sm:$0xff] %v7936_v30  ;;  %v2836_v48 = vadd.f32 %v2804_v51, %v2772_v37  ;;  %v4015_v46 = vmax.f32 %v3823_v39, %v3889_v9  ;;  %v3188_v57 = vmax.f32 %v3060_v17, %v3124_v4  ;;  %v7962_v61 = vld [vmem:[#allocation2 + $0xa8] sm:$0xff]  ;;  %v5640_v2 = vor.u32 %v5666_v54, %v5639_v11  ;;  %v3380_v51 = vld [vmem:[#allocation2 + $0xb8] sm:$0x3] }
 0x28a   : > { %2900 = vst.msk [vmem:[#allocation2 + $0xb0] sm:$0xff] %vm145_vm0, %v2772_v37  ;;  %v4014_v26 = vmax.f32 %v3822_v1, %v3887_v22  ;;  %v5049_v52 = vsel %vm1137_vm3, %v5599_v25, 0  ;;  %v9489_v39 = vmax.f32 %v7864_v5, %v7834_v13  ;;  %v4413_v17 = vrot.slane %v7920_v0, 7 }
 0x28b   : > { %2868 = vst.msk [vmem:[%s6278_s18 + $0x38] sm:$0xff] %vm145_vm0, %v2836_v48  ;;  %5588 = vmatmul.msk.bf16.gmra.mxu2 %vm2418_vm10, %v7504_v56  ;;  %v7975_v37 = vmax.f32 %v4015_v46, %v4065_v32  ;;  %5058 = vmatpush.bf16.msrb.mxu3 %v5049_v52  ;;  %v5146_v4 = vsel %vm1137_vm3, %v5619_v41, 0  ;;  %v3316_v22 = vmax.f32 %v3188_v57, %v3252_v28  ;;  %v5246_v5 = vsel %vm1137_vm3, %v5640_v2, 0 }
 0x28c   : > { %v7969_v9 = vmax.f32 %v9489_v39, %v7962_v61  ;;  %v7979_v31 = vmax.f32 %v4014_v26, %v4063_v62  ;;  %5155 = vmatpush.bf16.msrb.mxu0 %v5146_v4  ;;  %5255 = vmatpush.bf16.msrb.mxu1 %v5246_v5  ;;  %v2805_v62 = vld [vmem:[%s6278_s18 + $0x40] sm:$0xff]  ;;  %v9490_v11 = vrot.slane %v7904_v49, 1 }
 0x28d   : > { %v4528_v56 = vrot.slane %v7975_v37, 6  ;;  %v4416_v32 = vrot.slane %v7975_v37, 7  ;;  %v7986_v10 = vmax.f32 %v3316_v22, %v3380_v51  ;;  %v2516_v2 = vpop.f32.mrf.mxu0  ;;  %v2616_v51 = vpop.f32.mrf.mxu1  ;;  %v9492_v22 = vmov 0  }
 0x28e   : > { %v3555_v1 = vrot.slane %v7969_v9, 1  ;;  %v3728_v25 = vrot.slane %v7969_v9, 2  ;;  %v3890_v21 = vrot.slane %v7969_v9, 3  ;;  %v2649_v48 = vpop.f32.mrf.mxu3  ;;  %v2705_v28 = vpop.f32.mrf.mxu2  ;;  %v4526_v46 = vrot.slane %v7979_v31, 6 }
 0x28f   : > { %v4414_v41 = vrot.slane %v7979_v31, 7  ;;  %v4066_v57 = vrot.slane %v7969_v9, 4  ;;  %v7997_v26 = vadd.f32 %v2649_v48, %v7685_v16  ;;  %v2773_v52 = vadd.f32 %v2705_v28, %v7828_v3  ;;  %5156 = vmatmul.bf16.vlgmr.msrb.gmra.mxu0 %v9492_v22  ;;  %v2936_v22 = vld [vmem:[#allocation2 + $0x58] sm:$0x3] }
 0x290   : > { %v3556_v54 = vsel %vm960_vm2, %v9490_v11, %v3555_v1  ;;  %v3893_v4 = vrot.slane %v7986_v10, 3  ;;  %v4527_v5 = vsel %vm1942_vm6, %v4525_v7, %v4526_v46  ;;  %v4529_v11 = vsel %vm1942_vm6, %v4526_v46, %v4528_v56 }
 0x291   : > { %9491 = vst [vmem:[#allocation4_spill] sm:$0xff] %v7997_v26  ;;  %v3680_v39 = vmax.f32 %v7904_v49, %v3556_v54  ;;  %v4415_v30 = vsel %vm1813_vm7, %v4413_v17, %v4414_v41  ;;  %v4417_v16 = vsel %vm1813_vm7, %v4414_v41, %v4416_v32  ;;  %v8007_v48 = vld [vmem:[#allocation2 + $0xb0] sm:$0xff]  ;;  %v2837_v3 = vadd.f32 %v2805_v62, %v2773_v52  ;;  %v3000_v26 = vld [vmem:[#allocation2 + $0x78] sm:$0x3] }
 0x292   : > { %2901 = vst.msk [vmem:[#allocation2 + $0xc8] sm:$0xff] %vm145_vm0, %v2773_v52  ;;  %v5841_v28 = vpack.i.bf16 %v4529_v11, %v4527_v5  ;;  %v4509_v49 = vsel %vm960_vm2, %v4417_v16, 0.0  ;;  %v8011_v54 = vadd.f32 %v2616_v51, %v2516_v2  ;;  %v9493_v56 = vmax.f32 %v7882_v42, %v7899_v27  ;;  %v3128_v52 = vld [vmem:[#allocation2 + $0x98] sm:$0x3] }
 0x293   : > { %v5846_v7 = vpack.i.bf16 %v4509_v49, %v4415_v30  ;;  %v3824_v46 = vmax.f32 %v3680_v39, %v3728_v25  ;;  %v4069_v32 = vrot.slane %v7986_v10, 4  ;;  %2869 = vst.msk [vmem:[%s6278_s18 + $0x40] sm:$0xff] %vm145_vm0, %v2837_v3  ;;  %v3061_v62 = vmax.f32 %v7758_v60, %v7766_v47 }
 0x294   : > { %v3443_v17 = vmax.f32 %v9493_v56, %v8007_v48  ;;  %5842 = vrot.lane.b32.xlu2 %v5841_v28, %s6016_s15  ;;  %v3064_v41 = vmax.f32 %v2936_v22, %v3000_v26  ;;  %v3318_v30 = vmax.f32 %v7897_v43, %v7962_v61  ;;  %v2806_v28 = vld [vmem:[%s6278_s18 + $0x48] sm:$0xff]  ;;  %v3256_v56 = vld [vmem:[#allocation2 + $0xb8] sm:$0x3] }
 0x295   : > { %5847 = vrot.lane.b32.xlu0 %v5846_v7, %s6017_s19  ;;  %v4016_v39 = vmax.f32 %v3824_v46, %v3890_v21  ;;  %v3189_v11 = vmax.f32 %v3061_v62, %v7776_v36 }
 0x296   : > { %v3557_v42 = vrot.slane %v3443_v17, 1  ;;  %v3729_v51 = vrot.slane %v3443_v17, 2  ;;  %v3891_v10 = vrot.slane %v3443_v17, 3  ;;  %v4067_v5 = vrot.slane %v3443_v17, 4  ;;  %v2651_v26 = vpop.f32.mrf.mxu3  ;;  %v2707_v3 = vpop.f32.mrf.mxu2 }
 0x297   : > { %v3192_v16 = vmax.f32 %v3064_v41, %v3128_v52  ;;  %v8035_v46 = vadd.f32 %v2651_v26, %v7689_v53  ;;  %v2774_v62 = vadd.f32 %v2707_v3, %v7832_v45  ;;  %v3384_v53 = vld [vmem:[#allocation2 + $0xd8] sm:$0x3] }
 0x298   : > { %v3558_v43 = vsel %vm960_vm2, %v3555_v1, %v3557_v42  ;;  %v3682_v49 = vmax.f32 %v3443_v17, %v3557_v42  ;;  %v3730_v22 = vsel %vm1137_vm3, %v3728_v25, %v3729_v51  ;;  %v3892_v7 = vsel %vm1298_vm4, %v3890_v21, %v3891_v10  ;;  %v8044_v25 = vld [vmem:[#allocation2 + $0xc0] sm:$0xff] }
 0x299   : > { %v3681_v41 = vmax.f32 %v7969_v9, %v3558_v43  ;;  %v3894_v52 = vsel %vm1298_vm4, %v3891_v10, %v3893_v4  ;;  %v4068_v60 = vsel %vm1475_vm5, %v4066_v57, %v4067_v5  ;;  %v4070_v1 = vsel %vm1475_vm5, %v4067_v5, %v4069_v32  ;;  %v8046_v21 = vld [vmem:[#allocation2 + $0xc8] sm:$0xff]  ;;  %2902 = vst.msk [vmem:[#allocation2 + $0xd0] sm:$0xff] %vm145_vm0, %v2774_v62 }
 0x29a   : > { %v3826_v2 = vmax.f32 %v3682_v49, %v3729_v51  ;;  %v8042_v17 = vmax.f32 %v4016_v39, %v4066_v57  ;;  %v2838_v42 = vadd.f32 %v2806_v28, %v2774_v62  ;;  %v3317_v9 = vmax.f32 %v3189_v11, %v7894_v44 }
 0x29b   : > { %v3825_v45 = vmax.f32 %v3681_v41, %v3730_v22  ;;  %v3320_v4 = vmax.f32 %v3192_v16, %v3256_v56  ;;  %v8053_v57 = vmax.f32 %v3318_v30, %v8046_v21  ;;  %5589 = vmatmul.msk.bf16.gmra.mxu2 %vm2418_vm10, %v7542_v18  ;;  %v2807_v56 = vld [vmem:[%s6278_s18 + $0x50] sm:$0xff] }
 0x29c   : > { %v4018_v51 = vmax.f32 %v3826_v2, %v3894_v52  ;;  %v4530_v10 = vrot.slane %v8042_v17, 6  ;;  %v4418_v26 = vrot.slane %v8042_v17, 7  ;;  %2870 = vst.msk [vmem:[%s6278_s18 + $0x48] sm:$0xff] %vm145_vm0, %v2838_v42  ;;  %v3445_v39 = vmax.f32 %v3317_v9, %v8044_v25  ;;  %v3004_v2 = vld [vmem:[#allocation2 + $0x98] sm:$0x3] }
 0x29d   : > { %v4017_v32 = vmax.f32 %v3825_v45, %v3892_v7  ;;  %v8060_v5 = vmax.f32 %v3320_v4, %v3384_v53  ;;  %v3560_v16 = vrot.slane %v8053_v57, 1  ;;  %v3731_v30 = vrot.slane %v8053_v57, 2 }
 0x29e   : > { %v8063_v11 = vmax.f32 %v4018_v51, %v4070_v1  ;;  %v3895_v3 = vrot.slane %v8053_v57, 3  ;;  %v3559_v43 = vrot.slane %v3445_v39, 1  ;;  %v2654_v22 = vpop.f32.mrf.mxu3  ;;  %v2710_v7 = vpop.f32.mrf.mxu2  ;;  %v3065_v1 = vmax.f32 %v7766_v47, %v7776_v36 }
 0x29f   : > { %v8068_v28 = vmax.f32 %v4017_v32, %v4068_v60  ;;  %v3898_v18 = vrot.slane %v8060_v5, 3  ;;  %v4074_v52 = vrot.slane %v8060_v5, 4  ;;  %v8079_v60 = vadd.f32 %v2654_v22, %v7695_v19 }
 0x2a0   : > { %v4533_v62 = vrot.slane %v8063_v11, 6  ;;  %v4421_v41 = vrot.slane %v8063_v11, 7  ;;  %v2775_v53 = vadd.f32 %v2710_v7, %v7851_v63  ;;  %v8084_v9 = vld [vmem:[#allocation2 + $0xd0] sm:$0xff]  ;;  %v3561_v4 = vsel %vm960_vm2, %v3559_v43, %v3560_v16 }
 0x2a1   : > { %v4531_v42 = vrot.slane %v8068_v28, 6  ;;  %v4419_v45 = vrot.slane %v8068_v28, 7  ;;  %v3193_v51 = vmax.f32 %v3065_v1, %v7894_v44  ;;  %v9494_v47 = vmax.f32 %v7792_v58, %v7834_v13  ;;  %v2940_v1 = vld [vmem:[#allocation2 + $0x78] sm:$0x3] }
 0x2a2   : > { %v9495_v19 = vmax.f32 %v7840_v12, %v7899_v27  ;;  %v2839_v5 = vadd.f32 %v2807_v56, %v2775_v53  ;;  %2903 = vst.msk [vmem:[#allocation2 + $0xe8] sm:$0xff] %vm145_vm0, %v2775_v53  ;;  %v9496_v12 = vmax.f32 %v7924_v59, %v8007_v48 }
 0x2a3   : > { %v3194_v32 = vmax.f32 %v9494_v47, %v7962_v61  ;;  %v4532_v22 = vsel %vm1942_vm6, %v4530_v10, %v4531_v42  ;;  %v4534_v43 = vsel %vm1942_vm6, %v4531_v42, %v4533_v62  ;;  %v4420_v7 = vsel %vm1813_vm7, %v4418_v26, %v4419_v45  ;;  %v3132_v62 = vld [vmem:[#allocation2 + $0xb8] sm:$0x3] }
 0x2a4   : > { %v8096_v63 = vmax.f32 %v9495_v19, %v8007_v48  ;;  %v5851_v49 = vpack.i.bf16 %v4534_v43, %v4532_v22  ;;  %v4422_v58 = vsel %vm1813_vm7, %v4419_v45, %v4421_v41  ;;  %v3447_v47 = vmax.f32 %v9496_v12, %v8084_v9  ;;  %2871 = vst.msk [vmem:[%s6278_s18 + $0x50] sm:$0xff] %vm145_vm0, %v2839_v5 }
 0x2a5   : > { %v3683_v19 = vmax.f32 %v3445_v39, %v3561_v4  ;;  %v4510_v56 = vsel %vm960_vm2, %v4422_v58, 0.0  ;;  %v3068_v10 = vmax.f32 %v2940_v1, %v3004_v2  ;;  %v3321_v26 = vmax.f32 %v3193_v51, %v8044_v25  ;;  %v2808_v1 = vld [vmem:[%s6278_s18 + $0x58] sm:$0xff] }
 0x2a6   : > { %v3322_v53 = vmax.f32 %v3194_v32, %v8046_v21  ;;  %5852 = vrot.lane.b32.xlu1 %v5851_v49, %s6016_s15  ;;  %v5856_v41 = vpack.i.bf16 %v4510_v56, %v4420_v7  ;;  %v3562_v42 = vrot.slane %v3447_v47, 1  ;;  %v3732_v45 = vrot.slane %v3447_v47, 2  ;;  %v2656_v5 = vpop.f32.mrf.mxu3  ;;  %v2712_v2 = vpop.f32.mrf.mxu2  ;;  %v3260_v58 = vld [vmem:[#allocation2 + $0xd8] sm:$0x3] }
 0x2a7   : > { %v3827_v22 = vmax.f32 %v3683_v19, %v3731_v30  ;;  %v3896_v59 = vrot.slane %v3447_v47, 3  ;;  %v4072_v43 = vrot.slane %v3447_v47, 4  ;;  %v3196_v39 = vmax.f32 %v3068_v10, %v3132_v62  ;;  %v8125_v62 = vld [vmem:[#allocation2 + $0xe0] sm:$0xff] }
 0x2a8   : > { %v3323_v4 = vmax.f32 %v8096_v63, %v8084_v9  ;;  %5857 = vrot.lane.b32.xlu2 %v5856_v41, %s6017_s19  ;;  %v3563_v51 = vsel %vm960_vm2, %v3560_v16, %v3562_v42  ;;  %v3685_v32 = vmax.f32 %v3447_v47, %v3562_v42  ;;  %v3733_v49 = vsel %vm1137_vm3, %v3731_v30, %v3732_v45 }
 0x2a9   : > { %v4019_v7 = vmax.f32 %v3827_v22, %v3895_v3  ;;  %v8120_v12 = vadd.f32 %v2656_v5, %v7703_v55  ;;  %v2776_v19 = vadd.f32 %v2712_v2, %v7873_v14  ;;  %v3684_v56 = vmax.f32 %v8053_v57, %v3563_v51  ;;  %v8132_v55 = vld [vmem:[#allocation2 + $0xe8] sm:$0xff]  ;;  %v3388_v22 = vld [vmem:[#allocation2 + $0xf8] sm:$0x3] }
 0x2aa   : > { %v3897_v10 = vsel %vm1298_vm4, %v3895_v3, %v3896_v59  ;;  %v3829_v41 = vmax.f32 %v3685_v32, %v3732_v45  ;;  %v3899_v16 = vsel %vm1298_vm4, %v3896_v59, %v3898_v18  ;;  %v9498_v47 = vrot.slane %v8053_v57, 4 }
 0x2ab   : > { %9497 = vst [vmem:[#allocation18_spill] sm:$0xff] %v8120_v12  ;;  %v4075_v42 = vsel %vm1475_vm5, %v4072_v43, %v4074_v52  ;;  %v2840_v14 = vadd.f32 %v2808_v1, %v2776_v19  ;;  %v3828_v5 = vmax.f32 %v3684_v56, %v3733_v49  ;;  %v3324_v45 = vmax.f32 %v3196_v39, %v3260_v58  ;;  %v2809_v56 = vld [vmem:[%s6278_s18 + $0x60] sm:$0xff] }
 0x2ac   : > { %v4073_v30 = vsel %vm1475_vm5, %v9498_v47, %v4072_v43  ;;  %2904 = vst.msk [vmem:[#allocation2 + $0xf0] sm:$0xff] %vm145_vm0, %v2776_v19  ;;  %v9499_v3 = vmov %v9498_v47  ;;  %v4021_v51 = vmax.f32 %v3829_v41, %v3899_v16  ;;  %v3449_v18 = vmax.f32 %v3321_v26, %v8125_v62  ;;  %5590 = vmatmul.msk.bf16.gmra.mxu2 %vm2418_vm10, %v7576_v50 }
 0x2ad   : > { %v8137_v2 = vmax.f32 %v4019_v7, %v9499_v3  ;;  %v8141_v59 = vmax.f32 %v3322_v53, %v8132_v55  ;;  %v3069_v52 = vmax.f32 %v7776_v36, %v7894_v44  ;;  %2872 = vst.msk [vmem:[%s6278_s18 + $0x58] sm:$0xff] %vm145_vm0, %v2840_v14  ;;  %v4020_v43 = vmax.f32 %v3828_v5, %v3897_v10 }
 0x2ae   : > { %v8151_v1 = vmax.f32 %v3324_v45, %v3388_v22  ;;  %v8153_v26 = vmax.f32 %v4021_v51, %v4075_v42  ;;  %v3564_v53 = vrot.slane %v3449_v18, 1  ;;  %v2715_v19 = vpop.f32.mrf.mxu2  ;;  %v3070_v3 = vmax.f32 %v7834_v13, %v7962_v61  ;;  %v3008_v13 = vld [vmem:[#allocation2 + $0xb8] sm:$0x3] }
 0x2af   : > { %v4535_v57 = vrot.slane %v8137_v2, 6  ;;  %v4423_v39 = vrot.slane %v8137_v2, 7  ;;  %v3565_v32 = vrot.slane %v8141_v59, 1  ;;  %v3734_v36 = vrot.slane %v8141_v59, 2 }
 0x2b0   : > { %v8157_v49 = vmax.f32 %v4020_v43, %v4073_v30  ;;  %v3900_v7 = vrot.slane %v8141_v59, 3  ;;  %v3903_v50 = vrot.slane %v8151_v1, 3  ;;  %v4076_v58 = vrot.slane %v8141_v59, 4 }
 0x2b1   : > { %v4538_v10 = vrot.slane %v8153_v26, 6  ;;  %v4426_v41 = vrot.slane %v8153_v26, 7  ;;  %v3566_v16 = vsel %vm960_vm2, %v3564_v53, %v3565_v32  ;;  %v4079_v47 = vrot.slane %v8151_v1, 4 }
 0x2b2   : > { %v2777_v42 = vadd.f32 %v2715_v19, %v7887_v38  ;;  %v4536_v30 = vrot.slane %v8157_v49, 6  ;;  %v4424_v22 = vrot.slane %v8157_v49, 7  ;;  %v3686_v14 = vmax.f32 %v3449_v18, %v3566_v16  ;;  %v2944_v19 = vld [vmem:[#allocation2 + $0x98] sm:$0x3] }
 0x2b3   : > { %v8170_v5 = vld [vmem:[#allocation2 + $0xf0] sm:$0xff]  ;;  %v3071_v45 = vmax.f32 %v7899_v27, %v8007_v48 }
 0x2b4   : > { %v2841_v43 = vadd.f32 %v2809_v56, %v2777_v42  ;;  %2905 = vst.msk [vmem:[#allocation2 + $0x108] sm:$0xff] %vm145_vm0, %v2777_v42  ;;  %v4537_v18 = vsel %vm1942_vm6, %v4535_v57, %v4536_v30  ;;  %v4539_v1 = vsel %vm1942_vm6, %v4536_v30, %v4538_v10  ;;  %v4425_v53 = vsel %vm1813_vm7, %v4423_v39, %v4424_v22  ;;  %v3136_v10 = vld [vmem:[#allocation2 + $0xd8] sm:$0x3] }
 0x2b5   : > { %v5861_v16 = vpack.i.bf16 %v4539_v1, %v4537_v18  ;;  %v4427_v27 = vsel %vm1813_vm7, %v4424_v22, %v4426_v41  ;;  %v3451_v51 = vmax.f32 %v3323_v4, %v8170_v5  ;;  %v3830_v38 = vmax.f32 %v3686_v14, %v3734_v36 }
 0x2b6   : > { %2873 = vst.msk [vmem:[%s6278_s18 + $0x60] sm:$0xff] %vm145_vm0, %v2841_v43  ;;  %v4511_v56 = vsel %vm960_vm2, %v4427_v27, 0.0  ;;  %v3072_v57 = vmax.f32 %v2944_v19, %v3008_v13  ;;  %v3197_v39 = vmax.f32 %v3069_v52, %v8044_v25  ;;  %v3198_v42 = vmax.f32 %v3070_v3, %v8046_v21  ;;  %v2717_v1 = vpop.f32.mrf.mxu2  ;;  %v2810_v19 = vld [vmem:[%s6278_s18 + $0x68] sm:$0xff] }
 0x2b7   : > { %5862 = vrot.lane.b32.xlu0 %v5861_v16, %s6016_s15  ;;  %v5866_v41 = vpack.i.bf16 %v4511_v56, %v4425_v53  ;;  %v3567_v30 = vrot.slane %v3451_v51, 1  ;;  %v3735_v22 = vrot.slane %v3451_v51, 2  ;;  %v3901_v18 = vrot.slane %v3451_v51, 3  ;;  %v3264_v56 = vld [vmem:[#allocation2 + $0xf8] sm:$0x3] }
 0x2b8   : > { %v4022_v63 = vmax.f32 %v3830_v38, %v3900_v7  ;;  %v4077_v4 = vrot.slane %v3451_v51, 4  ;;  %v8196_v14 = vmax.f32 %v3071_v45, %v8084_v9  ;;  %v3200_v43 = vmax.f32 %v3072_v57, %v3136_v10 }
 0x2b9   : > { %5867 = vrot.lane.b32.xlu1 %v5866_v41, %s6017_s19  ;;  %v3568_v52 = vsel %vm960_vm2, %v3565_v32, %v3567_v30  ;;  %v3688_v13 = vmax.f32 %v3451_v51, %v3567_v30  ;;  %v3736_v3 = vsel %vm1137_vm3, %v3734_v36, %v3735_v22  ;;  %v3902_v53 = vsel %vm1298_vm4, %v3900_v7, %v3901_v18  ;;  %v8211_v36 = vld [vmem:[#allocation2 + $0x100] sm:$0xff]  ;;  %v3392_v30 = vld [vmem:[#allocation2 + $0x118] sm:$0x3] }
 0x2ba   : > { %v2778_v16 = vadd.f32 %v2717_v1, %v7914_v6  ;;  %v3687_v38 = vmax.f32 %v8141_v59, %v3568_v52  ;;  %v3904_v27 = vsel %vm1298_vm4, %v3901_v18, %v3903_v50  ;;  %v4078_v45 = vsel %vm1475_vm5, %v4076_v58, %v4077_v4 }
 0x2bb   : > { %v3832_v57 = vmax.f32 %v3688_v13, %v3735_v22  ;;  %v4080_v10 = vsel %vm1475_vm5, %v4077_v4, %v4079_v47  ;;  %v8208_v41 = vmax.f32 %v4022_v63, %v4076_v58  ;;  %v3325_v32 = vmax.f32 %v3197_v39, %v8125_v62  ;;  %v8213_v7 = vld [vmem:[#allocation2 + $0x108] sm:$0xff] }
 0x2bc   : > { %v2842_v6 = vadd.f32 %v2810_v19, %v2778_v16  ;;  %2906 = vst.msk [vmem:[#allocation2 + $0x110] sm:$0xff] %vm145_vm0, %v2778_v16  ;;  %v3831_v59 = vmax.f32 %v3687_v38, %v3736_v3  ;;  %v3326_v50 = vmax.f32 %v3198_v42, %v8132_v55  ;;  %v3327_v51 = vmax.f32 %v8196_v14, %v8170_v5 }
 0x2bd   : > { %v4024_v22 = vmax.f32 %v3832_v57, %v3904_v27  ;;  %v4540_v58 = vrot.slane %v8208_v41, 6  ;;  %v4428_v47 = vrot.slane %v8208_v41, 7  ;;  %v3328_v39 = vmax.f32 %v3200_v43, %v3264_v56  ;;  %5591 = vmatmul.msk.bf16.gmra.mxu2 %vm2418_vm10, %v7778_v40  ;;  %v2811_v56 = vld [vmem:[%s6278_s18 + $0x70] sm:$0xff]  ;;  %v2812_v40 = vld [vmem:[%s6278_s18 + $0x78] sm:$0xff] }
 0x2be   : > { %2874 = vst.msk [vmem:[%s6278_s18 + $0x68] sm:$0xff] %vm145_vm0, %v2842_v6  ;;  %v4023_v18 = vmax.f32 %v3831_v59, %v3902_v53  ;;  %v3453_v63 = vmax.f32 %v3325_v32, %v8211_v36  ;;  %v8227_v42 = vmax.f32 %v3326_v50, %v8213_v7  ;;  %v9500_v43 = vmax.f32 %v7962_v61, %v8046_v21  ;;  %v2720_v27 = vpop.f32.mrf.mxu2 }
 0x2bf   : > { %v8230_v14 = vmax.f32 %v4024_v22, %v4080_v10  ;;  %v8232_v1 = vmax.f32 %v3328_v39, %v3392_v30  ;;  %v9501_v52 = vmax.f32 %v8007_v48, %v8084_v9  ;;  %v2779_v48 = vadd.f32 %v2720_v27, %v7946_v24 }
 0x2c0   : > { %v8238_v19 = vmax.f32 %v9500_v43, %v8132_v55  ;;  %v8246_v3 = vmax.f32 %v4023_v18, %v4078_v45  ;;  %v3569_v53 = vrot.slane %v3453_v63, 1  ;;  %v3570_v16 = vrot.slane %v8227_v42, 1 }
 0x2c1   : > { %v8244_v13 = vmax.f32 %v9501_v52, %v8170_v5  ;;  %v3737_v38 = vrot.slane %v8227_v42, 2  ;;  %v4543_v57 = vrot.slane %v8230_v14, 6  ;;  %v4431_v61 = vrot.slane %v8230_v14, 7  ;;  %2907 = vst.msk [vmem:[#allocation2 + $0x128] sm:$0xff] %vm145_vm0, %v2779_v48 }
 0x2c2   : > { %v3905_v10 = vrot.slane %v8227_v42, 3  ;;  %v3908_v32 = vrot.slane %v8232_v1, 3  ;;  %v4541_v45 = vrot.slane %v8246_v3, 6  ;;  %v4429_v6 = vrot.slane %v8246_v3, 7 }
 0x2c3   : > { %v3571_v59 = vsel %vm960_vm2, %v3569_v53, %v3570_v16  ;;  %v8259_v50 = vld [vmem:[#allocation2 + $0x110] sm:$0xff]  ;;  %v4081_v22 = vrot.slane %v8227_v42, 4  ;;  %v4084_v39 = vrot.slane %v8232_v1, 4  ;;  %v3330_v18 = vmax.f32 %v8238_v19, %v8213_v7  ;;  %v2948_v19 = vld [vmem:[#allocation2 + $0xb8] sm:$0x3] }
 0x2c4   : > { %v3689_v30 = vmax.f32 %v3453_v63, %v3571_v59  ;;  %v2843_v43 = vadd.f32 %v2811_v56, %v2779_v48  ;;  %v4542_v24 = vsel %vm1942_vm6, %v4540_v58, %v4541_v45  ;;  %v4544_v52 = vsel %vm1942_vm6, %v4541_v45, %v4543_v57  ;;  %v3012_v56 = vld [vmem:[#allocation2 + $0xd8] sm:$0x3] }
 0x2c5   : > { %v4430_v27 = vsel %vm1813_vm7, %v4428_v47, %v4429_v6  ;;  %v5871_v53 = vpack.i.bf16 %v4544_v52, %v4542_v24  ;;  %v4432_v4 = vsel %vm1813_vm7, %v4429_v6, %v4431_v61  ;;  %v3455_v63 = vmax.f32 %v3327_v51, %v8259_v50  ;;  %v3140_v52 = vld [vmem:[#allocation2 + $0xf8] sm:$0x3] }
 0x2c6   : > { %v3833_v59 = vmax.f32 %v3689_v30, %v3737_v38  ;;  %2875 = vst.msk [vmem:[%s6278_s18 + $0x70] sm:$0xff] %vm145_vm0, %v2843_v43  ;;  %v4512_v1 = vsel %vm960_vm2, %v4432_v4, 0.0  ;;  %v3073_v58 = vmax.f32 %v7894_v44, %v8044_v25  ;;  %v9502_v47 = vrot.slane %v7979_v31, 5  ;;  %v2722_v57 = vpop.f32.mrf.mxu2 }
 0x2c7   : > { %v9503_v61 = vrot.slane %v7920_v0, 5  ;;  %5872 = vrot.lane.b32.xlu2 %v5871_v53, %s6016_s15  ;;  %v5876_v48 = vpack.i.bf16 %v4512_v1, %v4430_v27  ;;  %v3572_v45 = vrot.slane %v3455_v63, 1  ;;  %v3738_v4 = vrot.slane %v3455_v63, 2 }
 0x2c8   : > { %v3906_v6 = vrot.slane %v3455_v63, 3  ;;  %v4025_v30 = vmax.f32 %v3833_v59, %v3905_v10  ;;  %v4082_v43 = vrot.slane %v3455_v63, 4  ;;  %v3076_v24 = vmax.f32 %v2948_v19, %v3012_v56  ;;  %v3268_v56 = vld [vmem:[#allocation2 + $0x118] sm:$0x3] }
 0x2c9   : > { %v4287_v51 = vsel %vm1700_vm8, %v9503_v61, %v9502_v47  ;;  %v3201_v44 = vmax.f32 %v3073_v58, %v8125_v62  ;;  %5877 = vrot.lane.b32.xlu0 %v5876_v48, %s6017_s19  ;;  %v3573_v0 = vsel %vm960_vm2, %v3570_v16, %v3572_v45  ;;  %v3691_v12 = vmax.f32 %v3455_v63, %v3572_v45  ;;  %v8297_v63 = vld [vmem:[#allocation2 + $0x120] sm:$0xff] }
 0x2ca   : > { %v3739_v47 = vsel %vm1137_vm3, %v3737_v38, %v3738_v4  ;;  %v3907_v27 = vsel %vm1298_vm4, %v3905_v10, %v3906_v6  ;;  %v2780_v53 = vadd.f32 %v2722_v57, %v8011_v54  ;;  %v3690_v59 = vmax.f32 %v8227_v42, %v3573_v0  ;;  %v8299_v38 = vld [vmem:[#allocation2 + $0x128] sm:$0xff] }
 0x2cb   : > { %v3909_v1 = vsel %vm1298_vm4, %v3906_v6, %v3908_v32  ;;  %v4083_v19 = vsel %vm1475_vm5, %v4081_v22, %v4082_v43  ;;  %v3835_v58 = vmax.f32 %v3691_v12, %v3738_v4  ;;  %v4085_v61 = vsel %vm1475_vm5, %v4082_v43, %v4084_v39  ;;  %v3396_v32 = vld [vmem:[#allocation2 + $0x138] sm:$0x3] }
 0x2cc   : > { %v8295_v48 = vmax.f32 %v4025_v30, %v4081_v22  ;;  %v3204_v16 = vmax.f32 %v3076_v24, %v3140_v52  ;;  %v2844_v10 = vadd.f32 %v2812_v40, %v2780_v53  ;;  %2908 = vst.msk [vmem:[#allocation2 + $0x130] sm:$0xff] %vm145_vm0, %v2780_v53  ;;  %v3834_v54 = vmax.f32 %v3690_v59, %v3739_v47 }
 0x2cd   : > { %v3329_v42 = vmax.f32 %v3201_v44, %v8211_v36  ;;  %v8304_v57 = vmax.f32 %v3330_v18, %v8299_v38  ;;  %v4027_v12 = vmax.f32 %v3835_v58, %v3909_v1  ;;  %v9504_v47 = vrot.slane %v7975_v37, 5 }
 0x2ce   : > { %v4545_v39 = vrot.slane %v8295_v48, 6  ;;  %v4433_v22 = vrot.slane %v8295_v48, 7  ;;  %v3332_v45 = vmax.f32 %v3204_v16, %v3268_v56  ;;  %2876 = vst.msk [vmem:[%s6278_s18 + $0x78] sm:$0xff] %vm145_vm0, %v2844_v10  ;;  %v4026_v4 = vmax.f32 %v3834_v54, %v3907_v27  ;;  %v2725_v1 = vpop.f32.mrf.mxu2  ;;  %v2813_v56 = vld [vmem:[%s6278_s18 + $0x80] sm:$0xff] }
 0x2cf   : > { %v3457_v40 = vmax.f32 %v3329_v42, %v8297_v63  ;;  %v3575_v6 = vrot.slane %v8304_v57, 1  ;;  %v3740_v30 = vrot.slane %v8304_v57, 2  ;;  %v8313_v43 = vmax.f32 %v4027_v12, %v4085_v61 }
 0x2d0   : > { %v3460_v18 = vmax.f32 %v3332_v45, %v3396_v32  ;;  %v3910_v24 = vrot.slane %v8304_v57, 3  ;;  %v4086_v52 = vrot.slane %v8304_v57, 4  ;;  %v8317_v44 = vmax.f32 %v4026_v4, %v4083_v19 }
 0x2d1   : > { %v3574_v0 = vrot.slane %v3457_v40, 1  ;;  %v9505_v27 = vrot.slane %v7979_v31, 5  ;;  %v8327_v59 = vsel %vm1813_vm7, 0.0, %v4287_v51  ;;  %v4548_v58 = vrot.slane %v8313_v43, 6 }
 0x2d2   : > { %v4436_v61 = vrot.slane %v8313_v43, 7  ;;  %v3913_v16 = vrot.slane %v3460_v18, 3  ;;  %v4089_v19 = vrot.slane %v3460_v18, 4  ;;  %v2781_v10 = vadd.f32 %v2725_v1, %v7784_v29 }
 0x2d3   : > { %v8324_v53 = vsel %vm1700_vm8, %v9505_v27, %v9504_v47  ;;  %v4546_v37 = vrot.slane %v8317_v44, 6  ;;  %v4434_v31 = vrot.slane %v8317_v44, 7  ;;  %v3576_v54 = vsel %vm960_vm2, %v3574_v0, %v3575_v6  ;;  %v8336_v42 = vld [vmem:[#allocation2 + $0x130] sm:$0xff] }
 0x2d4   : > { %v3692_v51 = vmax.f32 %v3457_v40, %v3576_v54  ;;  %v3078_v32 = vmax.f32 %v8046_v21, %v8132_v55  ;;  %v3079_v12 = vmax.f32 %v8084_v9, %v8170_v5  ;;  %v2845_v4 = vadd.f32 %v2813_v56, %v2781_v10  ;;  %2909 = vst.msk [vmem:[#allocation2 + $0x148] sm:$0xff] %vm145_vm0, %v2781_v10  ;;  %v2952_v56 = vld [vmem:[#allocation2 + $0xd8] sm:$0x3] }
 0x2d5   : > { %v4547_v29 = vsel %vm1942_vm6, %v4545_v39, %v4546_v37  ;;  %v4549_v18 = vsel %vm1942_vm6, %v4546_v37, %v4548_v58  ;;  %v4435_v0 = vsel %vm1813_vm7, %v4433_v22, %v4434_v31  ;;  %v4437_v40 = vsel %vm1813_vm7, %v4434_v31, %v4436_v61  ;;  %v3016_v10 = vld [vmem:[#allocation2 + $0xf8] sm:$0x3] }
 0x2d6   : > { %v5881_v47 = vpack.i.bf16 %v4549_v18, %v4547_v29  ;;  %v9506_v21 = vmax.f32 %v8244_v13, %v8259_v50  ;;  %v3836_v9 = vmax.f32 %v3692_v51, %v3740_v30  ;;  %2877 = vst.msk [vmem:[%s6278_s18 + $0x80] sm:$0xff] %vm145_vm0, %v2845_v4  ;;  %v4513_v1 = vsel %vm960_vm2, %v4437_v40, 0.0  ;;  %v3144_v29 = vld [vmem:[#allocation2 + $0x118] sm:$0x3]  ;;  %v2814_v40 = vld [vmem:[%s6278_s18 + $0x88] sm:$0xff] }
 0x2d7   : > { %v3077_v39 = vmax.f32 %v8044_v25, %v8125_v62  ;;  %v3206_v22 = vmax.f32 %v3078_v32, %v8213_v7  ;;  %v8359_v58 = vmax.f32 %v3079_v12, %v8259_v50  ;;  %v5886_v13 = vpack.i.bf16 %v4513_v1, %v4435_v0  ;;  %v2727_v25 = vpop.f32.mrf.mxu2 }
 0x2d8   : > { %v3459_v27 = vmax.f32 %v9506_v21, %v8336_v42  ;;  %5882 = vrot.lane.b32.xlu1 %v5881_v47, %s6016_s15  ;;  %v4028_v54 = vmax.f32 %v3836_v9, %v3910_v24  ;;  %v3080_v4 = vmax.f32 %v2952_v56, %v3016_v10  ;;  %v2782_v47 = vadd.f32 %v2727_v25, %v7788_v15 }
 0x2d9   : > { %v3205_v18 = vmax.f32 %v3077_v39, %v8211_v36  ;;  %5887 = vrot.lane.b32.xlu2 %v5886_v13, %s6017_s19  ;;  %v3082_v25 = vmax.f32 %v8132_v55, %v8213_v7 }
 0x2da   : > { %v3577_v61 = vrot.slane %v3459_v27, 1  ;;  %v3741_v37 = vrot.slane %v3459_v27, 2  ;;  %v3911_v31 = vrot.slane %v3459_v27, 3  ;;  %v4087_v51 = vrot.slane %v3459_v27, 4  ;;  %2910 = vst.msk [vmem:[#allocation2 + $0x150] sm:$0xff] %vm145_vm0, %v2782_v47 }
 0x2db   : > { %v8373_v13 = vmax.f32 %v4028_v54, %v4086_v52  ;;  %v3400_v54 = vld [vmem:[#allocation2 + $0x158] sm:$0x3] }
 0x2dc   : > { %v3578_v32 = vsel %vm960_vm2, %v3575_v6, %v3577_v61  ;;  %v3694_v12 = vmax.f32 %v3459_v27, %v3577_v61  ;;  %v3742_v21 = vsel %vm1137_vm3, %v3740_v30, %v3741_v37  ;;  %v3912_v0 = vsel %vm1298_vm4, %v3910_v24, %v3911_v31  ;;  %v3272_v27 = vld [vmem:[#allocation2 + $0x138] sm:$0x3]  ;;  %v8375_v61 = vld [vmem:[#allocation2 + $0x140] sm:$0xff]  ;;  %v8377_v30 = vld [vmem:[#allocation2 + $0x148] sm:$0xff] }
 0x2dd   : > { %v3693_v9 = vmax.f32 %v8304_v57, %v3578_v32  ;;  %v3914_v1 = vsel %vm1298_vm4, %v3911_v31, %v3913_v16  ;;  %v4088_v56 = vsel %vm1475_vm5, %v4086_v52, %v4087_v51  ;;  %v4090_v39 = vsel %vm1475_vm5, %v4087_v51, %v4089_v19 }
 0x2de   : > { %v3838_v10 = vmax.f32 %v3694_v12, %v3741_v37  ;;  %v3208_v6 = vmax.f32 %v3080_v4, %v3144_v29  ;;  %v2846_v24 = vadd.f32 %v2814_v40, %v2782_v47  ;;  %v3333_v57 = vmax.f32 %v3205_v18, %v8297_v63 }
 0x2df   : > { %v3837_v15 = vmax.f32 %v3693_v9, %v3742_v21  ;;  %v3334_v16 = vmax.f32 %v3206_v22, %v8299_v38  ;;  %v4550_v19 = vrot.slane %v8373_v13, 6  ;;  %v4438_v52 = vrot.slane %v8373_v13, 7  ;;  %v2730_v47 = vpop.f32.mrf.mxu2  ;;  %v2815_v9 = vld [vmem:[%s6278_s18 + $0x90] sm:$0xff] }
 0x2e0   : > { %v4030_v37 = vmax.f32 %v3838_v10, %v3914_v1  ;;  %v3335_v31 = vmax.f32 %v8359_v58, %v8336_v42  ;;  %2878 = vst.msk [vmem:[%s6278_s18 + $0x88] sm:$0xff] %vm145_vm0, %v2846_v24  ;;  %v3336_v4 = vmax.f32 %v3208_v6, %v3272_v27  ;;  %v3461_v29 = vmax.f32 %v3333_v57, %v8375_v61 }
 0x2e1   : > { %v4029_v51 = vmax.f32 %v3837_v15, %v3912_v0  ;;  %v8390_v18 = vmax.f32 %v3334_v16, %v8377_v30  ;;  %v2783_v6 = vadd.f32 %v2730_v47, %v7796_v8  ;;  %v8410_v15 = vld [vmem:[#allocation2 + $0x150] sm:$0xff] }
 0x2e2   : > { %v8392_v22 = vmax.f32 %v4030_v37, %v4090_v39  ;;  %v3464_v12 = vmax.f32 %v3336_v4, %v3400_v54  ;;  %v3579_v21 = vrot.slane %v3461_v29, 1 }
 0x2e3   : > { %v8398_v32 = vmax.f32 %v4029_v51, %v4088_v56  ;;  %v3580_v0 = vrot.slane %v8390_v18, 1  ;;  %v3743_v39 = vrot.slane %v8390_v18, 2  ;;  %v3915_v55 = vrot.slane %v8390_v18, 3  ;;  %2911 = vst.msk [vmem:[#allocation2 + $0x168] sm:$0xff] %vm145_vm0, %v2783_v6 }
 0x2e4   : > { %v4553_v1 = vrot.slane %v8392_v22, 6  ;;  %v4441_v10 = vrot.slane %v8392_v22, 7  ;;  %v3918_v16 = vrot.slane %v3464_v12, 3  ;;  %v4091_v37 = vrot.slane %v8390_v18, 4 }
 0x2e5   : > { %v4551_v27 = vrot.slane %v8398_v32, 6  ;;  %v4439_v56 = vrot.slane %v8398_v32, 7  ;;  %v3581_v24 = vsel %vm960_vm2, %v3579_v21, %v3580_v0  ;;  %v4094_v54 = vrot.slane %v3464_v12, 4  ;;  %v2956_v12 = vld [vmem:[#allocation2 + $0xf8] sm:$0x3] }
 0x2e6   : > { %v3695_v57 = vmax.f32 %v3461_v29, %v3581_v24  ;;  %v2847_v51 = vadd.f32 %v2815_v9, %v2783_v6  ;;  %v3463_v21 = vmax.f32 %v3335_v31, %v8410_v15  ;;  %v3020_v9 = vld [vmem:[#allocation2 + $0x118] sm:$0x3] }
 0x2e7   : > { %v4552_v4 = vsel %vm1942_vm6, %v4550_v19, %v4551_v27  ;;  %v4554_v8 = vsel %vm1942_vm6, %v4551_v27, %v4553_v1  ;;  %v4440_v47 = vsel %vm1813_vm7, %v4438_v52, %v4439_v56  ;;  %v4442_v45 = vsel %vm1813_vm7, %v4439_v56, %v4441_v10 }
 0x2e8   : > { %v5891_v40 = vpack.i.bf16 %v4554_v8, %v4552_v4  ;;  %v3839_v58 = vmax.f32 %v3695_v57, %v3743_v39  ;;  %2879 = vst.msk [vmem:[%s6278_s18 + $0x90] sm:$0xff] %vm145_vm0, %v2847_v51  ;;  %v4514_v29 = vsel %vm960_vm2, %v4442_v45, 0.0  ;;  %v3081_v19 = vmax.f32 %v8125_v62, %v8211_v36  ;;  %v2732_v51 = vpop.f32.mrf.mxu2  ;;  %v2816_v62 = vld [vmem:[%s6278_s18 + $0x98] sm:$0xff] }
 0x2e9   : > { %v3083_v1 = vmax.f32 %v8170_v5, %v8259_v50  ;;  %v3210_v52 = vmax.f32 %v3082_v25, %v8299_v38  ;;  %v5896_v10 = vpack.i.bf16 %v4514_v29, %v4440_v47  ;;  %v3582_v31 = vrot.slane %v3463_v21, 1  ;;  %v3148_v8 = vld [vmem:[#allocation2 + $0x138] sm:$0x3] }
 0x2ea   : > { %5892 = vrot.lane.b32.xlu0 %v5891_v40, %s6016_s15  ;;  %v3744_v6 = vrot.slane %v3463_v21, 2  ;;  %v3916_v27 = vrot.slane %v3463_v21, 3  ;;  %v4031_v56 = vmax.f32 %v3839_v58, %v3915_v55  ;;  %v4092_v24 = vrot.slane %v3463_v21, 4 }
 0x2eb   : > { %v3084_v45 = vmax.f32 %v2956_v12, %v3020_v9  ;;  %v3209_v57 = vmax.f32 %v3081_v19, %v8297_v63  ;;  %5897 = vrot.lane.b32.xlu1 %v5896_v10, %s6017_s19  ;;  %v3583_v4 = vsel %vm960_vm2, %v3580_v0, %v3582_v31  ;;  %v3697_v5 = vmax.f32 %v3463_v21, %v3582_v31  ;;  %v8442_v21 = vld [vmem:[#allocation2 + $0x160] sm:$0xff]  ;;  %v8446_v31 = vld [vmem:[#allocation2 + $0x168] sm:$0xff] }
 0x2ec   : > { %v3745_v25 = vsel %vm1137_vm3, %v3743_v39, %v3744_v6  ;;  %v3917_v40 = vsel %vm1298_vm4, %v3915_v55, %v3916_v27  ;;  %v2784_v47 = vadd.f32 %v2732_v51, %v7802_v35  ;;  %v3696_v58 = vmax.f32 %v8390_v18, %v3583_v4  ;;  %v3276_v39 = vld [vmem:[#allocation2 + $0x158] sm:$0x3] }
 0x2ed   : > { %v3919_v29 = vsel %vm1298_vm4, %v3916_v27, %v3918_v16  ;;  %v4093_v12 = vsel %vm1475_vm5, %v4091_v37, %v4092_v24  ;;  %v3841_v9 = vmax.f32 %v3697_v5, %v3744_v6  ;;  %v4095_v19 = vsel %vm1475_vm5, %v4092_v24, %v4094_v54 }
 0x2ee   : > { %v8439_v10 = vmax.f32 %v4031_v56, %v4091_v37  ;;  %v3211_v0 = vmax.f32 %v3083_v1, %v8336_v42  ;;  %v2848_v55 = vadd.f32 %v2816_v62, %v2784_v47  ;;  %2912 = vst.msk [vmem:[#allocation2 + $0x170] sm:$0xff] %vm145_vm0, %v2784_v47  ;;  %v3840_v35 = vmax.f32 %v3696_v58, %v3745_v25  ;;  %v3404_v1 = vld [vmem:[#allocation2 + $0x178] sm:$0x3] }
 0x2ef   : > { %v3212_v18 = vmax.f32 %v3084_v45, %v3148_v8  ;;  %v3337_v16 = vmax.f32 %v3209_v57, %v8375_v61  ;;  %v4033_v6 = vmax.f32 %v3841_v9, %v3919_v29  ;;  %v3338_v27 = vmax.f32 %v3210_v52, %v8377_v30 }
 0x2f0   : > { %v4555_v54 = vrot.slane %v8439_v10, 6  ;;  %v4443_v37 = vrot.slane %v8439_v10, 7  ;;  %2880 = vst.msk [vmem:[%s6278_s18 + $0x98] sm:$0xff] %vm145_vm0, %v2848_v55  ;;  %v4032_v56 = vmax.f32 %v3840_v35, %v3917_v40  ;;  %v3339_v24 = vmax.f32 %v3211_v0, %v8410_v15  ;;  %v5843_v40 = vpop.permute.xlu2 %5842  ;;  %v2735_v55 = vpop.f32.mrf.mxu2  ;;  %v2817_v35 = vld [vmem:[%s6278_s18 + $0xa0] sm:$0xff] }
 0x2f1   : > { %v3340_v51 = vmax.f32 %v3212_v18, %v3276_v39  ;;  %v3465_v45 = vmax.f32 %v3337_v16, %v8442_v21  ;;  %v8455_v57 = vmax.f32 %v4033_v6, %v4095_v19  ;;  %v8458_v62 = vmax.f32 %v3338_v27, %v8446_v31 }
 0x2f2   : > { %v9507_v52 = vrot.slane %v8068_v28, 5  ;;  %v9508_v5 = vrot.slane %v8042_v17, 5  ;;  %v8469_v8 = vmax.f32 %v4032_v56, %v4093_v12  ;;  %v9509_v29 = vrot.slane %v8063_v11, 5 }
 0x2f3   : > { %v3468_v47 = vmax.f32 %v3340_v51, %v3404_v1  ;;  %v3584_v58 = vrot.slane %v3465_v45, 1  ;;  %v5845_v0 = vunpack.i.h.bf16 %v5843_v40  ;;  %v5844_v39 = vunpack.i.l.bf16 %v5843_v40 }
 0x2f4   : > { %v8467_v25 = vsel %vm1700_vm8, %v9508_v5, %v9507_v52  ;;  %v9510_v9 = vmov %v9507_v52  ;;  %v4558_v17 = vrot.slane %v8455_v57, 6  ;;  %v4446_v18 = vrot.slane %v8455_v57, 7 }
 0x2f5   : > { %v8476_v19 = vsel %vm1700_vm8, %v9510_v9, %v9509_v29  ;;  %v2785_v12 = vadd.f32 %v2735_v55, %v7806_v34  ;;  %v4556_v16 = vrot.slane %v8469_v8, 6  ;;  %v4444_v6 = vrot.slane %v8469_v8, 7  ;;  %v8493_v1 = vld [vmem:[#allocation2 + $0x170] sm:$0xff] }
 0x2f6   : > { %v3585_v11 = vrot.slane %v8458_v62, 1  ;;  %v8487_v28 = vsel %vm145_vm0, %v8327_v59, %v5844_v39  ;;  %v8491_v27 = vsel %vm145_vm0, %v8324_v53, %v5845_v0  ;;  %v3746_v56 = vrot.slane %v8458_v62, 2 }
 0x2f7   : > { %v3920_v34 = vrot.slane %v8458_v62, 3  ;;  %v2849_v51 = vadd.f32 %v2817_v35, %v2785_v12  ;;  %2913 = vst.msk [vmem:[#allocation2 + $0x188] sm:$0xff] %vm145_vm0, %v2785_v12  ;;  %v4557_v52 = vsel %vm1942_vm6, %v4555_v54, %v4556_v16  ;;  %v4559_v5 = vsel %vm1942_vm6, %v4556_v16, %v4558_v17 }
 0x2f8   : > { %v4445_v59 = vsel %vm1813_vm7, %v4443_v37, %v4444_v6  ;;  %v5901_v40 = vpack.i.bf16 %v4559_v5, %v4557_v52  ;;  %v4447_v29 = vsel %vm1813_vm7, %v4444_v6, %v4446_v18  ;;  %v3467_v53 = vmax.f32 %v3339_v24, %v8493_v1  ;;  %v2737_v6 = vpop.f32.mrf.mxu2 }
 0x2f9   : > { %v3586_v9 = vsel %vm960_vm2, %v3584_v58, %v3585_v11  ;;  %2881 = vst.msk [vmem:[%s6278_s18 + $0xa0] sm:$0xff] %vm145_vm0, %v2849_v51  ;;  %v4515_v0 = vsel %vm960_vm2, %v4447_v29, 0.0  ;;  %v3923_v55 = vrot.slane %v3468_v47, 3  ;;  %v4096_v54 = vrot.slane %v8458_v62, 4  ;;  %v2818_v51 = vld [vmem:[%s6278_s18 + $0xa8] sm:$0xff] }
 0x2fa   : > { %v3698_v39 = vmax.f32 %v3465_v45, %v3586_v9  ;;  %5902 = vrot.lane.b32.xlu2 %v5901_v40, %s6016_s15  ;;  %v5906_v35 = vpack.i.bf16 %v4515_v0, %v4445_v59  ;;  %v3587_v37 = vrot.slane %v3467_v53, 1  ;;  %v3747_v17 = vrot.slane %v3467_v53, 2  ;;  %v2960_v40 = vld [vmem:[#allocation2 + $0x118] sm:$0x3] }
 0x2fb   : > { %v3921_v12 = vrot.slane %v3467_v53, 3  ;;  %v4097_v16 = vrot.slane %v3467_v53, 4  ;;  %v4099_v24 = vrot.slane %v3468_v47, 4  ;;  %v3085_v58 = vmax.f32 %v8211_v36, %v8297_v63  ;;  %v3024_v29 = vld [vmem:[#allocation2 + $0x138] sm:$0x3] }
 0x2fc   : > { %v3842_v18 = vmax.f32 %v3698_v39, %v3746_v56  ;;  %5907 = vrot.lane.b32.xlu0 %v5906_v35, %s6017_s19  ;;  %v3588_v45 = vsel %vm960_vm2, %v3585_v11, %v3587_v37  ;;  %v3700_v52 = vmax.f32 %v3467_v53, %v3587_v37  ;;  %v3748_v5 = vsel %vm1137_vm3, %v3746_v56, %v3747_v17  ;;  %v3152_v53 = vld [vmem:[#allocation2 + $0x158] sm:$0x3] }
 0x2fd   : > { %v3922_v59 = vsel %vm1298_vm4, %v3920_v34, %v3921_v12  ;;  %v2786_v9 = vadd.f32 %v2737_v6, %v7819_v20  ;;  %v3699_v47 = vmax.f32 %v8458_v62, %v3588_v45  ;;  %v3924_v0 = vsel %vm1298_vm4, %v3921_v12, %v3923_v55 }
 0x2fe   : > { %v4034_v36 = vmax.f32 %v3842_v18, %v3920_v34  ;;  %v3844_v39 = vmax.f32 %v3700_v52, %v3747_v17  ;;  %v4098_v35 = vsel %vm1475_vm5, %v4096_v54, %v4097_v16  ;;  %v4100_v11 = vsel %vm1475_vm5, %v4097_v16, %v4099_v24  ;;  %v3280_v18 = vld [vmem:[#allocation2 + $0x178] sm:$0x3] }
 0x2ff   : > { %v3087_v56 = vmax.f32 %v8259_v50, %v8336_v42  ;;  %v2850_v37 = vadd.f32 %v2818_v51, %v2786_v9  ;;  %2914 = vst.msk [vmem:[#allocation2 + $0x190] sm:$0xff] %vm145_vm0, %v2786_v9  ;;  %v3843_v4 = vmax.f32 %v3699_v47, %v3748_v5  ;;  %v3088_v62 = vmax.f32 %v2960_v40, %v3024_v29  ;;  %v8536_v51 = vld [vmem:[#allocation2 + $0x180] sm:$0xff]  ;;  %v3408_v40 = vld [vmem:[#allocation2 + $0x198] sm:$0x3] }
 0x300   : > { %v8524_v20 = vmax.f32 %v4034_v36, %v4096_v54  ;;  %v4036_v6 = vmax.f32 %v3844_v39, %v3924_v0  ;;  %v3213_v34 = vmax.f32 %v3085_v58, %v8375_v61  ;;  %v9512_v55 = vmax.f32 %v8213_v7, %v8299_v38  ;;  %v8538_v58 = vld [vmem:[#allocation2 + $0x188] sm:$0xff]  ;;  %v2740_v47 = vpop.f32.mrf.mxu2  ;;  %v2819_v0 = vld [vmem:[%s6278_s18 + $0xb0] sm:$0xff] }
 0x301   : > { %v3215_v12 = vmax.f32 %v3087_v56, %v8410_v15  ;;  %2882 = vst.msk [vmem:[%s6278_s18 + $0xa8] sm:$0xff] %vm145_vm0, %v2850_v37  ;;  %v4035_v50 = vmax.f32 %v3843_v4, %v3922_v59  ;;  %v3216_v24 = vmax.f32 %v3088_v62, %v3152_v53  ;;  %v8549_v29 = vsel %vm1813_vm7, 0.0, %v8467_v25 }
 0x302   : > { %9511 = vst [vmem:[#allocation19_spill] sm:$0xff] %v8524_v20  ;;  %v3214_v17 = vmax.f32 %v9512_v55, %v8377_v30  ;;  %v4560_v16 = vrot.slane %v8524_v20, 6  ;;  %v4448_v54 = vrot.slane %v8524_v20, 7  ;;  %v8540_v45 = vmax.f32 %v4036_v6, %v4100_v11  ;;  %v8562_v62 = vpop.permute.xlu2 %5857 }
 0x303   : > { %v3341_v7 = vmax.f32 %v3213_v34, %v8442_v21  ;;  %v3343_v5 = vmax.f32 %v3215_v12, %v8493_v1  ;;  %v8545_v4 = vmax.f32 %v4035_v50, %v4098_v35  ;;  %v3344_v59 = vmax.f32 %v3216_v24, %v3280_v18 }
 0x304   : > { %9513 = vst [vmem:[#allocation20_spill] sm:$0xff] %v8540_v45  ;;  %v3342_v52 = vmax.f32 %v3214_v17, %v8446_v31  ;;  %v4563_v36 = vrot.slane %v8540_v45, 6  ;;  %v4451_v39 = vrot.slane %v8540_v45, 7  ;;  %v2787_v35 = vadd.f32 %v2740_v47, %v7824_v33 }
 0x305   : > { %9514 = vst [vmem:[#allocation6_spill] sm:$0xff] %v8545_v4  ;;  %v3469_v11 = vmax.f32 %v3341_v7, %v8536_v51  ;;  %v4561_v53 = vrot.slane %v8545_v4, 6  ;;  %v4449_v25 = vrot.slane %v8545_v4, 7  ;;  %v3472_v37 = vmax.f32 %v3344_v59, %v3408_v40 }
 0x306   : > { %v8557_v56 = vmax.f32 %v3342_v52, %v8538_v58  ;;  %v8564_v6 = vld [vmem:[#allocation2 + $0x190] sm:$0xff]  ;;  %v2851_v18 = vadd.f32 %v2819_v0, %v2787_v35  ;;  %2915 = vst.msk [vmem:[#allocation2 + $0x1a8] sm:$0xff] %vm145_vm0, %v2787_v35 }
 0x307   : > { %v3589_v34 = vrot.slane %v3469_v11, 1  ;;  %v4562_v24 = vsel %vm1942_vm6, %v4560_v16, %v4561_v53  ;;  %v4564_v7 = vsel %vm1942_vm6, %v4561_v53, %v4563_v36  ;;  %v4450_v52 = vsel %vm1813_vm7, %v4448_v54, %v4449_v25 }
 0x308   : > { %v3590_v55 = vrot.slane %v8557_v56, 1  ;;  %v3749_v17 = vrot.slane %v8557_v56, 2  ;;  %v3925_v12 = vrot.slane %v8557_v56, 3  ;;  %v4452_v40 = vsel %vm1813_vm7, %v4449_v25, %v4451_v39  ;;  %2883 = vst.msk [vmem:[%s6278_s18 + $0xb0] sm:$0xff] %vm145_vm0, %v2851_v18  ;;  %v2742_v53 = vpop.f32.mrf.mxu2  ;;  %v2820_v25 = vld [vmem:[%s6278_s18 + $0xb8] sm:$0xff]  ;;  %v5848_v18 = vpop.permute.xlu0 %5847 }
 0x309   : > { %v3471_v59 = vmax.f32 %v3343_v5, %v8564_v6  ;;  %v5911_v47 = vpack.i.bf16 %v4564_v7, %v4562_v24  ;;  %v4516_v0 = vsel %vm960_vm2, %v4452_v40, 0.0  ;;  %v3928_v33 = vrot.slane %v3472_v37, 3 }
 0x30a   : > { %v3591_v35 = vsel %vm960_vm2, %v3589_v34, %v3590_v55  ;;  %v5916_v50 = vpack.i.bf16 %v4516_v0, %v4450_v52  ;;  %v4101_v36 = vrot.slane %v8557_v56, 4  ;;  %v4104_v5 = vrot.slane %v3472_v37, 4 }
 0x30b   : > { %v3592_v9 = vrot.slane %v3471_v59, 1  ;;  %v3701_v16 = vmax.f32 %v3469_v11, %v3591_v35  ;;  %v3750_v45 = vrot.slane %v3471_v59, 2  ;;  %5912 = vrot.lane.b32.xlu1 %v5911_v47, %s6016_s15  ;;  %v3926_v54 = vrot.slane %v3471_v59, 3 }
 0x30c   : > { %v4102_v39 = vrot.slane %v3471_v59, 4  ;;  %5917 = vrot.lane.b32.xlu2 %v5916_v50, %s6017_s19  ;;  %v2788_v11 = vadd.f32 %v2742_v53, %v7847_v23  ;;  %v5850_v40 = vunpack.i.h.bf16 %v5848_v18  ;;  %v5849_v47 = vunpack.i.l.bf16 %v5848_v18 }
 0x30d   : > { %v3593_v24 = vsel %vm960_vm2, %v3590_v55, %v3592_v9  ;;  %v3703_v34 = vmax.f32 %v3471_v59, %v3592_v9  ;;  %v3751_v7 = vsel %vm1137_vm3, %v3749_v17, %v3750_v45  ;;  %v3845_v52 = vmax.f32 %v3701_v16, %v3749_v17 }
 0x30e   : > { %v3702_v0 = vmax.f32 %v8557_v56, %v3593_v24  ;;  %v3927_v37 = vsel %vm1298_vm4, %v3925_v12, %v3926_v54  ;;  %v3929_v50 = vsel %vm1298_vm4, %v3926_v54, %v3928_v33  ;;  %v2852_v20 = vadd.f32 %v2820_v25, %v2788_v11  ;;  %2916 = vst.msk [vmem:[#allocation2 + $0x1b0] sm:$0xff] %vm145_vm0, %v2788_v11 }
 0x30f   : > { %v3847_v35 = vmax.f32 %v3703_v34, %v3750_v45  ;;  %v4037_v4 = vmax.f32 %v3845_v52, %v3925_v12  ;;  %v4845_v9 = vsel %vm2263_vm9, %v8487_v28, %v5849_v47  ;;  %v4846_v23 = vsel %vm2263_vm9, %v8491_v27, %v5850_v40  ;;  %v2964_v34 = vld [vmem:[#allocation2 + $0x138] sm:$0x3] }
 0x310   : > { %v3846_v55 = vmax.f32 %v3702_v0, %v3751_v7  ;;  %v4877_v17 = vpack.c.bf16 %v4845_v9, %v4845_v9  ;;  %v4878_v59 = vpack.c.bf16 %v4846_v23, %v4846_v23  ;;  %v4103_v45 = vsel %vm1475_vm5, %v4101_v36, %v4102_v39  ;;  %2884 = vst.msk [vmem:[%s6278_s18 + $0xb8] sm:$0xff] %vm145_vm0, %v2852_v20  ;;  %v3028_v7 = vld [vmem:[#allocation2 + $0x158] sm:$0x3] }
 0x311   : > { %v4039_v16 = vmax.f32 %v3847_v35, %v3929_v50  ;;  %v4105_v12 = vsel %vm1475_vm5, %v4102_v39, %v4104_v5  ;;  %v8600_v33 = vmax.f32 %v4037_v4, %v4101_v36  ;;  %v4303_v54 = vrot.slane %v8230_v14, 5  ;;  %v2745_v36 = vpop.f32.mrf.mxu2  ;;  %v2821_v39 = vld [vmem:[%s6278_s18 + $0xc0] sm:$0xff]  ;;  %v9516_v40 = vld [vmem:[#allocation14_spill] sm:$0xff] }
 0x312   : > { %v4038_v56 = vmax.f32 %v3846_v55, %v3927_v37  ;;  %v4939_v28 = vunpack.c.l.b16 %v4877_v17  ;;  %v4940_v53 = vunpack.c.l.b16 %v4878_v59  ;;  %v4301_v27 = vrot.slane %v8246_v3, 5  ;;  %v3156_v23 = vld [vmem:[#allocation2 + $0x178] sm:$0x3] }
 0x313   : > { %v8603_v25 = vmax.f32 %v4039_v16, %v4105_v12  ;;  %v4565_v24 = vrot.slane %v8600_v33, 6  ;;  %v4453_v20 = vrot.slane %v8600_v33, 7  ;;  %v3089_v4 = vmax.f32 %v8297_v63, %v8375_v61 }
 0x314   : > { %v8606_v18 = vmax.f32 %v4038_v56, %v4103_v45  ;;  %v4969_v14 = vpack.c.b16 %v4940_v53, %v4939_v28  ;;  %v9515_v3 = vrot.slane %v8208_v41, 5  ;;  %v2789_v47 = vadd.f32 %v2745_v36, %v9516_v40 }
 0x315   : > { %v4568_v5 = vrot.slane %v8603_v25, 6  ;;  %v4456_v52 = vrot.slane %v8603_v25, 7  ;;  %v8622_v37 = vsel %vm1700_vm8, %v4301_v27, %v4303_v54  ;;  %v3090_v41 = vmax.f32 %v8299_v38, %v8377_v30  ;;  %v3284_v54 = vld [vmem:[#allocation2 + $0x198] sm:$0x3]  ;;  %v8652_v36 = vld [vmem:[#allocation2 + $0x1b0] sm:$0xff] }
 0x316   : > { %v4302_v11 = vsel %vm1700_vm8, %v9515_v3, %v4301_v27  ;;  %v4566_v0 = vrot.slane %v8606_v18, 6  ;;  %v4454_v35 = vrot.slane %v8606_v18, 7  ;;  %5600 = vmatmul.msk.bf16.vlgmr.msrb.gmra.mxu3 %vm2418_vm10, %v4969_v14  ;;  %5620 = vmatmul.msk.bf16.gmra.mxu0 %vm2418_vm10, %v4969_v14  ;;  %v3091_v50 = vmax.f32 %v8336_v42, %v8410_v15  ;;  %2917 = vst.msk [vmem:[#allocation2 + $0x1c8] sm:$0xff] %vm145_vm0, %v2789_v47  ;;  %v8644_v27 = vld [vmem:[#allocation2 + $0x1a0] sm:$0xff] }
 0x317   : > { %v8627_v63 = vsel %vm1813_vm7, 0.0, %v4302_v11  ;;  %v3092_v9 = vmax.f32 %v2964_v34, %v3028_v7  ;;  %v2853_v55 = vadd.f32 %v2821_v39, %v2789_v47  ;;  %v3217_v12 = vmax.f32 %v3089_v4, %v8442_v21  ;;  %v3032_v11 = vld [vmem:[#allocation2 + $0x178] sm:$0x3] }
 0x318   : > { %v4567_v17 = vsel %vm1942_vm6, %v4565_v24, %v4566_v0  ;;  %v4569_v59 = vsel %vm1942_vm6, %v4566_v0, %v4568_v5  ;;  %v4455_v16 = vsel %vm1813_vm7, %v4453_v20, %v4454_v35  ;;  %v4457_v56 = vsel %vm1813_vm7, %v4454_v35, %v4456_v52  ;;  %v8646_v24 = vld [vmem:[#allocation2 + $0x1a8] sm:$0xff]  ;;  %v3412_v52 = vld [vmem:[#allocation2 + $0x1b8] sm:$0x3]  ;;  %v5853_v40 = vpop.permute.xlu1 %5852 }
 0x319   : > { %v5921_v45 = vpack.i.bf16 %v4569_v59, %v4567_v17  ;;  %v3218_v38 = vmax.f32 %v3090_v41, %v8446_v31  ;;  %2885 = vst.msk [vmem:[%s6278_s18 + $0xc0] sm:$0xff] %vm145_vm0, %v2853_v55  ;;  %v4517_v42 = vsel %vm960_vm2, %v4457_v56, 0.0  ;;  %v3219_v28 = vmax.f32 %v3091_v50, %v8493_v1  ;;  %v2747_v47 = vpop.f32.mrf.mxu2  ;;  %v2822_v0 = vld [vmem:[%s6278_s18 + $0xc8] sm:$0xff]  ;;  %v9517_v17 = vld [vmem:[#allocation13_spill] sm:$0xff] }
 0x31a   : > { %v3220_v53 = vmax.f32 %v3092_v9, %v3156_v23  ;;  %v4295_v20 = vrot.slane %v8137_v2, 5  ;;  %v5926_v34 = vpack.i.bf16 %v4517_v42, %v4455_v16  ;;  %v3345_v7 = vmax.f32 %v3217_v12, %v8536_v51 }
 0x31b   : > { %5922 = vrot.lane.b32.xlu0 %v5921_v45, %s6016_s15  ;;  %v3346_v4 = vmax.f32 %v3218_v38, %v8538_v58  ;;  %v4298_v39 = vrot.slane %v8153_v26, 5  ;;  %v3347_v14 = vmax.f32 %v3219_v28, %v8564_v6  ;;  %v4296_v3 = vrot.slane %v8157_v49, 5 }
 0x31c   : > { %v3348_v5 = vmax.f32 %v3220_v53, %v3284_v54  ;;  %5927 = vrot.lane.b32.xlu1 %v5926_v34, %s6017_s19  ;;  %v3473_v35 = vmax.f32 %v3345_v7, %v8644_v27  ;;  %v5855_v23 = vunpack.i.h.bf16 %v5853_v40  ;;  %v5854_v55 = vunpack.i.l.bf16 %v5853_v40 }
 0x31d   : > { %v8663_v41 = vmax.f32 %v3346_v4, %v8646_v24  ;;  %v2790_v59 = vadd.f32 %v2747_v47, %v9517_v17  ;;  %v8671_v16 = vmax.f32 %v3347_v14, %v8652_v36  ;;  %v9518_v34 = vunpack.i.l.bf16 %v8562_v62 }
 0x31e   : > { %v3476_v45 = vmax.f32 %v3348_v5, %v3412_v52  ;;  %v3594_v56 = vrot.slane %v3473_v35, 1  ;;  %v4815_v54 = vsel %vm145_vm0, %v8549_v29, %v5854_v55  ;;  %v4816_v42 = vsel %vm145_vm0, %v8476_v19, %v5855_v23 }
 0x31f   : > { %v3595_v12 = vrot.slane %v8663_v41, 1  ;;  %v3752_v38 = vrot.slane %v8663_v41, 2  ;;  %v2854_v28 = vadd.f32 %v2822_v0, %v2790_v59  ;;  %2918 = vst.msk [vmem:[#allocation2 + $0x1d0] sm:$0xff] %vm145_vm0, %v2790_v59  ;;  %v3597_v53 = vrot.slane %v8671_v16, 1 }
 0x320   : > { %v4847_v7 = vsel %vm2263_vm9, %v4815_v54, %v9518_v34  ;;  %v9519_v4 = vunpack.i.h.bf16 %v8562_v62  ;;  %v3753_v29 = vrot.slane %v8671_v16, 2  ;;  %v3930_v55 = vrot.slane %v8663_v41, 3  ;;  %v2823_v34 = vld [vmem:[%s6278_s18 + $0xd0] sm:$0xff] }
 0x321   : > { %v3596_v5 = vsel %vm960_vm2, %v3594_v56, %v3595_v12  ;;  %2886 = vst.msk [vmem:[%s6278_s18 + $0xc8] sm:$0xff] %vm145_vm0, %v2854_v28  ;;  %v4879_v19 = vpack.c.bf16 %v4847_v7, %v4847_v7  ;;  %v3598_v40 = vsel %vm960_vm2, %v3595_v12, %v3597_v53  ;;  %v3706_v23 = vmax.f32 %v8671_v16, %v3597_v53  ;;  %v2750_v28 = vpop.f32.mrf.mxu2  ;;  %v9520_v53 = vld [vmem:[#allocation5_spill] sm:$0xff] }
 0x322   : > { %v4848_v14 = vsel %vm2263_vm9, %v4816_v42, %v9519_v4  ;;  %v3704_v47 = vmax.f32 %v3473_v35, %v3596_v5  ;;  %v3705_v0 = vmax.f32 %v8663_v41, %v3598_v40  ;;  %v3754_v62 = vsel %vm1137_vm3, %v3752_v38, %v3753_v29  ;;  %v5873_v42 = vpop.permute.xlu2 %5872 }
 0x323   : > { %v4880_v52 = vpack.c.bf16 %v4848_v14, %v4848_v14  ;;  %v4941_v17 = vunpack.c.l.b16 %v4879_v19  ;;  %v3931_v54 = vrot.slane %v8671_v16, 3  ;;  %v3850_v4 = vmax.f32 %v3706_v23, %v3753_v29 }
 0x324   : > { %v3848_v56 = vmax.f32 %v3704_v47, %v3752_v38  ;;  %v3849_v7 = vmax.f32 %v3705_v0, %v3754_v62  ;;  %v3933_v12 = vrot.slane %v3476_v45, 3  ;;  %v4106_v35 = vrot.slane %v8663_v41, 4  ;;  %v2968_v47 = vld [vmem:[#allocation2 + $0x158] sm:$0x3] }
 0x325   : > { %v4942_v59 = vunpack.c.l.b16 %v4880_v52  ;;  %v5875_v14 = vunpack.i.h.bf16 %v5873_v42  ;;  %v5874_v5 = vunpack.i.l.bf16 %v5873_v42  ;;  %v2791_v40 = vadd.f32 %v2750_v28, %v9520_v53 }
 0x326   : > { %v3932_v50 = vsel %vm1298_vm4, %v3930_v55, %v3931_v54  ;;  %v3934_v19 = vsel %vm1298_vm4, %v3931_v54, %v3933_v12  ;;  %v4040_v38 = vmax.f32 %v3848_v56, %v3930_v55  ;;  %v4107_v52 = vrot.slane %v8671_v16, 4 }
 0x327   : > { %v4970_v9 = vpack.c.b16 %v4942_v59, %v4941_v17  ;;  %v8705_v29 = vsel %vm145_vm0, %v8627_v63, %v5874_v5  ;;  %v8709_v41 = vsel %vm145_vm0, %v8622_v37, %v5875_v14  ;;  %v2855_v0 = vadd.f32 %v2823_v34, %v2791_v40  ;;  %2919 = vst.msk [vmem:[#allocation2 + $0x1e8] sm:$0xff] %vm145_vm0, %v2791_v40  ;;  %v3160_v17 = vld [vmem:[#allocation2 + $0x198] sm:$0x3] }
 0x328   : > { %v4041_v16 = vmax.f32 %v3849_v7, %v3932_v50  ;;  %v4042_v23 = vmax.f32 %v3850_v4, %v3934_v19  ;;  %v4108_v62 = vsel %vm1475_vm5, %v4106_v35, %v4107_v52  ;;  %v4109_v55 = vrot.slane %v3476_v45, 4  ;;  %v9524_v19 = vld [vmem:[#allocation3_spill] sm:$0xff] }
 0x329   : > { %5601 = vmatmul.msk.bf16.gmra.mxu3 %vm2418_vm10, %v4970_v9  ;;  %5621 = vmatmul.msk.bf16.gmra.mxu0 %vm2418_vm10, %v4970_v9  ;;  %2887 = vst.msk [vmem:[%s6278_s18 + $0xd0] sm:$0xff] %vm145_vm0, %v2855_v0  ;;  %v8718_v63 = vmax.f32 %v4040_v38, %v4106_v35  ;;  %v4297_v37 = vsel %vm1700_vm8, %v4295_v20, %v4296_v3  ;;  %v5863_v28 = vpop.permute.xlu0 %5862  ;;  %v2752_v34 = vpop.f32.mrf.mxu2 }
 0x32a   : > { %5641 = vmatmul.msk.bf16.vlgmr.msrb.gmra.mxu1 %vm2418_vm10, %v4970_v9  ;;  %v4299_v50 = vsel %vm1700_vm8, %v4296_v3, %v4298_v39  ;;  %v3096_v9 = vmax.f32 %v2968_v47, %v3032_v11  ;;  %v4110_v45 = vsel %vm1475_vm5, %v4107_v52, %v4109_v55  ;;  %v8731_v59 = vmax.f32 %v4041_v16, %v4108_v62  ;;  %v3288_v62 = vld [vmem:[#allocation2 + $0x1b8] sm:$0x3]  ;;  %v8763_v55 = vld [vmem:[#allocation2 + $0x1c0] sm:$0xff] }
 0x32b   : > { %v4399_v56 = vsel %vm1813_vm7, 0.0, %v4297_v37  ;;  %v9521_v2 = vmax.f32 %v8375_v61, %v8442_v21  ;;  %v8738_v54 = vmax.f32 %v4042_v23, %v4110_v45  ;;  %v4570_v26 = vrot.slane %v8718_v63, 6  ;;  %v5868_v52 = vpop.permute.xlu1 %5867 }
 0x32c   : > { %v4458_v49 = vrot.slane %v8718_v63, 7  ;;  %v9522_v39 = vmax.f32 %v8377_v30, %v8446_v31  ;;  %v4571_v11 = vrot.slane %v8731_v59, 6  ;;  %v4459_v42 = vrot.slane %v8731_v59, 7  ;;  %v2824_v30 = vld [vmem:[%s6278_s18 + $0xd8] sm:$0xff] }
 0x32d   : > { %v3221_v20 = vmax.f32 %v9521_v2, %v8536_v51  ;;  %v9523_v61 = vmax.f32 %v8410_v15, %v8493_v1  ;;  %v3224_v4 = vmax.f32 %v3096_v9, %v3160_v17  ;;  %v4573_v12 = vrot.slane %v8738_v54, 6  ;;  %v8767_v2 = vld [vmem:[#allocation2 + $0x1c8] sm:$0xff] }
 0x32e   : > { %v3222_v3 = vmax.f32 %v9522_v39, %v8538_v58  ;;  %v4461_v35 = vrot.slane %v8738_v54, 7  ;;  %v5865_v14 = vunpack.i.h.bf16 %v5863_v28  ;;  %v5864_v5 = vunpack.i.l.bf16 %v5863_v28  ;;  %v3416_v39 = vld [vmem:[#allocation2 + $0x1d8] sm:$0x3] }
 0x32f   : > { %v3223_v7 = vmax.f32 %v9523_v61, %v8564_v6  ;;  %v4572_v53 = vsel %vm1942_vm6, %v4570_v26, %v4571_v11  ;;  %v4460_v40 = vsel %vm1813_vm7, %v4458_v49, %v4459_v42  ;;  %v2792_v38 = vadd.f32 %v2752_v34, %v9524_v19 }
 0x330   : > { %v3349_v47 = vmax.f32 %v3221_v20, %v8644_v27  ;;  %v4574_v15 = vsel %vm1942_vm6, %v4571_v11, %v4573_v12  ;;  %v4462_v0 = vsel %vm1813_vm7, %v4459_v42, %v4461_v35  ;;  %v4817_v16 = vsel %vm145_vm0, %v4399_v56, %v5864_v5  ;;  %v8769_v20 = vld [vmem:[#allocation2 + $0x1d0] sm:$0xff] }
 0x331   : > { %v4818_v23 = vsel %vm145_vm0, %v4299_v50, %v5865_v14  ;;  %v5931_v37 = vpack.i.bf16 %v4574_v15, %v4572_v53  ;;  %v4518_v9 = vsel %vm960_vm2, %v4462_v0, 0.0  ;;  %v2856_v17 = vadd.f32 %v2824_v30, %v2792_v38  ;;  %2920 = vst.msk [vmem:[#allocation2 + $0x1f0] sm:$0xff] %vm145_vm0, %v2792_v38  ;;  %v2755_v35 = vpop.f32.mrf.mxu2  ;;  %v2825_v14 = vld [vmem:[%s6278_s18 + $0xe0] sm:$0xff] }
 0x332   : > { %v5870_v45 = vunpack.i.h.bf16 %v5868_v52  ;;  %v5936_v26 = vpack.i.bf16 %v4518_v9, %v4460_v40  ;;  %v5869_v49 = vunpack.i.l.bf16 %v5868_v52  ;;  %v3350_v50 = vmax.f32 %v3222_v3, %v8646_v24  ;;  %v9525_v40 = vld [vmem:[#allocation4_spill] sm:$0xff] }
 0x333   : > { %v3351_v56 = vmax.f32 %v3223_v7, %v8652_v36  ;;  %5932 = vrot.lane.b32.xlu2 %v5931_v37, %s6016_s15  ;;  %2888 = vst.msk [vmem:[%s6278_s18 + $0xd8] sm:$0xff] %vm145_vm0, %v2856_v17  ;;  %v3352_v42 = vmax.f32 %v3224_v4, %v3288_v62  ;;  %v3477_v28 = vmax.f32 %v3349_v47, %v8763_v55  ;;  %v4305_v34 = vrot.slane %v8295_v48, 5  ;;  %v8787_v15 = vpop.permute.xlu2 %5887 }
 0x334   : > { %v4850_v11 = vsel %vm2263_vm9, %v4818_v23, %v5870_v45  ;;  %5937 = vrot.lane.b32.xlu0 %v5936_v26, %s6017_s19  ;;  %v4849_v61 = vsel %vm2263_vm9, %v4817_v16, %v5869_v49  ;;  %v3478_v3 = vmax.f32 %v3350_v50, %v8767_v2  ;;  %v3097_v4 = vmax.f32 %v8442_v21, %v8536_v51 }
 0x335   : > { %v4882_v12 = vpack.c.bf16 %v4850_v11, %v4850_v11  ;;  %v3479_v7 = vmax.f32 %v3351_v56, %v8769_v20  ;;  %v4881_v5 = vpack.c.bf16 %v4849_v61, %v4849_v61  ;;  %v3480_v30 = vmax.f32 %v3352_v42, %v3416_v39 }
 0x336   : > { %v3599_v53 = vrot.slane %v3477_v28, 1  ;;  %v2793_v19 = vadd.f32 %v2755_v35, %v9525_v40  ;;  %v3600_v52 = vrot.slane %v3478_v3, 1  ;;  %v3755_v16 = vrot.slane %v3478_v3, 2 }
 0x337   : > { %v4944_v38 = vunpack.c.l.b16 %v4882_v12  ;;  %v3602_v47 = vrot.slane %v3479_v7, 1  ;;  %v4943_v0 = vunpack.c.l.b16 %v4881_v5  ;;  %v3756_v23 = vrot.slane %v3479_v7, 2 }
 0x338   : > { %v3935_v62 = vrot.slane %v3478_v3, 3  ;;  %v2857_v37 = vadd.f32 %v2825_v14, %v2793_v19  ;;  %2921 = vst.msk [vmem:[#allocation2 + $0x208] sm:$0xff] %vm145_vm0, %v2793_v19  ;;  %v5890_v9 = vunpack.i.h.bf16 %v8787_v15  ;;  %v5889_v17 = vunpack.i.l.bf16 %v8787_v15  ;;  %v2972_v19 = vld [vmem:[#allocation2 + $0x178] sm:$0x3] }
 0x339   : > { %v3601_v21 = vsel %vm960_vm2, %v3599_v53, %v3600_v52  ;;  %v4971_v45 = vpack.c.b16 %v4944_v38, %v4943_v0  ;;  %v3603_v26 = vsel %vm960_vm2, %v3600_v52, %v3602_v47  ;;  %v3709_v50 = vmax.f32 %v3479_v7, %v3602_v47  ;;  %v3036_v38 = vld [vmem:[#allocation2 + $0x198] sm:$0x3] }
 0x33a   : > { %v3707_v49 = vmax.f32 %v3477_v28, %v3601_v21  ;;  %2889 = vst.msk [vmem:[%s6278_s18 + $0xe0] sm:$0xff] %vm145_vm0, %v2857_v37  ;;  %v3708_v56 = vmax.f32 %v3478_v3, %v3603_v26  ;;  %v3757_v39 = vsel %vm1137_vm3, %v3755_v16, %v3756_v23  ;;  %v3936_v11 = vrot.slane %v3479_v7, 3  ;;  %v2757_v37 = vpop.f32.mrf.mxu2  ;;  %v2826_v21 = vld [vmem:[%s6278_s18 + $0xe8] sm:$0xff] }
 0x33b   : > { %v3938_v42 = vrot.slane %v3480_v30, 3  ;;  %5602 = vmatmul.msk.bf16.gmra.mxu3 %vm2418_vm10, %v4971_v45  ;;  %5622 = vmatmul.msk.bf16.gmra.mxu0 %vm2418_vm10, %v4971_v45  ;;  %v3853_v12 = vmax.f32 %v3709_v50, %v3756_v23  ;;  %v4111_v35 = vrot.slane %v3478_v3, 4  ;;  %v4112_v14 = vrot.slane %v3479_v7, 4  ;;  %v5878_v26 = vpop.permute.xlu0 %5877 }
 0x33c   : > { %v3851_v61 = vmax.f32 %v3707_v49, %v3755_v16  ;;  %5642 = vmatmul.msk.bf16.gmra.mxu1 %vm2418_vm10, %v4971_v45  ;;  %v3852_v28 = vmax.f32 %v3708_v56, %v3757_v39  ;;  %v3937_v5 = vsel %vm1298_vm4, %v3935_v62, %v3936_v11  ;;  %v4114_v40 = vrot.slane %v3480_v30, 4 }
 0x33d   : > { %v3939_v53 = vsel %vm1298_vm4, %v3936_v11, %v3938_v42  ;;  %v4113_v0 = vsel %vm1475_vm5, %v4111_v35, %v4112_v14  ;;  %v3098_v3 = vmax.f32 %v8446_v31, %v8538_v58  ;;  %v2794_v23 = vadd.f32 %v2757_v37, %v8035_v46 }
 0x33e   : > { %v4043_v52 = vmax.f32 %v3851_v61, %v3935_v62  ;;  %v4045_v47 = vmax.f32 %v3853_v12, %v3939_v53  ;;  %v4044_v7 = vmax.f32 %v3852_v28, %v3937_v5  ;;  %v4115_v16 = vsel %vm1475_vm5, %v4112_v14, %v4114_v40  ;;  %v3164_v53 = vld [vmem:[#allocation2 + $0x1b8] sm:$0x3] }
 0x33f   : > { %v3099_v45 = vmax.f32 %v8493_v1, %v8564_v6  ;;  %v3100_v49 = vmax.f32 %v2972_v19, %v3036_v38  ;;  %v3225_v50 = vmax.f32 %v3097_v4, %v8644_v27  ;;  %v2858_v31 = vadd.f32 %v2826_v21, %v2794_v23  ;;  %2922 = vst.msk [vmem:[#allocation2 + $0x210] sm:$0xff] %vm145_vm0, %v2794_v23  ;;  %v3292_v23 = vld [vmem:[#allocation2 + $0x1d8] sm:$0x3] }
 0x340   : > { %v8810_v30 = vmax.f32 %v4043_v52, %v4111_v35  ;;  %v8812_v62 = vmax.f32 %v4045_v47, %v4115_v16  ;;  %v8815_v56 = vmax.f32 %v4044_v7, %v4113_v0  ;;  %v5880_v39 = vunpack.i.h.bf16 %v5878_v26 }
 0x341   : > { %v5879_v11 = vunpack.i.l.bf16 %v5878_v26  ;;  %2890 = vst.msk [vmem:[%s6278_s18 + $0xe8] sm:$0xff] %vm145_vm0, %v2858_v31  ;;  %v3226_v40 = vmax.f32 %v3098_v3, %v8646_v24  ;;  %v3227_v19 = vmax.f32 %v3099_v45, %v8652_v36  ;;  %v8838_v26 = vld [vmem:[#allocation2 + $0x1e0] sm:$0xff]  ;;  %v3228_v31 = vmax.f32 %v3100_v49, %v3164_v53 }
 0x342   : > { %v4575_v46 = vrot.slane %v8810_v30, 6  ;;  %v4578_v1 = vrot.slane %v8812_v62, 6  ;;  %v4463_v42 = vrot.slane %v8810_v30, 7  ;;  %v4466_v61 = vrot.slane %v8812_v62, 7  ;;  %v2760_v21 = vpop.f32.mrf.mxu2 }
 0x343   : > { %v4576_v12 = vrot.slane %v8815_v56, 6  ;;  %v4464_v35 = vrot.slane %v8815_v56, 7  ;;  %v4851_v4 = vsel %vm2263_vm9, %v8705_v29, %v5879_v11  ;;  %v4852_v14 = vsel %vm2263_vm9, %v8709_v41, %v5880_v39  ;;  %v2827_v41 = vld [vmem:[%s6278_s18 + $0xf0] sm:$0xff]  ;;  %v8842_v11 = vld [vmem:[#allocation2 + $0x1e8] sm:$0xff] }
 0x344   : > { %v4883_v28 = vpack.c.bf16 %v4851_v4, %v4851_v4  ;;  %v4884_v5 = vpack.c.bf16 %v4852_v14, %v4852_v14  ;;  %v2795_v45 = vadd.f32 %v2760_v21, %v8079_v60  ;;  %v3353_v39 = vmax.f32 %v3225_v50, %v8763_v55 }
 0x345   : > { %v4577_v38 = vsel %vm1942_vm6, %v4575_v46, %v4576_v12  ;;  %v4579_v52 = vsel %vm1942_vm6, %v4576_v12, %v4578_v1  ;;  %v4465_v47 = vsel %vm1813_vm7, %v4463_v42, %v4464_v35  ;;  %v4467_v0 = vsel %vm1813_vm7, %v4464_v35, %v4466_v61  ;;  %v8844_v46 = vld [vmem:[#allocation2 + $0x1f0] sm:$0xff]  ;;  %v3420_v12 = vld [vmem:[#allocation2 + $0x1f8] sm:$0x3] }
 0x346   : > { %v5941_v37 = vpack.i.bf16 %v4579_v52, %v4577_v38  ;;  %v4519_v29 = vsel %vm960_vm2, %v4467_v0, 0.0  ;;  %v4945_v7 = vunpack.c.l.b16 %v4883_v28  ;;  %v4946_v16 = vunpack.c.l.b16 %v4884_v5  ;;  %2923 = vst.msk [vmem:[#allocation2 + $0x228] sm:$0xff] %vm145_vm0, %v2795_v45 }
 0x347   : > { %v5946_v3 = vpack.i.bf16 %v4519_v29, %v4465_v47  ;;  %v3354_v42 = vmax.f32 %v3226_v40, %v8767_v2  ;;  %v3355_v61 = vmax.f32 %v3227_v19, %v8769_v20  ;;  %v4308_v35 = vrot.slane %v8313_v43, 5 }
 0x348   : > { %5942 = vrot.lane.b32.xlu1 %v5941_v37, %s6016_s15  ;;  %v4972_v1 = vpack.c.b16 %v4946_v16, %v4945_v7  ;;  %v2859_v60 = vadd.f32 %v2827_v41, %v2795_v45  ;;  %v3356_v49 = vmax.f32 %v3228_v31, %v3292_v23  ;;  %v3481_v50 = vmax.f32 %v3353_v39, %v8838_v26 }
 0x349   : > { %5947 = vrot.lane.b32.xlu2 %v5946_v3, %s6017_s19  ;;  %v4306_v4 = vrot.slane %v8317_v44, 5  ;;  %v3482_v14 = vmax.f32 %v3354_v42, %v8842_v11  ;;  %v3483_v28 = vmax.f32 %v3355_v61, %v8844_v46  ;;  %v4315_v5 = vrot.slane %v8439_v10, 5 }
 0x34a   : > { %v4318_v53 = vrot.slane %v8455_v57, 5  ;;  %2891 = vst.msk [vmem:[%s6278_s18 + $0xf0] sm:$0xff] %vm145_vm0, %v2859_v60  ;;  %v3484_v43 = vmax.f32 %v3356_v49, %v3420_v12  ;;  %v3604_v40 = vrot.slane %v3481_v50, 1  ;;  %v5883_v23 = vpop.permute.xlu1 %5882 }
 0x34b   : > { %v4307_v19 = vsel %vm1700_vm8, %v4305_v34, %v4306_v4  ;;  %v4309_v38 = vsel %vm1700_vm8, %v4306_v4, %v4308_v35  ;;  %5603 = vmatmul.msk.bf16.gmra.mxu3 %vm2418_vm10, %v4972_v1  ;;  %5623 = vmatmul.msk.bf16.gmra.mxu0 %vm2418_vm10, %v4972_v1  ;;  %v3605_v44 = vrot.slane %v3482_v14, 1  ;;  %v3607_v52 = vrot.slane %v3483_v28, 1 }
 0x34c   : > { %v3758_v47 = vrot.slane %v3482_v14, 2  ;;  %v3759_v0 = vrot.slane %v3483_v28, 2  ;;  %5643 = vmatmul.msk.bf16.gmra.mxu1 %vm2418_vm10, %v4972_v1  ;;  %v3940_v37 = vrot.slane %v3482_v14, 3  ;;  %v3941_v29 = vrot.slane %v3483_v28, 3 }
 0x34d   : > { %v3943_v21 = vrot.slane %v3484_v43, 3  ;;  %v4116_v41 = vrot.slane %v3482_v14, 4  ;;  %v3606_v48 = vsel %vm960_vm2, %v3604_v40, %v3605_v44  ;;  %v3608_v34 = vsel %vm960_vm2, %v3605_v44, %v3607_v52  ;;  %v2762_v40 = vpop.f32.mrf.mxu2 }
 0x34e   : > { %v3712_v7 = vmax.f32 %v3483_v28, %v3607_v52  ;;  %v3760_v16 = vsel %vm1137_vm3, %v3758_v47, %v3759_v0  ;;  %v3710_v3 = vmax.f32 %v3481_v50, %v3606_v48  ;;  %v3711_v45 = vmax.f32 %v3482_v14, %v3608_v34  ;;  %v9526_v34 = vld [vmem:[#allocation18_spill] sm:$0xff] }
 0x34f   : > { %v3942_v31 = vsel %vm1298_vm4, %v3940_v37, %v3941_v29  ;;  %v3944_v39 = vsel %vm1298_vm4, %v3941_v29, %v3943_v21  ;;  %v4117_v1 = vrot.slane %v3483_v28, 4  ;;  %v4119_v61 = vrot.slane %v3484_v43, 4 }
 0x350   : > { %v3856_v42 = vmax.f32 %v3712_v7, %v3759_v0  ;;  %v5885_v12 = vunpack.i.h.bf16 %v5883_v23  ;;  %v3854_v35 = vmax.f32 %v3710_v3, %v3758_v47  ;;  %v3855_v60 = vmax.f32 %v3711_v45, %v3760_v16  ;;  %v2828_v47 = vld [vmem:[%s6278_s18 + $0xf8] sm:$0xff] }
 0x351   : > { %v5884_v49 = vunpack.i.l.bf16 %v5883_v23  ;;  %v4401_v4 = vsel %vm1813_vm7, 0.0, %v4307_v19  ;;  %v4118_v52 = vsel %vm1475_vm5, %v4116_v41, %v4117_v1  ;;  %v4120_v50 = vsel %vm1475_vm5, %v4117_v1, %v4119_v61 }
 0x352   : > { %v4048_v44 = vmax.f32 %v3856_v42, %v3944_v39  ;;  %v4822_v14 = vsel %vm145_vm0, %v4309_v38, %v5885_v12  ;;  %v4046_v48 = vmax.f32 %v3854_v35, %v3940_v37  ;;  %v4047_v29 = vmax.f32 %v3855_v60, %v3942_v31 }
 0x353   : > { %v4821_v28 = vsel %vm145_vm0, %v4401_v4, %v5884_v49  ;;  %v4854_v43 = vsel %vm2263_vm9, %v4822_v14, %v5890_v9  ;;  %v2796_v7 = vadd.f32 %v2762_v40, %v9526_v34  ;;  %v4316_v23 = vrot.slane %v8469_v8, 5  ;;  %v2976_v4 = vld [vmem:[#allocation2 + $0x198] sm:$0x3] }
 0x354   : > { %v8881_v0 = vmax.f32 %v4048_v44, %v4120_v50  ;;  %v4853_v19 = vsel %vm2263_vm9, %v4821_v28, %v5889_v17  ;;  %v4886_v21 = vpack.c.bf16 %v4854_v43, %v4854_v43  ;;  %v8887_v38 = vmax.f32 %v4046_v48, %v4116_v41  ;;  %v5903_v15 = vpop.permute.xlu2 %5902  ;;  %v3040_v40 = vld [vmem:[#allocation2 + $0x1b8] sm:$0x3] }
 0x355   : > { %v8889_v37 = vmax.f32 %v4047_v29, %v4118_v52  ;;  %v4885_v16 = vpack.c.bf16 %v4853_v19, %v4853_v19  ;;  %v2860_v31 = vadd.f32 %v2828_v47, %v2796_v7  ;;  %2924 = vst.msk [vmem:[#allocation2 + $0x230] sm:$0xff] %vm145_vm0, %v2796_v7  ;;  %v5904_v8 = vunpack.i.l.bf16 %v5903_v15  ;;  %v3168_v19 = vld [vmem:[#allocation2 + $0x1d8] sm:$0x3] }
 0x356   : > { %v4583_v9 = vrot.slane %v8881_v0, 6  ;;  %v4471_v3 = vrot.slane %v8881_v0, 7  ;;  %v4948_v45 = vunpack.c.l.b16 %v4886_v21  ;;  %v4580_v17 = vrot.slane %v8887_v38, 6  ;;  %v3296_v7 = vld [vmem:[#allocation2 + $0x1f8] sm:$0x3] }
 0x357   : > { %v4581_v39 = vrot.slane %v8889_v37, 6  ;;  %v4468_v41 = vrot.slane %v8887_v38, 7  ;;  %v4469_v42 = vrot.slane %v8889_v37, 7  ;;  %v4947_v1 = vunpack.c.l.b16 %v4885_v16  ;;  %2892 = vst.msk [vmem:[%s6278_s18 + $0xf8] sm:$0xff] %vm145_vm0, %v2860_v31 }
 0x358   : > { %v4317_v61 = vsel %vm1700_vm8, %v4315_v5, %v4316_v23  ;;  %v5905_v50 = vunpack.i.h.bf16 %v5903_v15  ;;  %v4319_v10 = vsel %vm1700_vm8, %v4316_v23, %v4318_v53  ;;  %v3101_v29 = vmax.f32 %v8536_v51, %v8644_v27 }
 0x359   : > { %v4582_v12 = vsel %vm1942_vm6, %v4580_v17, %v4581_v39  ;;  %v4584_v35 = vsel %vm1942_vm6, %v4581_v39, %v4583_v9  ;;  %v4470_v60 = vsel %vm1813_vm7, %v4468_v41, %v4469_v42  ;;  %v4472_v49 = vsel %vm1813_vm7, %v4469_v42, %v4471_v3  ;;  %v8933_v9 = vld [vmem:[#allocation2 + $0x200] sm:$0xff]  ;;  %v3424_v39 = vld [vmem:[#allocation2 + $0x218] sm:$0x3] }
 0x35a   : > { %v5951_v44 = vpack.i.bf16 %v4584_v35, %v4582_v12  ;;  %v4520_v52 = vsel %vm960_vm2, %v4472_v49, 0.0  ;;  %v4403_v5 = vsel %vm1813_vm7, 0.0, %v4317_v61  ;;  %v4973_v48 = vpack.c.b16 %v4948_v45, %v4947_v1 }
 0x35b   : > { %v5956_v14 = vpack.i.bf16 %v4520_v52, %v4470_v60  ;;  %v3102_v28 = vmax.f32 %v8538_v58, %v8646_v24  ;;  %v3103_v43 = vmax.f32 %v8564_v6, %v8652_v36  ;;  %v3104_v47 = vmax.f32 %v2976_v4, %v3040_v40 }
 0x35c   : > { %5952 = vrot.lane.b32.xlu0 %v5951_v44, %s6016_s15  ;;  %v8922_v57 = vsel %vm145_vm0, %v4403_v5, %v5904_v8  ;;  %5604 = vmatmul.msk.bf16.gmra.mxu3 %vm2418_vm10, %v4973_v48  ;;  %v4310_v53 = vrot.slane %v8373_v13, 5  ;;  %v4313_v21 = vrot.slane %v8392_v22, 5  ;;  %v4311_v51 = vrot.slane %v8398_v32, 5  ;;  %v5893_v16 = vpop.permute.xlu0 %5892  ;;  %v8935_v13 = vld [vmem:[#allocation2 + $0x208] sm:$0xff]  ;;  %v8937_v22 = vld [vmem:[#allocation2 + $0x210] sm:$0xff] }
 0x35d   : > { %5957 = vrot.lane.b32.xlu1 %v5956_v14, %s6017_s19  ;;  %5624 = vmatmul.msk.bf16.gmra.mxu0 %vm2418_vm10, %v4973_v48  ;;  %v3229_v58 = vmax.f32 %v3101_v29, %v8763_v55  ;;  %v3230_v6 = vmax.f32 %v3102_v28, %v8767_v2  ;;  %v3231_v34 = vmax.f32 %v3103_v43, %v8769_v20  ;;  %v5895_v32 = vunpack.i.h.bf16 %v5893_v16  ;;  %v5898_v42 = vpop.permute.xlu1 %5897 }
 0x35e   : > { %5644 = vmatmul.msk.bf16.gmra.mxu1 %vm2418_vm10, %v4973_v48  ;;  %v3232_v23 = vmax.f32 %v3104_v47, %v3168_v19  ;;  %v5894_v3 = vunpack.i.l.bf16 %v5893_v16  ;;  %v4312_v45 = vsel %vm1700_vm8, %v4310_v53, %v4311_v51  ;;  %v4314_v41 = vsel %vm1700_vm8, %v4311_v51, %v4313_v21 }
 0x35f   : > { %v3357_v31 = vmax.f32 %v3229_v58, %v8838_v26  ;;  %v3358_v15 = vmax.f32 %v3230_v6, %v8842_v11  ;;  %v3359_v17 = vmax.f32 %v3231_v34, %v8844_v46  ;;  %v8945_v1 = vsel %vm145_vm0, %v4319_v10, %v5905_v50 }
 0x360   : > { %v3360_v8 = vmax.f32 %v3232_v23, %v3296_v7  ;;  %v4824_v61 = vsel %vm145_vm0, %v4314_v41, %v5895_v32  ;;  %v5900_v12 = vunpack.i.h.bf16 %v5898_v42  ;;  %v4402_v4 = vsel %vm1813_vm7, 0.0, %v4312_v45 }
 0x361   : > { %v3485_v35 = vmax.f32 %v3357_v31, %v8933_v9  ;;  %v3486_v60 = vmax.f32 %v3358_v15, %v8935_v13  ;;  %v3487_v49 = vmax.f32 %v3359_v17, %v8937_v22  ;;  %v4823_v44 = vsel %vm145_vm0, %v4402_v4, %v5894_v3 }
 0x362   : > { %v3488_v40 = vmax.f32 %v3360_v8, %v3424_v39  ;;  %v5899_v52 = vunpack.i.l.bf16 %v5898_v42  ;;  %v3105_v50 = vmax.f32 %v8644_v27, %v8763_v55  ;;  %v4856_v48 = vsel %vm2263_vm9, %v4824_v61, %v5900_v12  ;;  %v2980_v42 = vld [vmem:[#allocation2 + $0x1b8] sm:$0x3] }
 0x363   : > { %v3609_v14 = vrot.slane %v3485_v35, 1  ;;  %v3610_v10 = vrot.slane %v3486_v60, 1  ;;  %v3612_v5 = vrot.slane %v3487_v49, 1  ;;  %v3761_v29 = vrot.slane %v3486_v60, 2  ;;  %v3044_v8 = vld [vmem:[#allocation2 + $0x1d8] sm:$0x3] }
 0x364   : > { %v3762_v28 = vrot.slane %v3487_v49, 2  ;;  %v3946_v43 = vrot.slane %v3487_v49, 3  ;;  %v3948_v47 = vrot.slane %v3488_v40, 3  ;;  %v3106_v51 = vmax.f32 %v8646_v24, %v8767_v2 }
 0x365   : > { %v3611_v19 = vsel %vm960_vm2, %v3609_v14, %v3610_v10  ;;  %v3613_v53 = vsel %vm960_vm2, %v3610_v10, %v3612_v5  ;;  %v3715_v21 = vmax.f32 %v3487_v49, %v3612_v5  ;;  %v3945_v34 = vrot.slane %v3486_v60, 3  ;;  %v3172_v5 = vld [vmem:[#allocation2 + $0x1f8] sm:$0x3] }
 0x366   : > { %v3713_v58 = vmax.f32 %v3485_v35, %v3611_v19  ;;  %v3714_v6 = vmax.f32 %v3486_v60, %v3613_v53  ;;  %v3763_v27 = vsel %vm1137_vm3, %v3761_v29, %v3762_v28  ;;  %v3949_v16 = vsel %vm1298_vm4, %v3946_v43, %v3948_v47 }
 0x367   : > { %v3859_v7 = vmax.f32 %v3715_v21, %v3762_v28  ;;  %v4122_v23 = vrot.slane %v3487_v49, 4  ;;  %v4124_v32 = vrot.slane %v3488_v40, 4  ;;  %v4855_v31 = vsel %vm2263_vm9, %v4823_v44, %v5899_v52 }
 0x368   : > { %v3857_v3 = vmax.f32 %v3713_v58, %v3761_v29  ;;  %v3858_v45 = vmax.f32 %v3714_v6, %v3763_v27  ;;  %v4888_v15 = vpack.c.bf16 %v4856_v48, %v4856_v48  ;;  %v3947_v17 = vsel %vm1298_vm4, %v3945_v34, %v3946_v43  ;;  %v3300_v6 = vld [vmem:[#allocation2 + $0x218] sm:$0x3] }
 0x369   : > { %v4051_v39 = vmax.f32 %v3859_v7, %v3949_v16  ;;  %v4121_v41 = vrot.slane %v3486_v60, 4  ;;  %v4887_v24 = vpack.c.bf16 %v4855_v31, %v4855_v31  ;;  %v4125_v35 = vsel %vm1475_vm5, %v4122_v23, %v4124_v32  ;;  %v8993_v32 = vld [vmem:[#allocation2 + $0x228] sm:$0xff] }
 0x36a   : > { %v4049_v61 = vmax.f32 %v3857_v3, %v3945_v34  ;;  %v4050_v12 = vmax.f32 %v3858_v45, %v3947_v17  ;;  %v4950_v4 = vunpack.c.l.b16 %v4888_v15  ;;  %v3107_v44 = vmax.f32 %v8652_v36, %v8769_v20  ;;  %v8986_v34 = vld [vmem:[#allocation2 + $0x220] sm:$0xff]  ;;  %v8995_v3 = vld [vmem:[#allocation2 + $0x230] sm:$0xff]  ;;  %v3428_v45 = vld [vmem:[#allocation2 + $0x238] sm:$0x3] }
 0x36b   : > { %v4123_v49 = vsel %vm1475_vm5, %v4121_v41, %v4122_v23  ;;  %v8966_v40 = vmax.f32 %v4051_v39, %v4125_v35  ;;  %v4949_v14 = vunpack.c.l.b16 %v4887_v24  ;;  %v3108_v60 = vmax.f32 %v2980_v42, %v3044_v8  ;;  %v3048_v24 = vld [vmem:[#allocation2 + $0x1f8] sm:$0x3] }
 0x36c   : > { %v8970_v52 = vmax.f32 %v4049_v61, %v4121_v41  ;;  %v8972_v10 = vmax.f32 %v4050_v12, %v4123_v49  ;;  %v3233_v48 = vmax.f32 %v3105_v50, %v8838_v26  ;;  %v3234_v47 = vmax.f32 %v3106_v51, %v8842_v11  ;;  %v2984_v41 = vld [vmem:[#allocation2 + $0x1d8] sm:$0x3] }
 0x36d   : > { %v4588_v29 = vrot.slane %v8966_v40, 6  ;;  %v4476_v28 = vrot.slane %v8966_v40, 7  ;;  %v4974_v43 = vpack.c.b16 %v4950_v4, %v4949_v14  ;;  %v3235_v50 = vmax.f32 %v3107_v44, %v8844_v46 }
 0x36e   : > { %v4585_v19 = vrot.slane %v8970_v52, 6  ;;  %v4586_v53 = vrot.slane %v8972_v10, 6  ;;  %v4473_v36 = vrot.slane %v8970_v52, 7  ;;  %v4474_v21 = vrot.slane %v8972_v10, 7 }
 0x36f   : > { %5605 = vmatmul.msk.bf16.gmra.mxu3 %vm2418_vm10, %v4974_v43  ;;  %5625 = vmatmul.msk.bf16.gmra.mxu0 %vm2418_vm10, %v4974_v43  ;;  %v3236_v58 = vmax.f32 %v3108_v60, %v3172_v5  ;;  %v3361_v27 = vmax.f32 %v3233_v48, %v8933_v9  ;;  %v3362_v17 = vmax.f32 %v3234_v47, %v8935_v13 }
 0x370   : > { %v4587_v51 = vsel %vm1942_vm6, %v4585_v19, %v4586_v53  ;;  %v4589_v7 = vsel %vm1942_vm6, %v4586_v53, %v4588_v29  ;;  %v4475_v16 = vsel %vm1813_vm7, %v4473_v36, %v4474_v21  ;;  %v4477_v23 = vsel %vm1813_vm7, %v4474_v21, %v4476_v28  ;;  %5645 = vmatmul.msk.bf16.gmra.mxu1 %vm2418_vm10, %v4974_v43 }
 0x371   : > { %v5961_v31 = vpack.i.bf16 %v4589_v7, %v4587_v51  ;;  %v4521_v15 = vsel %vm960_vm2, %v4477_v23, 0.0  ;;  %v3363_v39 = vmax.f32 %v3235_v50, %v8937_v22  ;;  %v3364_v8 = vmax.f32 %v3236_v58, %v3300_v6  ;;  %v3176_v58 = vld [vmem:[#allocation2 + $0x218] sm:$0x3] }
 0x372   : > { %v5966_v42 = vpack.i.bf16 %v4521_v15, %v4475_v16  ;;  %v3489_v61 = vmax.f32 %v3361_v27, %v8986_v34  ;;  %v3109_v12 = vmax.f32 %v8763_v55, %v8838_v26  ;;  %v3490_v35 = vmax.f32 %v3362_v17, %v8993_v32 }
 0x373   : > { %5962 = vrot.lane.b32.xlu2 %v5961_v31, %s6016_s15  ;;  %v3491_v4 = vmax.f32 %v3363_v39, %v8995_v3  ;;  %v3110_v49 = vmax.f32 %v8767_v2, %v8842_v11  ;;  %v3111_v14 = vmax.f32 %v8769_v20, %v8844_v46  ;;  %v3492_v44 = vmax.f32 %v3364_v8, %v3428_v45  ;;  %v9021_v8 = vpop.permute.xlu0 %5907 }
 0x374   : > { %5967 = vrot.lane.b32.xlu0 %v5966_v42, %s6017_s19  ;;  %v3614_v60 = vrot.slane %v3489_v61, 1  ;;  %v3112_v5 = vmax.f32 %v2984_v41, %v3048_v24  ;;  %v3237_v48 = vmax.f32 %v3109_v12, %v8933_v9  ;;  %v3615_v55 = vrot.slane %v3490_v35, 1  ;;  %v3304_v24 = vld [vmem:[#allocation2 + $0x238] sm:$0x3]  ;;  %v9019_v42 = vld [vmem:[#allocation2 + $0x240] sm:$0xff] }
 0x375   : > { %v3617_v29 = vrot.slane %v3491_v4, 1  ;;  %v3764_v28 = vrot.slane %v3490_v35, 2  ;;  %v3765_v43 = vrot.slane %v3491_v4, 2  ;;  %v3950_v47 = vrot.slane %v3490_v35, 3 }
 0x376   : > { %v3951_v19 = vrot.slane %v3491_v4, 3  ;;  %v3953_v53 = vrot.slane %v3492_v44, 3  ;;  %v4126_v36 = vrot.slane %v3490_v35, 4  ;;  %v3616_v2 = vsel %vm960_vm2, %v3614_v60, %v3615_v55 }
 0x377   : > { %v3618_v21 = vsel %vm960_vm2, %v3615_v55, %v3617_v29  ;;  %v3718_v20 = vmax.f32 %v3491_v4, %v3617_v29  ;;  %v3766_v50 = vsel %vm1137_vm3, %v3764_v28, %v3765_v43  ;;  %v3716_v6 = vmax.f32 %v3489_v61, %v3616_v2  ;;  %v3432_v29 = vld [vmem:[#allocation2 + $0x258] sm:$0x3] }
 0x378   : > { %v3717_v27 = vmax.f32 %v3490_v35, %v3618_v21  ;;  %v3952_v51 = vsel %vm1298_vm4, %v3950_v47, %v3951_v19  ;;  %v3954_v7 = vsel %vm1298_vm4, %v3951_v19, %v3953_v53  ;;  %v4127_v23 = vrot.slane %v3491_v4, 4 }
 0x379   : > { %v3862_v16 = vmax.f32 %v3718_v20, %v3765_v43  ;;  %v4129_v45 = vrot.slane %v3492_v44, 4  ;;  %v3238_v31 = vmax.f32 %v3110_v49, %v8935_v13  ;;  %v3860_v15 = vmax.f32 %v3716_v6, %v3764_v28  ;;  %v9026_v44 = vld [vmem:[#allocation2 + $0x248] sm:$0xff]  ;;  %v9028_v49 = vld [vmem:[#allocation2 + $0x250] sm:$0xff] }
 0x37a   : > { %v3861_v17 = vmax.f32 %v3717_v27, %v3766_v50  ;;  %v3239_v39 = vmax.f32 %v3111_v14, %v8937_v22  ;;  %v3240_v41 = vmax.f32 %v3112_v5, %v3176_v58  ;;  %v4128_v12 = vsel %vm1475_vm5, %v4126_v36, %v4127_v23 }
 0x37b   : > { %v4054_v61 = vmax.f32 %v3862_v16, %v3954_v7  ;;  %v4130_v35 = vsel %vm1475_vm5, %v4127_v23, %v4129_v45  ;;  %v3365_v4 = vmax.f32 %v3237_v48, %v8986_v34  ;;  %v4052_v60 = vmax.f32 %v3860_v15, %v3950_v47 }
 0x37c   : > { %v4053_v55 = vmax.f32 %v3861_v17, %v3952_v51  ;;  %v3366_v14 = vmax.f32 %v3238_v31, %v8993_v32  ;;  %v3367_v5 = vmax.f32 %v3239_v39, %v8995_v3  ;;  %v3368_v43 = vmax.f32 %v3240_v41, %v3304_v24 }
 0x37d   : > { %v9032_v28 = vmax.f32 %v4054_v61, %v4130_v35  ;;  %v3493_v19 = vmax.f32 %v3365_v4, %v9019_v42  ;;  %v5910_v53 = vunpack.i.h.bf16 %v9021_v8  ;;  %v9036_v2 = vmax.f32 %v4052_v60, %v4126_v36 }
 0x37e   : > { %v9038_v48 = vmax.f32 %v4053_v55, %v4128_v12  ;;  %v3494_v21 = vmax.f32 %v3366_v14, %v9026_v44  ;;  %v3495_v47 = vmax.f32 %v3367_v5, %v9028_v49  ;;  %v3496_v58 = vmax.f32 %v3368_v43, %v3432_v29 }
 0x37f   : > { %v4593_v20 = vrot.slane %v9032_v28, 6  ;;  %v4481_v50 = vrot.slane %v9032_v28, 7  ;;  %v3619_v6 = vrot.slane %v3493_v19, 1  ;;  %v4590_v27 = vrot.slane %v9036_v2, 6 }
 0x380   : > { %v4591_v51 = vrot.slane %v9038_v48, 6  ;;  %v4478_v7 = vrot.slane %v9036_v2, 7  ;;  %v4479_v36 = vrot.slane %v9038_v48, 7  ;;  %v3620_v16 = vrot.slane %v3494_v21, 1 }
 0x381   : > { %v3622_v23 = vrot.slane %v3495_v47, 1  ;;  %v3767_v45 = vrot.slane %v3494_v21, 2  ;;  %v3768_v31 = vrot.slane %v3495_v47, 2  ;;  %v3955_v29 = vrot.slane %v3494_v21, 3 }
 0x382   : > { %v4592_v15 = vsel %vm1942_vm6, %v4590_v27, %v4591_v51  ;;  %v4594_v17 = vsel %vm1942_vm6, %v4591_v51, %v4593_v20  ;;  %v4480_v39 = vsel %vm1813_vm7, %v4478_v7, %v4479_v36  ;;  %v4482_v41 = vsel %vm1813_vm7, %v4479_v36, %v4481_v50 }
 0x383   : > { %v5971_v24 = vpack.i.bf16 %v4594_v17, %v4592_v15  ;;  %v4522_v61 = vsel %vm960_vm2, %v4482_v41, 0.0  ;;  %v3621_v12 = vsel %vm960_vm2, %v3619_v6, %v3620_v16  ;;  %v3623_v35 = vsel %vm960_vm2, %v3620_v16, %v3622_v23 }
 0x384   : > { %v5976_v4 = vpack.i.bf16 %v4522_v61, %v4480_v39  ;;  %v3719_v60 = vmax.f32 %v3493_v19, %v3621_v12  ;;  %v3720_v55 = vmax.f32 %v3494_v21, %v3623_v35  ;;  %v3721_v14 = vmax.f32 %v3495_v47, %v3622_v23  ;;  %v9060_v23 = vpop.f32.mrf.mxu0 }
 0x385   : > { %5972 = vrot.lane.b32.xlu1 %v5971_v24, %s6016_s15  ;;  %v3769_v5 = vsel %vm1137_vm3, %v3767_v45, %v3768_v31  ;;  %v3956_v43 = vrot.slane %v3495_v47, 3  ;;  %v3958_v20 = vrot.slane %v3496_v58, 3  ;;  %v4131_v7 = vrot.slane %v3494_v21, 4 }
 0x386   : > { %5977 = vrot.lane.b32.xlu2 %v5976_v4, %s6017_s19  ;;  %v3863_v50 = vmax.f32 %v3719_v60, %v3767_v45  ;;  %v3864_v27 = vmax.f32 %v3720_v55, %v3769_v5  ;;  %v3865_v51 = vmax.f32 %v3721_v14, %v3768_v31  ;;  %v4132_v19 = vrot.slane %v3495_v47, 4  ;;  %v2988_v4 = vld [vmem:[#allocation2 + $0x1f8] sm:$0x3] }
 0x387   : > { %v3957_v6 = vsel %vm1298_vm4, %v3955_v29, %v3956_v43  ;;  %v3959_v36 = vsel %vm1298_vm4, %v3956_v43, %v3958_v20  ;;  %v4134_v16 = vrot.slane %v3496_v58, 4  ;;  %v5909_v41 = vunpack.i.l.bf16 %v9021_v8  ;;  %v3052_v60 = vld [vmem:[#allocation2 + $0x218] sm:$0x3] }
 0x388   : > { %v4055_v15 = vmax.f32 %v3863_v50, %v3955_v29  ;;  %v4056_v17 = vmax.f32 %v3864_v27, %v3957_v6  ;;  %v4057_v39 = vmax.f32 %v3865_v51, %v3959_v36  ;;  %v4133_v24 = vsel %vm1475_vm5, %v4131_v7, %v4132_v19  ;;  %v3180_v20 = vld [vmem:[#allocation2 + $0x238] sm:$0x3]  ;;  %v3433_v36 = vld [vmem:[#allocation2 + $0x260] sm:$0xff] }
 0x389   : > { %v4135_v45 = vsel %vm1475_vm5, %v4132_v19, %v4134_v16  ;;  %v4858_v21 = vsel %vm2263_vm9, %v8945_v1, %v5910_v53  ;;  %v3113_v31 = vmax.f32 %v8838_v26, %v8933_v9  ;;  %v4857_v12 = vsel %vm2263_vm9, %v8922_v57, %v5909_v41  ;;  %v3308_v6 = vld [vmem:[#allocation2 + $0x258] sm:$0x3]  ;;  %v9095_v16 = vpop.permute.xlu2 %5917  ;;  %v3434_v41 = vld [vmem:[#allocation2 + $0x268] sm:$0xff] }
 0x38a   : > { %v9069_v61 = vmax.f32 %v4055_v15, %v4131_v7  ;;  %v9071_v47 = vmax.f32 %v4056_v17, %v4133_v24  ;;  %v9073_v58 = vmax.f32 %v4057_v39, %v4135_v45  ;;  %v4889_v8 = vpack.c.bf16 %v4857_v12, %v4857_v12 }
 0x38b   : > { %v4890_v35 = vpack.c.bf16 %v4858_v21, %v4858_v21  ;;  %v3114_v55 = vmax.f32 %v8842_v11, %v8935_v13  ;;  %v3115_v1 = vmax.f32 %v8844_v46, %v8937_v22  ;;  %v3116_v46 = vmax.f32 %v2988_v4, %v3052_v60  ;;  %v3436_v21 = vld [vmem:[#allocation2 + $0x278] sm:$0x3]  ;;  %v5913_v4 = vpop.permute.xlu1 %5912 }
 0x38c   : > { %v4595_v26 = vrot.slane %v9069_v61, 6  ;;  %v4596_v9 = vrot.slane %v9071_v47, 6  ;;  %v4598_v53 = vrot.slane %v9073_v58, 6  ;;  %v4483_v14 = vrot.slane %v9069_v61, 7  ;;  %v9093_v19 = vpop.f32.mrf.mxu0 }
 0x38d   : > { %v4951_v5 = vunpack.c.l.b16 %v4889_v8  ;;  %v4952_v57 = vunpack.c.l.b16 %v4890_v35  ;;  %v4484_v29 = vrot.slane %v9071_v47, 7  ;;  %v4486_v43 = vrot.slane %v9073_v58, 7 }
 0x38e   : > { %v4597_v11 = vsel %vm1942_vm6, %v4595_v26, %v4596_v9  ;;  %v4599_v13 = vsel %vm1942_vm6, %v4596_v9, %v4598_v53  ;;  %v3241_v22 = vmax.f32 %v3113_v31, %v8986_v34  ;;  %v3242_v7 = vmax.f32 %v3114_v55, %v8993_v32  ;;  %v3435_v32 = vld [vmem:[#allocation2 + $0x270] sm:$0xff]  ;;  %v9527_v55 = vld [vmem:[#allocation19_spill] sm:$0xff] }
 0x38f   : > { %v5981_v50 = vpack.i.bf16 %v4599_v13, %v4597_v11  ;;  %v4485_v27 = vsel %vm1813_vm7, %v4483_v14, %v4484_v29  ;;  %v4487_v51 = vsel %vm1813_vm7, %v4484_v29, %v4486_v43  ;;  %v3243_v17 = vmax.f32 %v3115_v1, %v8995_v3 }
 0x390   : > { %v4523_v15 = vsel %vm960_vm2, %v4487_v51, 0.0  ;;  %v3244_v39 = vmax.f32 %v3116_v46, %v3180_v20  ;;  %v3369_v34 = vmax.f32 %v3241_v22, %v9019_v42  ;;  %v3370_v45 = vmax.f32 %v3242_v7, %v9026_v44 }
 0x391   : > { %5982 = vrot.lane.b32.xlu0 %v5981_v50, %s6016_s15  ;;  %v5986_v24 = vpack.i.bf16 %v4523_v15, %v4485_v27  ;;  %v4975_v31 = vpack.c.b16 %v4952_v57, %v4951_v5  ;;  %v3371_v12 = vmax.f32 %v3243_v17, %v9028_v49  ;;  %v5920_v60 = vunpack.i.h.bf16 %v9095_v16  ;;  %v9528_v49 = vld [vmem:[#allocation6_spill] sm:$0xff]  ;;  %v9529_v5 = vld [vmem:[#allocation20_spill] sm:$0xff] }
 0x392   : > { %v3372_v8 = vmax.f32 %v3244_v39, %v3308_v6  ;;  %v3497_v35 = vmax.f32 %v3369_v34, %v3433_v36  ;;  %v5919_v3 = vunpack.i.l.bf16 %v9095_v16  ;;  %v3498_v42 = vmax.f32 %v3370_v45, %v3434_v41 }
 0x393   : > { %5987 = vrot.lane.b32.xlu1 %v5986_v24, %s6017_s19  ;;  %5606 = vmatmul.msk.bf16.gmra.mxu3 %vm2418_vm10, %v4975_v31  ;;  %v4320_v1 = vrot.slane %v9527_v55, 5  ;;  %v3499_v44 = vmax.f32 %v3371_v12, %v3435_v32  ;;  %v4321_v53 = vrot.slane %v9528_v49, 5  ;;  %v4323_v57 = vrot.slane %v9529_v5, 5 }
 0x394   : > { %v3500_v26 = vmax.f32 %v3372_v8, %v3436_v21  ;;  %v3624_v9 = vrot.slane %v3497_v35, 1  ;;  %5626 = vmatmul.msk.bf16.gmra.mxu0 %vm2418_vm10, %v4975_v31  ;;  %5646 = vmatmul.msk.bf16.gmra.mxu1 %vm2418_vm10, %v4975_v31  ;;  %v3625_v14 = vrot.slane %v3498_v42, 1  ;;  %v5915_v29 = vunpack.i.h.bf16 %v5913_v4  ;;  %v9116_v41 = vpop.f32.mrf.mxu0 }
 0x395   : > { %v5914_v43 = vunpack.i.l.bf16 %v5913_v4  ;;  %v3627_v20 = vrot.slane %v3499_v44, 1  ;;  %v3770_v11 = vrot.slane %v3498_v42, 2  ;;  %v3771_v13 = vrot.slane %v3499_v44, 2 }
 0x396   : > { %v3961_v46 = vrot.slane %v3499_v44, 3  ;;  %v3626_v22 = vsel %vm960_vm2, %v3624_v9, %v3625_v14  ;;  %v3960_v50 = vrot.slane %v3498_v42, 3  ;;  %v3963_v27 = vrot.slane %v3500_v26, 3 }
 0x397   : > { %v4136_v51 = vrot.slane %v3498_v42, 4  ;;  %v3628_v7 = vsel %vm960_vm2, %v3625_v14, %v3627_v20  ;;  %v3722_v6 = vmax.f32 %v3497_v35, %v3626_v22  ;;  %v3724_v36 = vmax.f32 %v3499_v44, %v3627_v20 }
 0x398   : > { %v4322_v16 = vsel %vm1700_vm8, %v4320_v1, %v4321_v53  ;;  %v3723_v15 = vmax.f32 %v3498_v42, %v3628_v7  ;;  %v3772_v17 = vsel %vm1137_vm3, %v3770_v11, %v3771_v13  ;;  %v4137_v39 = vrot.slane %v3499_v44, 4 }
 0x399   : > { %v4139_v34 = vrot.slane %v3500_v26, 4  ;;  %v3866_v24 = vmax.f32 %v3722_v6, %v3770_v11  ;;  %v3868_v45 = vmax.f32 %v3724_v36, %v3771_v13  ;;  %v3962_v32 = vsel %vm1298_vm4, %v3960_v50, %v3961_v46  ;;  %v5060_v4 = vpop.f32.mrf.mxu3  ;;  %v5928_v6 = vpop.permute.xlu1 %5927 }
 0x39a   : > { %v4324_v21 = vsel %vm1700_vm8, %v4321_v53, %v4323_v57  ;;  %v3867_v31 = vmax.f32 %v3723_v15, %v3772_v17  ;;  %v3964_v12 = vsel %vm1298_vm4, %v3961_v46, %v3963_v27  ;;  %v4404_v8 = vsel %vm1813_vm7, 0.0, %v4322_v16  ;;  %v5923_v27 = vpop.permute.xlu0 %5922 }
 0x39b   : > { %v4828_v35 = vsel %vm145_vm0, %v4324_v21, %v5915_v29  ;;  %v4058_v42 = vmax.f32 %v3866_v24, %v3960_v50  ;;  %v4060_v55 = vmax.f32 %v3868_v45, %v3964_v12  ;;  %v4827_v1 = vsel %vm145_vm0, %v4404_v8, %v5914_v43 }
 0x39c   : > { %v4860_v44 = vsel %vm2263_vm9, %v4828_v35, %v5920_v60  ;;  %v4059_v26 = vmax.f32 %v3867_v31, %v3962_v32  ;;  %v4140_v9 = vsel %vm1475_vm5, %v4137_v39, %v4139_v34  ;;  %v4859_v49 = vsel %vm2263_vm9, %v4827_v1, %v5919_v3 }
 0x39d   : > { %v4892_v53 = vpack.c.bf16 %v4860_v44, %v4860_v44  ;;  %v4138_v14 = vsel %vm1475_vm5, %v4136_v51, %v4137_v39  ;;  %v9128_v5 = vmax.f32 %v4058_v42, %v4136_v51  ;;  %v9130_v57 = vmax.f32 %v4060_v55, %v4140_v9  ;;  %v9146_v39 = vpop.f32.mrf.mxu0 }
 0x39e   : > { %v4891_v29 = vpack.c.bf16 %v4859_v49, %v4859_v49  ;;  %v9132_v20 = vmax.f32 %v4059_v26, %v4138_v14  ;;  %v4325_v51 = vrot.slane %v8600_v33, 5  ;;  %v4328_v7 = vrot.slane %v8603_v25, 5 }
 0x39f   : > { %v4600_v11 = vrot.slane %v9128_v5, 6  ;;  %v4603_v43 = vrot.slane %v9130_v57, 6  ;;  %v4491_v60 = vrot.slane %v9130_v57, 7  ;;  %v4954_v13 = vunpack.c.l.b16 %v4892_v53  ;;  %v5369_v53 = vld [vmem:[%s6278_s18] sm:$0xff] }
 0x3a0   : > { %v4601_v46 = vrot.slane %v9132_v20, 6  ;;  %v4488_v3 = vrot.slane %v9128_v5, 7  ;;  %v4489_v22 = vrot.slane %v9132_v20, 7  ;;  %v4953_v50 = vunpack.c.l.b16 %v4891_v29 }
 0x3a1   : > { %v5925_v32 = vunpack.i.h.bf16 %v5923_v27  ;;  %v5924_v33 = vunpack.i.l.bf16 %v5923_v27  ;;  %v4326_v25 = vrot.slane %v8606_v18, 5  ;;  %v5930_v31 = vunpack.i.h.bf16 %v5928_v6  ;;  %v5062_v12 = vpop.f32.mrf.mxu3  ;;  %v5933_v27 = vpop.permute.xlu2 %5932 }
 0x3a2   : > { %v4602_v36 = vsel %vm1942_vm6, %v4600_v11, %v4601_v46  ;;  %v4604_v16 = vsel %vm1942_vm6, %v4601_v46, %v4603_v43  ;;  %v4490_v15 = vsel %vm1813_vm7, %v4488_v3, %v4489_v22  ;;  %v4492_v17 = vsel %vm1813_vm7, %v4489_v22, %v4491_v60 }
 0x3a3   : > { %v5991_v34 = vpack.i.bf16 %v4604_v16, %v4602_v36  ;;  %v4524_v24 = vsel %vm960_vm2, %v4492_v17, 0.0  ;;  %v4976_v45 = vpack.c.b16 %v4954_v13, %v4953_v50  ;;  %v5929_v8 = vunpack.i.l.bf16 %v5928_v6  ;;  %v5370_v36 = vld [vmem:[%s6278_s18 + $0x8] sm:$0xff] }
 0x3a4   : > { %v5996_v21 = vpack.i.bf16 %v4524_v24, %v4490_v15  ;;  %v5158_v35 = vadd.f32 %v9060_v23, %v5060_v4  ;;  %v4327_v55 = vsel %vm1700_vm8, %v4325_v51, %v4326_v25  ;;  %v4329_v18 = vsel %vm1700_vm8, %v4326_v25, %v4328_v7 }
 0x3a5   : > { %5992 = vrot.lane.b32.xlu2 %v5991_v34, %s6016_s15  ;;  %5607 = vmatmul.msk.bf16.gmra.mxu3 %vm2418_vm10, %v4976_v45  ;;  %v4405_v1 = vsel %vm1813_vm7, 0.0, %v4327_v55  ;;  %v4830_v44 = vsel %vm145_vm0, %v4329_v18, %v5925_v32  ;;  %v4331_v11 = vrot.slane %v8731_v59, 5  ;;  %v5160_v43 = vadd.f32 %v9093_v19, %v5062_v12 }
 0x3a6   : > { %5997 = vrot.lane.b32.xlu0 %v5996_v21, %s6017_s19  ;;  %5627 = vmatmul.msk.bf16.gmra.mxu0 %vm2418_vm10, %v4976_v45  ;;  %v4829_v9 = vsel %vm145_vm0, %v4405_v1, %v5924_v33  ;;  %v4862_v23 = vsel %vm2263_vm9, %v4830_v44, %v5930_v31  ;;  %v9166_v60 = vpop.f32.mrf.mxu0  ;;  %v4345_v22 = vrot.slane %v8970_v52, 5  ;;  %v4346_v50 = vrot.slane %v8972_v10, 5  ;;  %v5938_v59 = vpop.permute.xlu0 %5937 }
 0x3a7   : > { %v5257_v42 = vpop.f32.mrf.mxu1  ;;  %5647 = vmatmul.msk.bf16.gmra.mxu1 %vm2418_vm10, %v4976_v45  ;;  %v4861_v4 = vsel %vm2263_vm9, %v4829_v9, %v5929_v8  ;;  %v4894_v49 = vpack.c.bf16 %v4862_v23, %v4862_v23  ;;  %v4330_v6 = vrot.slane %v8718_v63, 5  ;;  %v4333_v16 = vrot.slane %v8738_v54, 5 }
 0x3a8   : > { %v5337_v26 = vadd.f32 %v5257_v42, %v5158_v35  ;;  %v4893_v14 = vpack.c.bf16 %v4861_v4, %v4861_v4  ;;  %v9177_v19 = vsel %vm1700_vm8, %v4345_v22, %v4346_v50  ;;  %v5935_v17 = vunpack.i.h.bf16 %v5933_v27 }
 0x3a9   : > { %v4956_v46 = vunpack.c.l.b16 %v4894_v49  ;;  %v5934_v52 = vunpack.i.l.bf16 %v5933_v27  ;;  %v4332_v34 = vsel %vm1700_vm8, %v4330_v6, %v4331_v11  ;;  %v5940_v45 = vunpack.i.h.bf16 %v5938_v59  ;;  %v5372_v6 = vld [vmem:[%s6278_s18 + $0x18] sm:$0xff] }
 0x3aa   : > { %v5401_v29 = vadd.f32 %v5369_v53, %v5337_v26  ;;  %v4955_v13 = vunpack.c.l.b16 %v4893_v14  ;;  %v5939_v32 = vunpack.i.l.bf16 %v5938_v59  ;;  %v4334_v63 = vsel %vm1700_vm8, %v4331_v11, %v4333_v16  ;;  %v5371_v26 = vld [vmem:[%s6278_s18 + $0x10] sm:$0xff]  ;;  %v5948_v11 = vpop.permute.xlu2 %5947 }
 0x3ab   : > { %v4406_v21 = vsel %vm1813_vm7, 0.0, %v4332_v34  ;;  %v4832_v25 = vsel %vm145_vm0, %v4334_v63, %v5935_v17  ;;  %v4336_v44 = vrot.slane %v8815_v56, 5  ;;  %v4335_v4 = vrot.slane %v8810_v30, 5 }
 0x3ac   : > { %5433 = vst.msk [vmem:[%s6278_s18] sm:$0xff] %vm145_vm0, %v5401_v29  ;;  %v5065_v51 = vpop.f32.mrf.mxu3  ;;  %v4977_v24 = vpack.c.b16 %v4956_v46, %v4955_v13  ;;  %v4831_v33 = vsel %vm145_vm0, %v4406_v21, %v5934_v52  ;;  %v4864_v31 = vsel %vm2263_vm9, %v4832_v25, %v5940_v45  ;;  %v5950_v16 = vunpack.i.h.bf16 %v5948_v11 }
 0x3ad   : > { %v4863_v54 = vsel %vm2263_vm9, %v4831_v33, %v5939_v32  ;;  %v5163_v8 = vadd.f32 %v9116_v41, %v5065_v51  ;;  %v4896_v18 = vpack.c.bf16 %v4864_v31, %v4864_v31  ;;  %v4337_v14 = vsel %vm1700_vm8, %v4335_v4, %v4336_v44 }
 0x3ae   : > { %v9191_v12 = vpop.f32.mrf.mxu0  ;;  %v4895_v55 = vpack.c.bf16 %v4863_v54, %v4863_v54  ;;  %v4338_v41 = vrot.slane %v8812_v62, 5  ;;  %v4407_v30 = vsel %vm1813_vm7, 0.0, %v4337_v14  ;;  %v5949_v62 = vunpack.i.l.bf16 %v5948_v11 }
 0x3af   : > { %v5259_v3 = vpop.f32.mrf.mxu1  ;;  %v4958_v53 = vunpack.c.l.b16 %v4896_v18  ;;  %v4360_v52 = vrot.slane %v9128_v5, 5  ;;  %v4361_v34 = vrot.slane %v9132_v20, 5  ;;  %v4341_v5 = vrot.slane %v8889_v37, 5 }
 0x3b0   : > { %v5338_v7 = vadd.f32 %v5259_v3, %v5160_v43  ;;  %v4957_v49 = vunpack.c.l.b16 %v4895_v55  ;;  %v4339_v27 = vsel %vm1700_vm8, %v4336_v44, %v4338_v41  ;;  %v4343_v55 = vrot.slane %v8881_v0, 5  ;;  %v5374_v41 = vld [vmem:[%s6278_s18 + $0x28] sm:$0xff] }
 0x3b1   : > { %v9222_v33 = vsel %vm1700_vm8, %v4360_v52, %v4361_v34 }
 0x3b2   : > { %v5402_v15 = vadd.f32 %v5370_v36, %v5338_v7  ;;  %v4978_v3 = vpack.c.b16 %v4958_v53, %v4957_v49  ;;  %v4344_v49 = vsel %vm1700_vm8, %v4341_v5, %v4343_v55 }
 0x3b4   : > { %5434 = vst.msk [vmem:[%s6278_s18 + $0x8] sm:$0xff] %vm145_vm0, %v5402_v15  ;;  %v5067_v35 = vpop.f32.mrf.mxu3 }
 0x3b5   : > { %5608 = vmatmul.msk.bf16.gmra.mxu3 %vm2418_vm10, %v4977_v24  ;;  %v5165_v13 = vadd.f32 %v9146_v39, %v5067_v35 }
 0x3b6   : > { %5628 = vmatmul.msk.bf16.gmra.mxu0 %vm2418_vm10, %v4977_v24 }
 0x3b7   : > { %5648 = vmatmul.msk.bf16.gmra.mxu1 %vm2418_vm10, %v4977_v24  ;;  %v4363_v24 = vrot.slane %v9130_v57, 5 }
 0x3b8   : > { %v9203_v56 = vpop.f32.mrf.mxu0 }
 0x3b9   : > { %v5262_v42 = vpop.f32.mrf.mxu1  ;;  %v9225_v25 = vsel %vm1700_vm8, %v4361_v34, %v4363_v24  ;;  %v5375_v24 = vld [vmem:[%s6278_s18 + $0x30] sm:$0xff] }
 0x3ba   : > { %v5339_v1 = vadd.f32 %v5262_v42, %v5163_v8  ;;  %v5943_v9 = vpop.permute.xlu1 %5942  ;;  %v4340_v42 = vrot.slane %v8887_v38, 5 }
 0x3bb   : > { %v5944_v29 = vunpack.i.l.bf16 %v5943_v9  ;;  %v5945_v43 = vunpack.i.h.bf16 %v5943_v9 }
 0x3bc   : > { %v5403_v23 = vadd.f32 %v5371_v26, %v5339_v1  ;;  %v4342_v18 = vsel %vm1700_vm8, %v4340_v42, %v4341_v5 }
 0x3bd   : > { %v4833_v51 = vsel %vm145_vm0, %v4407_v30, %v5944_v29  ;;  %v4834_v59 = vsel %vm145_vm0, %v4339_v27, %v5945_v43  ;;  %v4408_v53 = vsel %vm1813_vm7, 0.0, %v4342_v18  ;;  %v5376_v18 = vld [vmem:[%s6278_s18 + $0x38] sm:$0xff] }
 0x3be   : > { %5435 = vst.msk [vmem:[%s6278_s18 + $0x10] sm:$0xff] %vm145_vm0, %v5403_v23  ;;  %v5070_v7 = vpop.f32.mrf.mxu3  ;;  %v4865_v39 = vsel %vm2263_vm9, %v4833_v51, %v5949_v62  ;;  %v4866_v15 = vsel %vm2263_vm9, %v4834_v59, %v5950_v16 }
 0x3bf   : > { %v5168_v17 = vadd.f32 %v9166_v60, %v5070_v7  ;;  %v4897_v45 = vpack.c.bf16 %v4865_v39, %v4865_v39  ;;  %v4898_v63 = vpack.c.bf16 %v4866_v15, %v4866_v15  ;;  %v5373_v60 = vld [vmem:[%s6278_s18 + $0x20] sm:$0xff] }
 0x3c0   : > { %v9227_v54 = vpop.f32.mrf.mxu0 }
 0x3c1   : > { %v5264_v46 = vpop.f32.mrf.mxu1  ;;  %v4959_v57 = vunpack.c.l.b16 %v4897_v45  ;;  %v4960_v35 = vunpack.c.l.b16 %v4898_v63 }
 0x3c2   : > { %v5340_v22 = vadd.f32 %v5264_v46, %v5165_v13 }
 0x3c3   : > { %v4979_v23 = vpack.c.b16 %v4960_v35, %v4959_v57 }
 0x3c4   : > { %v5404_v36 = vadd.f32 %v5372_v6, %v5340_v22  ;;  %v4348_v6 = vrot.slane %v8966_v40, 5  ;;  %v4409_v40 = vsel %vm1813_vm7, 0.0, %v9177_v19 }
 0x3c5   : > { %5609 = vmatmul.msk.bf16.gmra.mxu3 %vm2418_vm10, %v4978_v3 }
 0x3c6   : > { %5436 = vst.msk [vmem:[%s6278_s18 + $0x18] sm:$0xff] %vm145_vm0, %v5404_v36  ;;  %5629 = vmatmul.msk.bf16.gmra.mxu0 %vm2418_vm10, %v4978_v3  ;;  %v5072_v8 = vpop.f32.mrf.mxu3  ;;  %v4349_v52 = vsel %vm1700_vm8, %v4346_v50, %v4348_v6 }
 0x3c7   : > { %5649 = vmatmul.msk.bf16.gmra.mxu1 %vm2418_vm10, %v4978_v3  ;;  %v5170_v37 = vadd.f32 %v9191_v12, %v5072_v8 }
 0x3c8   : > { %v5177_v43 = vpop.f32.mrf.mxu0 }
 0x3c9   : > { %v5267_v32 = vpop.f32.mrf.mxu1 }
 0x3ca   : > { %v5341_v21 = vadd.f32 %v5267_v32, %v5168_v17 }
 0x3cc   : > { %v5405_v31 = vadd.f32 %v5373_v60, %v5341_v21 }
 0x3cd   : > { %v5963_v7 = vpop.permute.xlu2 %5962 }
 0x3ce   : > { %v5953_v20 = vpop.permute.xlu0 %5952  ;;  %5437 = vst.msk [vmem:[%s6278_s18 + $0x20] sm:$0xff] %vm145_vm0, %v5405_v31  ;;  %v5075_v30 = vpop.f32.mrf.mxu3  ;;  %v5965_v36 = vunpack.i.h.bf16 %v5963_v7  ;;  %v5964_v16 = vunpack.i.l.bf16 %v5963_v7 }
 0x3cf   : > { %v5955_v1 = vunpack.i.h.bf16 %v5953_v20  ;;  %v5954_v44 = vunpack.i.l.bf16 %v5953_v20  ;;  %v5958_v26 = vpop.permute.xlu1 %5957  ;;  %v5173_v59 = vadd.f32 %v9203_v56, %v5075_v30 }
 0x3d0   : > { %v5960_v38 = vunpack.i.h.bf16 %v5958_v26  ;;  %v5959_v14 = vunpack.i.l.bf16 %v5958_v26  ;;  %v9249_v51 = vpop.f32.mrf.mxu0  ;;  %v4838_v63 = vsel %vm145_vm0, %v4349_v52, %v5965_v36  ;;  %v4837_v10 = vsel %vm145_vm0, %v4409_v40, %v5964_v16  ;;  %v5378_v52 = vld [vmem:[%s6278_s18 + $0x48] sm:$0xff] }
 0x3d1   : > { %v5269_v9 = vpop.f32.mrf.mxu1  ;;  %v4836_v0 = vsel %vm145_vm0, %v4344_v49, %v5955_v1  ;;  %v4835_v29 = vsel %vm145_vm0, %v4408_v53, %v5954_v44  ;;  %v4351_v44 = vrot.slane %v9038_v48, 5 }
 0x3d2   : > { %v5342_v4 = vadd.f32 %v5269_v9, %v5170_v37  ;;  %v4867_v12 = vsel %vm2263_vm9, %v4835_v29, %v5959_v14  ;;  %v4868_v13 = vsel %vm2263_vm9, %v4836_v0, %v5960_v38  ;;  %v4350_v9 = vrot.slane %v9036_v2, 5  ;;  %v5377_v38 = vld [vmem:[%s6278_s18 + $0x40] sm:$0xff] }
 0x3d3   : > { %v4899_v46 = vpack.c.bf16 %v4867_v12, %v4867_v12  ;;  %v4900_v3 = vpack.c.bf16 %v4868_v13, %v4868_v13 }
 0x3d4   : > { %v5406_v11 = vadd.f32 %v5374_v41, %v5342_v4  ;;  %v4352_v53 = vsel %vm1700_vm8, %v4350_v9, %v4351_v44 }
 0x3d5   : > { %5610 = vmatmul.msk.bf16.gmra.mxu3 %vm2418_vm10, %v4979_v23  ;;  %v4961_v22 = vunpack.c.l.b16 %v4899_v46  ;;  %v4962_v27 = vunpack.c.l.b16 %v4900_v3 }
 0x3d6   : > { %5438 = vst.msk [vmem:[%s6278_s18 + $0x28] sm:$0xff] %vm145_vm0, %v5406_v11  ;;  %5630 = vmatmul.msk.bf16.gmra.mxu0 %vm2418_vm10, %v4979_v23  ;;  %v5077_v39 = vpop.f32.mrf.mxu3 }
 0x3d7   : > { %5650 = vmatmul.msk.bf16.gmra.mxu1 %vm2418_vm10, %v4979_v23  ;;  %v4980_v62 = vpack.c.b16 %v4962_v27, %v4961_v22  ;;  %v5175_v31 = vadd.f32 %v9227_v54, %v5077_v39  ;;  %v4353_v54 = vrot.slane %v9032_v28, 5  ;;  %v4355_v39 = vrot.slane %v9069_v61, 5 }
 0x3d9   : > { %v4354_v28 = vsel %vm1700_vm8, %v4351_v44, %v4353_v54  ;;  %v5379_v44 = vld [vmem:[%s6278_s18 + $0x50] sm:$0xff] }
 0x3da   : > { %v9266_v60 = vpop.f32.mrf.mxu0 }
 0x3db   : > { %v5272_v15 = vpop.f32.mrf.mxu1 }
 0x3dc   : > { %v5343_v17 = vadd.f32 %v5272_v15, %v5173_v59  ;;  %v4356_v59 = vrot.slane %v9071_v47, 5 }
 0x3de   : > { %v5407_v32 = vadd.f32 %v5375_v24, %v5343_v17 }
 0x3df   : > { %v5080_v55 = vpop.f32.mrf.mxu3 }
 0x3e0   : > { %5439 = vst.msk [vmem:[%s6278_s18 + $0x30] sm:$0xff] %vm145_vm0, %v5407_v32  ;;  %v5178_v26 = vadd.f32 %v5177_v43, %v5080_v55  ;;  %v5978_v49 = vpop.permute.xlu2 %5977  ;;  %v4410_v43 = vsel %vm1813_vm7, 0.0, %v4352_v53 }
 0x3e1   : > { %v5980_v29 = vunpack.i.h.bf16 %v5978_v49  ;;  %v5979_v11 = vunpack.i.l.bf16 %v5978_v49 }
 0x3e2   : > { %v9275_v37 = vpop.f32.mrf.mxu0 }
 0x3e3   : > { %v5274_v57 = vpop.f32.mrf.mxu1 }
 0x3e4   : > { %v5344_v35 = vadd.f32 %v5274_v57, %v5175_v31 }
 0x3e5   : > { %5611 = vmatmul.msk.bf16.gmra.mxu3 %vm2418_vm10, %v4980_v62 }
 0x3e6   : > { %v5968_v34 = vpop.permute.xlu0 %5967  ;;  %5631 = vmatmul.msk.bf16.gmra.mxu0 %vm2418_vm10, %v4980_v62  ;;  %v5408_v1 = vadd.f32 %v5376_v18, %v5344_v35 }
 0x3e7   : > { %v5970_v56 = vunpack.i.h.bf16 %v5968_v34  ;;  %v5969_v45 = vunpack.i.l.bf16 %v5968_v34  ;;  %5651 = vmatmul.msk.bf16.gmra.mxu1 %vm2418_vm10, %v4980_v62  ;;  %v5082_v2 = vpop.f32.mrf.mxu3  ;;  %v4358_v34 = vrot.slane %v9073_v58, 5 }
 0x3e8   : > { %5440 = vst.msk [vmem:[%s6278_s18 + $0x38] sm:$0xff] %vm145_vm0, %v5408_v1  ;;  %v5180_v62 = vadd.f32 %v9249_v51, %v5082_v2 }
 0x3e9   : > { %v4870_v50 = vsel %vm2263_vm9, %v4838_v63, %v5970_v56  ;;  %v4869_v21 = vsel %vm2263_vm9, %v4837_v10, %v5969_v45  ;;  %v4357_v56 = vsel %vm1700_vm8, %v4355_v39, %v4356_v59  ;;  %v4359_v61 = vsel %vm1700_vm8, %v4356_v59, %v4358_v34  ;;  %v5381_v59 = vld [vmem:[%s6278_s18 + $0x60] sm:$0xff] }
 0x3ea   : > { %v4902_v19 = vpack.c.bf16 %v4870_v50, %v4870_v50  ;;  %v4901_v5 = vpack.c.bf16 %v4869_v21, %v4869_v21  ;;  %v4411_v10 = vsel %vm1813_vm7, 0.0, %v4357_v56 }
 0x3ec   : > { %v4964_v20 = vunpack.c.l.b16 %v4902_v19  ;;  %v4963_v8 = vunpack.c.l.b16 %v4901_v5  ;;  %v9292_v27 = vpop.f32.mrf.mxu0 }
 0x3ed   : > { %v5277_v23 = vpop.f32.mrf.mxu1 }
 0x3ee   : > { %v4981_v42 = vpack.c.b16 %v4964_v20, %v4963_v8  ;;  %v5345_v4 = vadd.f32 %v5277_v23, %v5178_v26 }
 0x3f0   : > { %v5409_v48 = vadd.f32 %v5377_v38, %v5345_v4  ;;  %v4412_v38 = vsel %vm1813_vm7, 0.0, %v9222_v33 }
 0x3f2   : > { %5441 = vst.msk [vmem:[%s6278_s18 + $0x40] sm:$0xff] %vm145_vm0, %v5409_v48  ;;  %v5085_v17 = vpop.f32.mrf.mxu3 }
 0x3f4   : > { %v5189_v58 = vpop.f32.mrf.mxu0 }
 0x3f5   : > { %5612 = vmatmul.msk.bf16.gmra.mxu3 %vm2418_vm10, %v4981_v42  ;;  %v5279_v36 = vpop.f32.mrf.mxu1 }
 0x3f6   : > { %5632 = vmatmul.msk.bf16.gmra.mxu0 %vm2418_vm10, %v4981_v42  ;;  %v5346_v16 = vadd.f32 %v5279_v36, %v5180_v62 }
 0x3f7   : > { %v5973_v14 = vpop.permute.xlu1 %5972  ;;  %5652 = vmatmul.msk.bf16.gmra.mxu1 %vm2418_vm10, %v4981_v42  ;;  %v5183_v42 = vadd.f32 %v9266_v60, %v5085_v17 }
 0x3f8   : > { %v5975_v41 = vunpack.i.h.bf16 %v5973_v14  ;;  %v5974_v0 = vunpack.i.l.bf16 %v5973_v14  ;;  %v5410_v40 = vadd.f32 %v5378_v52, %v5346_v16 }
 0x3fa   : > { %v4840_v12 = vsel %vm145_vm0, %v4354_v28, %v5975_v41  ;;  %v4839_v13 = vsel %vm145_vm0, %v4410_v43, %v5974_v0  ;;  %5442 = vst.msk [vmem:[%s6278_s18 + $0x48] sm:$0xff] %vm145_vm0, %v5410_v40  ;;  %v5087_v8 = vpop.f32.mrf.mxu3 }
 0x3fb   : > { %v4871_v46 = vsel %vm2263_vm9, %v4839_v13, %v5979_v11  ;;  %v4872_v3 = vsel %vm2263_vm9, %v4840_v12, %v5980_v29  ;;  %v5185_v53 = vadd.f32 %v9275_v37, %v5087_v8  ;;  %v5380_v37 = vld [vmem:[%s6278_s18 + $0x58] sm:$0xff] }
 0x3fc   : > { %v4903_v30 = vpack.c.bf16 %v4871_v46, %v4871_v46  ;;  %v4904_v22 = vpack.c.bf16 %v4872_v3, %v4872_v3 }
 0x3fe   : > { %v4965_v7 = vunpack.c.l.b16 %v4903_v30  ;;  %v4966_v6 = vunpack.c.l.b16 %v4904_v22 }
 0x3ff   : > { %v5993_v26 = vpop.permute.xlu2 %5992 }
 0x400   : > { %v4982_v15 = vpack.c.b16 %v4966_v6, %v4965_v7  ;;  %v5995_v4 = vunpack.i.h.bf16 %v5993_v26  ;;  %v5994_v49 = vunpack.i.l.bf16 %v5993_v26 }
 0x402   : > { %v4844_v0 = vsel %vm145_vm0, %v9225_v25, %v5995_v4  ;;  %v4843_v2 = vsel %vm145_vm0, %v4412_v38, %v5994_v49  ;;  %v5387_v38 = vld [vmem:[%s6278_s18 + $0x90] sm:$0xff] }
 0x403   : > { %v5983_v24 = vpop.permute.xlu0 %5982 }
 0x404   : > { %v5985_v45 = vunpack.i.h.bf16 %v5983_v24  ;;  %v5984_v32 = vunpack.i.l.bf16 %v5983_v24 }
 0x405   : > { %v5988_v63 = vpop.permute.xlu1 %5987  ;;  %5613 = vmatmul.msk.bf16.gmra.mxu3 %vm2418_vm10, %v4982_v15 }
 0x406   : > { %v5990_v51 = vunpack.i.h.bf16 %v5988_v63  ;;  %v5989_v47 = vunpack.i.l.bf16 %v5988_v63  ;;  %5633 = vmatmul.msk.bf16.gmra.mxu0 %vm2418_vm10, %v4982_v15  ;;  %v4842_v50 = vsel %vm145_vm0, %v4359_v61, %v5985_v45  ;;  %v4841_v21 = vsel %vm145_vm0, %v4411_v10, %v5984_v32  ;;  %v5383_v32 = vld [vmem:[%s6278_s18 + $0x70] sm:$0xff] }
 0x407   : > { %5653 = vmatmul.msk.bf16.gmra.mxu1 %vm2418_vm10, %v4982_v15 }
 0x408   : > { %v4873_v19 = vsel %vm2263_vm9, %v4841_v21, %v5989_v47  ;;  %v4874_v5 = vsel %vm2263_vm9, %v4842_v50, %v5990_v51  ;;  %v9530_v51 = vld [vmem:[#allocation12_spill] sm:$0xff]  ;;  %v5384_v21 = vld [vmem:[%s6278_s18 + $0x78] sm:$0xff] }
 0x409   : > { %v4905_v31 = vpack.c.bf16 %v4873_v19, %v4873_v19  ;;  %v4906_v20 = vpack.c.bf16 %v4874_v5, %v4874_v5 }
 0x40b   : > { %v4967_v57 = vunpack.c.l.b16 %v4905_v31  ;;  %v4968_v35 = vunpack.c.l.b16 %v4906_v20 }
 0x40d   : > { %v4983_v23 = vpack.c.b16 %v4968_v35, %v4967_v57  ;;  %v5385_v35 = vld [vmem:[%s6278_s18 + $0x80] sm:$0xff] }
 0x411   : > { %v5192_v55 = vpop.f32.mrf.mxu0  ;;  %v5282_v18 = vpop.f32.mrf.mxu1 }
 0x412   : > { %v5347_v1 = vadd.f32 %v5282_v18, %v5183_v42 }
 0x414   : > { %v5411_v9 = vadd.f32 %v5379_v44, %v5347_v1 }
 0x415   : > { %5614 = vmatmul.msk.bf16.gmra.mxu3 %vm2418_vm10, %v4983_v23 }
 0x416   : > { %5443 = vst.msk [vmem:[%s6278_s18 + $0x50] sm:$0xff] %vm145_vm0, %v5411_v9  ;;  %v5090_v54 = vpop.f32.mrf.mxu3  ;;  %5634 = vmatmul.msk.bf16.gmra.mxu0 %vm2418_vm10, %v4983_v23  ;;  %v5386_v9 = vld [vmem:[%s6278_s18 + $0x88] sm:$0xff] }
 0x417   : > { %5654 = vmatmul.msk.bf16.gmra.mxu1 %vm2418_vm10, %v4983_v23  ;;  %v5188_v22 = vadd.f32 %v9292_v27, %v5090_v54  ;;  %v5382_v27 = vld [vmem:[%s6278_s18 + $0x68] sm:$0xff] }
 0x418   : > { %v5998_v60 = vpop.permute.xlu0 %5997 }
 0x419   : > { %v6000_v14 = vunpack.i.h.bf16 %v5998_v60  ;;  %v5999_v48 = vunpack.i.l.bf16 %v5998_v60  ;;  %v5284_v41 = vpop.f32.mrf.mxu1  ;;  %v5194_v29 = vpop.f32.mrf.mxu0 }
 0x41a   : > { %v5348_v11 = vadd.f32 %v5284_v41, %v5185_v53 }
 0x41b   : > { %v4876_v28 = vsel %vm2263_vm9, %v4844_v0, %v6000_v14  ;;  %v4875_v43 = vsel %vm2263_vm9, %v4843_v2, %v5999_v48 }
 0x41c   : > { %v4908_v12 = vpack.c.bf16 %v4876_v28, %v4876_v28  ;;  %v4907_v13 = vpack.c.bf16 %v4875_v43, %v4875_v43  ;;  %v5412_v33 = vadd.f32 %v5380_v37, %v5348_v11 }
 0x41e   : > { %v4993_v46 = vunpack.c.l.b16 %v4908_v12  ;;  %v4992_v3 = vunpack.c.l.b16 %v4907_v13  ;;  %5444 = vst.msk [vmem:[%s6278_s18 + $0x58] sm:$0xff] %vm145_vm0, %v5412_v33  ;;  %v5092_v30 = vpop.f32.mrf.mxu3  ;;  %v5389_v33 = vld [vmem:[%s6278_s18 + $0xa0] sm:$0xff] }
 0x41f   : > { %v5190_v39 = vadd.f32 %v5189_v58, %v5092_v30 }
 0x420   : > { %v4994_v25 = vpack.c.b16 %v4993_v46, %v4992_v3 }
 0x423   : > { %v5197_v7 = vpop.f32.mrf.mxu0 }
 0x424   : > { %v5287_v6 = vpop.f32.mrf.mxu1 }
 0x425   : > { %v5349_v62 = vadd.f32 %v5287_v6, %v5188_v22  ;;  %5615 = vmatmul.msk.bf16.gmra.mxu3 %vm2418_vm10, %v4994_v25  ;;  %v5390_v6 = vld [vmem:[%s6278_s18 + $0xa8] sm:$0xff] }
 0x427   : > { %v5413_v36 = vadd.f32 %v5381_v59, %v5349_v62  ;;  %5655 = vmatmul.msk.bf16.gmra.mxu1 %vm2418_vm10, %v4994_v25 }
 0x428   : > { %v5095_v16 = vpop.f32.mrf.mxu3 }
 0x429   : > { %5445 = vst.msk [vmem:[%s6278_s18 + $0x60] sm:$0xff] %vm145_vm0, %v5413_v36  ;;  %v5193_v40 = vadd.f32 %v5192_v55, %v5095_v16 }
 0x42b   : > { %v5199_v52 = vpop.f32.mrf.mxu0 }
 0x42c   : > { %v5289_v15 = vpop.f32.mrf.mxu1 }
 0x42d   : > { %v5350_v17 = vadd.f32 %v5289_v15, %v5190_v39 }
 0x42f   : > { %v5414_v34 = vadd.f32 %v5382_v27, %v5350_v17  ;;  %v5391_v17 = vld [vmem:[%s6278_s18 + $0xb0] sm:$0xff] }
 0x430   : > { %v5097_v24 = vpop.f32.mrf.mxu3 }
 0x431   : > { %5446 = vst.msk [vmem:[%s6278_s18 + $0x68] sm:$0xff] %vm145_vm0, %v5414_v34  ;;  %v5195_v10 = vadd.f32 %v5194_v29, %v5097_v24  ;;  %v5388_v29 = vld [vmem:[%s6278_s18 + $0x98] sm:$0xff] }
 0x433   : > { %v5202_v47 = vpop.f32.mrf.mxu0 }
 0x434   : > { %v5292_v56 = vpop.f32.mrf.mxu1 }
 0x435   : > { %v5351_v45 = vadd.f32 %v5292_v56, %v5193_v40 }
 0x437   : > { %v5415_v63 = vadd.f32 %v5383_v32, %v5351_v45  ;;  %5656 = vmatmul.msk.bf16.gmra.mxu1 %vm2418_vm10, %v9530_v51  ;;  %v5392_v45 = vld [vmem:[%s6278_s18 + $0xb8] sm:$0xff] }
 0x438   : > { %v5100_v61 = vpop.f32.mrf.mxu3 }
 0x439   : > { %5447 = vst.msk [vmem:[%s6278_s18 + $0x70] sm:$0xff] %vm145_vm0, %v5415_v63  ;;  %v5198_v20 = vadd.f32 %v5197_v7, %v5100_v61 }
 0x43b   : > { %v5204_v31 = vpop.f32.mrf.mxu0 }
 0x43c   : > { %v5294_v58 = vpop.f32.mrf.mxu1 }
 0x43d   : > { %v5352_v50 = vadd.f32 %v5294_v58, %v5195_v10  ;;  %v5393_v10 = vld [vmem:[%s6278_s18 + $0xc0] sm:$0xff] }
 0x43f   : > { %v5416_v19 = vadd.f32 %v5384_v21, %v5352_v50 }
 0x440   : > { %v5102_v5 = vpop.f32.mrf.mxu3 }
 0x441   : > { %5448 = vst.msk [vmem:[%s6278_s18 + $0x78] sm:$0xff] %vm145_vm0, %v5416_v19  ;;  %v5200_v18 = vadd.f32 %v5199_v52, %v5102_v5 }
 0x443   : > { %v5207_v1 = vpop.f32.mrf.mxu0 }
 0x444   : > { %v5297_v8 = vpop.f32.mrf.mxu1 }
 0x445   : > { %v5353_v57 = vadd.f32 %v5297_v8, %v5198_v20  ;;  %v5394_v20 = vld [vmem:[%s6278_s18 + $0xc8] sm:$0xff] }
 0x447   : > { %v5417_v42 = vadd.f32 %v5385_v35, %v5353_v57 }
 0x448   : > { %v5105_v55 = vpop.f32.mrf.mxu3 }
 0x449   : > { %5449 = vst.msk [vmem:[%s6278_s18 + $0x80] sm:$0xff] %vm145_vm0, %v5417_v42  ;;  %v5203_v4 = vadd.f32 %v5202_v47, %v5105_v55 }
 0x44b   : > { %v5209_v53 = vpop.f32.mrf.mxu0 }
 0x44c   : > { %v5299_v44 = vpop.f32.mrf.mxu1 }
 0x44d   : > { %v5354_v26 = vadd.f32 %v5299_v44, %v5200_v18 }
 0x44f   : > { %v5418_v23 = vadd.f32 %v5386_v9, %v5354_v26 }
 0x450   : > { %v5107_v54 = vpop.f32.mrf.mxu3 }
 0x451   : > { %5450 = vst.msk [vmem:[%s6278_s18 + $0x88] sm:$0xff] %vm145_vm0, %v5418_v23  ;;  %v5205_v41 = vadd.f32 %v5204_v31, %v5107_v54 }
 0x453   : > { %v5212_v28 = vpop.f32.mrf.mxu0 }
 0x454   : > { %v5302_v49 = vpop.f32.mrf.mxu1 }
 0x455   : > { %v5355_v60 = vadd.f32 %v5302_v49, %v5203_v4  ;;  %v5396_v49 = vld [vmem:[%s6278_s18 + $0xd8] sm:$0xff] }
 0x457   : > { %v5419_v14 = vadd.f32 %v5387_v38, %v5355_v60 }
 0x458   : > { %v5110_v48 = vpop.f32.mrf.mxu3 }
 0x459   : > { %5451 = vst.msk [vmem:[%s6278_s18 + $0x90] sm:$0xff] %vm145_vm0, %v5419_v14  ;;  %v5208_v37 = vadd.f32 %v5207_v1, %v5110_v48  ;;  %v5395_v1 = vld [vmem:[%s6278_s18 + $0xd0] sm:$0xff] }
 0x45b   : > { %v5214_v30 = vpop.f32.mrf.mxu0 }
 0x45c   : > { %v5304_v0 = vpop.f32.mrf.mxu1 }
 0x45d   : > { %v5356_v2 = vadd.f32 %v5304_v0, %v5205_v41  ;;  %v5397_v0 = vld [vmem:[%s6278_s18 + $0xe0] sm:$0xff] }
 0x45f   : > { %v5420_v11 = vadd.f32 %v5388_v29, %v5356_v2 }
 0x460   : > { %v5112_v43 = vpop.f32.mrf.mxu3 }
 0x461   : > { %5452 = vst.msk [vmem:[%s6278_s18 + $0x98] sm:$0xff] %vm145_vm0, %v5420_v11  ;;  %v5210_v25 = vadd.f32 %v5209_v53, %v5112_v43 }
 0x463   : > { %v5217_v16 = vpop.f32.mrf.mxu0 }
 0x464   : > { %v5307_v12 = vpop.f32.mrf.mxu1 }
 0x465   : > { %v5357_v13 = vadd.f32 %v5307_v12, %v5208_v37  ;;  %v5398_v37 = vld [vmem:[%s6278_s18 + $0xe8] sm:$0xff] }
 0x467   : > { %v5421_v46 = vadd.f32 %v5389_v33, %v5357_v13 }
 0x468   : > { %v5115_v3 = vpop.f32.mrf.mxu3 }
 0x469   : > { %5453 = vst.msk [vmem:[%s6278_s18 + $0xa0] sm:$0xff] %vm145_vm0, %v5421_v46  ;;  %v5213_v36 = vadd.f32 %v5212_v28, %v5115_v3 }
 0x46b   : > { %v5219_v56 = vpop.f32.mrf.mxu0 }
 0x46c   : > { %v5309_v22 = vpop.f32.mrf.mxu1 }
 0x46d   : > { %v5358_v7 = vadd.f32 %v5309_v22, %v5210_v25 }
 0x46f   : > { %v5422_v62 = vadd.f32 %v5390_v6, %v5358_v7 }
 0x470   : > { %v5117_v59 = vpop.f32.mrf.mxu3 }
 0x471   : > { %5454 = vst.msk [vmem:[%s6278_s18 + $0xa8] sm:$0xff] %vm145_vm0, %v5422_v62  ;;  %v5215_v34 = vadd.f32 %v5214_v30, %v5117_v59  ;;  %v5399_v30 = vld [vmem:[%s6278_s18 + $0xf0] sm:$0xff] }
 0x473   : > { %v5222_v50 = vpop.f32.mrf.mxu0 }
 0x474   : > { %v5312_v39 = vpop.f32.mrf.mxu1 }
 0x475   : > { %v5359_v15 = vadd.f32 %v5312_v39, %v5213_v36  ;;  %v5400_v36 = vld [vmem:[%s6278_s18 + $0xf8] sm:$0xff] }
 0x477   : > { %v5423_v52 = vadd.f32 %v5391_v17, %v5359_v15 }
 0x478   : > { %v5120_v27 = vpop.f32.mrf.mxu3 }
 0x479   : > { %5455 = vst.msk [vmem:[%s6278_s18 + $0xb0] sm:$0xff] %vm145_vm0, %v5423_v52  ;;  %v5218_v51 = vadd.f32 %v5217_v16, %v5120_v27 }
 0x47b   : > { %v5224_v35 = vpop.f32.mrf.mxu0 }
 0x47c   : > { %v5314_v24 = vpop.f32.mrf.mxu1 }
 0x47d   : > { %v5360_v40 = vadd.f32 %v5314_v24, %v5215_v34 }
 0x47f   : > { %v5424_v32 = vadd.f32 %v5392_v45, %v5360_v40 }
 0x480   : > { %v5122_v63 = vpop.f32.mrf.mxu3 }
 0x481   : > { %5456 = vst.msk [vmem:[%s6278_s18 + $0xb8] sm:$0xff] %vm145_vm0, %v5424_v32  ;;  %v5220_v19 = vadd.f32 %v5219_v56, %v5122_v63 }
 0x483   : > { %v5227_v23 = vpop.f32.mrf.mxu0 }
 0x484   : > { %v5317_v47 = vpop.f32.mrf.mxu1 }
 0x485   : > { %v5361_v61 = vadd.f32 %v5317_v47, %v5218_v51 }
 0x487   : > { %v5425_v58 = vadd.f32 %v5393_v10, %v5361_v61 }
 0x488   : > { %v5125_v21 = vpop.f32.mrf.mxu3 }
 0x489   : > { %5457 = vst.msk [vmem:[%s6278_s18 + $0xc0] sm:$0xff] %vm145_vm0, %v5425_v58  ;;  %v5223_v42 = vadd.f32 %v5222_v50, %v5125_v21 }
 0x48b   : > { %v5229_v41 = vpop.f32.mrf.mxu0 }
 0x48c   : > { %v5319_v5 = vpop.f32.mrf.mxu1 }
 0x48d   : > { %v5362_v31 = vadd.f32 %v5319_v5, %v5220_v19 }
 0x48f   : > { %v5426_v8 = vadd.f32 %v5394_v20, %v5362_v31 }
 0x490   : > { %v5127_v57 = vpop.f32.mrf.mxu3 }
 0x491   : > { %5458 = vst.msk [vmem:[%s6278_s18 + $0xc8] sm:$0xff] %vm145_vm0, %v5426_v8  ;;  %v5225_v9 = vadd.f32 %v5224_v35, %v5127_v57 }
 0x493   : > { %v5232_v13 = vpop.f32.mrf.mxu0 }
 0x494   : > { %v5322_v55 = vpop.f32.mrf.mxu1 }
 0x495   : > { %v5363_v18 = vadd.f32 %v5322_v55, %v5223_v42 }
 0x497   : > { %v5427_v44 = vadd.f32 %v5395_v1, %v5363_v18 }
 0x498   : > { %v5130_v26 = vpop.f32.mrf.mxu3 }
 0x499   : > { %5459 = vst.msk [vmem:[%s6278_s18 + $0xd0] sm:$0xff] %vm145_vm0, %v5427_v44  ;;  %v5228_v53 = vadd.f32 %v5227_v23, %v5130_v26 }
 0x49b   : > { %v5234_v7 = vpop.f32.mrf.mxu0 }
 0x49c   : > { %v5324_v54 = vpop.f32.mrf.mxu1 }
 0x49d   : > { %v5364_v4 = vadd.f32 %v5324_v54, %v5225_v9 }
 0x49f   : > { %v5428_v60 = vadd.f32 %v5396_v49, %v5364_v4 }
 0x4a0   : > { %v5132_v38 = vpop.f32.mrf.mxu3 }
 0x4a1   : > { %5460 = vst.msk [vmem:[%s6278_s18 + $0xd8] sm:$0xff] %vm145_vm0, %v5428_v60  ;;  %v5230_v29 = vadd.f32 %v5229_v41, %v5132_v38 }
 0x4a4   : > { %v5327_v14 = vpop.f32.mrf.mxu1 }
 0x4a5   : > { %v5365_v48 = vadd.f32 %v5327_v14, %v5228_v53 }
 0x4a7   : > { %v5429_v2 = vadd.f32 %v5397_v0, %v5365_v48 }
 0x4a8   : > { %v5135_v43 = vpop.f32.mrf.mxu3 }
 0x4a9   : > { %5461 = vst.msk [vmem:[%s6278_s18 + $0xe0] sm:$0xff] %vm145_vm0, %v5429_v2  ;;  %v5233_v33 = vadd.f32 %v5232_v13, %v5135_v43 }
 0x4ac   : > { %v5329_v11 = vpop.f32.mrf.mxu1 }
 0x4ad   : > { %v5366_v28 = vadd.f32 %v5329_v11, %v5230_v29 }
 0x4af   : > { %v5430_v12 = vadd.f32 %v5398_v37, %v5366_v28 }
 0x4b0   : > { %v5137_v22 = vpop.f32.mrf.mxu3 }
 0x4b1   : > { %5462 = vst.msk [vmem:[%s6278_s18 + $0xe8] sm:$0xff] %vm145_vm0, %v5430_v12  ;;  %v5235_v6 = vadd.f32 %v5234_v7, %v5137_v22 }
 0x4b4   : > { %v5332_v46 = vpop.f32.mrf.mxu1 }
 0x4b5   : > { %v5367_v3 = vadd.f32 %v5332_v46, %v5233_v33 }
 0x4b7   : > { %v5431_v25 = vadd.f32 %v5399_v30, %v5367_v3 }
 0x4b9   : > { %5463 = vst.msk [vmem:[%s6278_s18 + $0xf0] sm:$0xff] %vm145_vm0, %v5431_v25 }
 0x4bc   : > { %v5334_v62 = vpop.f32.mrf.mxu1 }
 0x4bd   : > { %v5368_v59 = vadd.f32 %v5334_v62, %v5235_v6 }
 0x4bf   : > { %v5432_v16 = vadd.f32 %v5400_v36, %v5368_v59 }
 0x4c1   : > { %5464 = vst.msk [vmem:[%s6278_s18 + $0xf8] sm:$0xff] %vm145_vm0, %v5432_v16 }
 0x4c2 PF: > { %s12_s9 = sadd.s32 1, %s6013_s9  }
 0x4c3   : > { %p9_p4 = scmp.ge.s32.totalorder %s12_s9, 4  }
 0x4c5   :  { %11 = sbr.rel (!%p9_p4) target bundleno = 1 (0x1), region = 68 }

</bundles_post_ra>
